<compile_context>
chip_gen: v6e
topology: v6e:2x2x1
jax: 0.10.0
libtpu: 0.0.40
codegen_flags: <defaults>
</compile_context>

<pallas_src>
import jax
import jax.numpy as jnp
from jax import lax
from jax.experimental import pallas as pl
from jax.experimental.pallas import tpu as pltpu

BN_EPS = 1e-5


def _make_bottleneck_kernel(H, W):
    """Kernel factory; H, W static so the 3x3 taps unroll into 9 accumulating matmuls."""

    def kernel(x_ref, w1_ref, b1_ref, w2_ref, b2_ref, w3_ref, b3_ref, out_ref, ypad_ref):
        # x_ref:    (Bt, H*W, Cin)         f32 activations (channels on lanes)
        # w1_ref:   (Cin, width)           bf16, BN1 scale folded in
        # w2_ref:   (9, width, width)      bf16, BN2 scale folded in, tap-major (kh*3+kw)
        # w3_ref:   (width, Cout)          bf16, BN3 scale folded in
        # b*_ref:   (1, C)                 f32 folded BN shifts
        # out_ref:  (Bt, H*W, Cout)        f32
        # ypad_ref: (Bt, H+2, W+2, width)  bf16 VMEM scratch (zero halo for the 3x3 conv)
        Bt = x_ref.shape[0]
        Cin = x_ref.shape[2]
        width = w1_ref.shape[1]
        Cout = w3_ref.shape[1]
        HW = H * W
        M = Bt * HW

        x = x_ref[...].reshape(M, Cin)                         # f32; residual stays f32

        # ---- conv1 (1x1) + bn1 + relu : bf16 operands, f32 accumulate ----
        y1 = jnp.dot(x.astype(jnp.bfloat16), w1_ref[...],
                     preferred_element_type=jnp.float32)
        y1 = jnp.maximum(y1 + b1_ref[...], 0.0)                # (M, width) f32
        y1b = y1.astype(jnp.bfloat16)                          # cast BEFORE padding

        # ---- conv2 (3x3, stride 1, pad 1): halo scratch + 9 accumulating matmuls ----
        # Zero only the 1-element halo border (scratch persists across grid steps, and
        # with a "parallel" grid axis there is no safe "first step" to init it on).
        ypad_ref[:, 0:1, :, :] = jnp.zeros((Bt, 1, W + 2, width), jnp.bfloat16)
        ypad_ref[:, H + 1:H + 2, :, :] = jnp.zeros((Bt, 1, W + 2, width), jnp.bfloat16)
        ypad_ref[:, :, 0:1, :] = jnp.zeros((Bt, H + 2, 1, width), jnp.bfloat16)
        ypad_ref[:, :, W + 1:W + 2, :] = jnp.zeros((Bt, H + 2, 1, width), jnp.bfloat16)
        ypad_ref[:, 1:H + 1, 1:W + 1, :] = y1b.reshape(Bt, H, W, width)

        acc = jnp.zeros((M, width), jnp.float32)
        for kh in range(3):
            for kw in range(3):
                tap = ypad_ref[:, kh:kh + H, kw:kw + W, :].reshape(M, width)  # bf16
                acc = acc + jnp.dot(tap, w2_ref[kh * 3 + kw],
                                    preferred_element_type=jnp.float32)
        y2 = jnp.maximum(acc + b2_ref[...], 0.0)               # (M, width) f32

        # ---- conv3 (1x1) + bn3, then residual add (exact f32 identity) + relu ----
        y3 = jnp.dot(y2.astype(jnp.bfloat16), w3_ref[...],
                     preferred_element_type=jnp.float32)
        y3 = y3 + b3_ref[...]
        out = jnp.maximum(y3 + x, 0.0)                         # (M, Cout) f32
        out_ref[...] = out.reshape(Bt, HW, Cout)

    return kernel


def prepare_params(w1, bn1, w2_hwio, bn2, w3, bn3):
    """One-time host-side precompute: fold BN scale into the conv weights, keep the BN
    shift as a per-channel f32 bias, flatten the 3x3 kernel to tap-major (9, ci, co)
    and cast matmul operands to bf16."""
    def fold(w, bn, out_axis):
        gamma, beta, mean, var = bn
        scale = gamma / jnp.sqrt(var + BN_EPS)
        shift = beta - mean * scale
        shape = [1] * w.ndim
        shape[out_axis] = -1
        return ((w * scale.reshape(shape)).astype(jnp.bfloat16),
                shift.reshape(1, -1).astype(jnp.float32))

    w1s, b1 = fold(w1, bn1, 1)               # (Cin, width)
    w2s, b2 = fold(w2_hwio, bn2, 3)          # (3, 3, width, width)  HWIO
    w3s, b3 = fold(w3, bn3, 1)               # (width, Cout)
    width = w2_hwio.shape[2]
    w2t = w2s.reshape(9, width, width)       # tap index = kh*3 + kw, matches the kernel
    return (w1s, b1, w2t, b2, w3s, b3)


@jax.jit
def bottleneck_pallas(x_nhwc, params):
    """x_nhwc: (N, H, W, Cin) float32 NHWC.  Returns (N, H, W, Cout) float32."""
    w1, b1, w2, b2, w3, b3 = params
    N, H, W, Cin = x_nhwc.shape
    width = w1.shape[1]
    Cout = w3.shape[1]
    assert Cin == Cout, "identity shortcut requires Cin == Cout (downsample branch is TODO)"
    HW = H * W

    # Batch tiling: target ~512 matmul rows per grid step (MXU sublane fill, per-step
    # overhead amortization, enough steps per core for double-buffering).
    Bt = max(1, min(N, max(1, 512 // HW)))
    G = pl.cdiv(N, Bt)
    Np = G * Bt

    x = x_nhwc.reshape(N, HW, Cin)
    if Np != N:
        x = jnp.pad(x, ((0, Np - N), (0, 0), (0, 0)))

    # Advisory cost + VMEM budget (double-buffered I/O tiles + scratch + intermediates).
    flops = 2 * N * HW * (Cin * width + 9 * width * width + width * Cout)
    w_bytes = (w1.size + w2.size + w3.size) * 2 + (b1.size + b2.size + b3.size) * 4
    in_bytes = Bt * HW * Cin * 4
    out_bytes = Bt * HW * Cout * 4
    pad_bytes = Bt * (H + 2) * (W + 2) * width * 2
    interm_bytes = Bt * HW * (3 * width + Cout) * 4
    vmem_need = 2 * (in_bytes + out_bytes) + w_bytes + pad_bytes + interm_bytes + (4 << 20)
    # TODO(synk): raise the 48 MiB cap on v5e/v6e (128 MiB physical VMEM) for big tiles.
    vmem_limit = int(min(48 << 20, max(16 << 20, vmem_need)))

    out = pl.pallas_call(
        _make_bottleneck_kernel(H, W),
        out_shape=jax.ShapeDtypeStruct((Np, HW, Cout), jnp.float32),
        grid=(G,),
        in_specs=[
            pl.BlockSpec((Bt, HW, Cin), lambda n: (n, 0, 0)),   # activations: Bt images/step
            pl.BlockSpec((Cin, width), lambda n: (0, 0)),        # weights: VMEM resident
            pl.BlockSpec((1, width), lambda n: (0, 0)),
            pl.BlockSpec((9, width, width), lambda n: (0, 0, 0)),
            pl.BlockSpec((1, width), lambda n: (0, 0)),
            pl.BlockSpec((width, Cout), lambda n: (0, 0)),
            pl.BlockSpec((1, Cout), lambda n: (0, 0)),
        ],
        out_specs=pl.BlockSpec((Bt, HW, Cout), lambda n: (n, 0, 0)),
        scratch_shapes=[pltpu.VMEM((Bt, H + 2, W + 2, width), jnp.bfloat16)],
        compiler_params=pltpu.CompilerParams(
            dimension_semantics=("parallel",),      # shards batch tiles across TCs
            vmem_limit_bytes=vmem_limit,
        ),
        cost_estimate=pl.CostEstimate(
            flops=flops, transcendentals=0,
            bytes_accessed=N * HW * (Cin + Cout) * 4 + w_bytes),
    )(x, w1, b1, w2, b2, w3, b3)

    return out[:N].reshape(N, H, W, Cout)


def reference_forward(x_nhwc, params):
    """Pure-JAX reference (lax convs) mirroring the kernel's numerics (bf16 conv
    operands, f32 accumulate, exact f32 identity path)."""
    w1, b1, w2, b2, w3, b3 = params
    Cin, width = w1.shape
    Cout = w3.shape[1]
    dn = ('NHWC', 'HWIO', 'NHWC')
    xb = x_nhwc.astype(jnp.bfloat16)
    y = lax.conv_general_dilated(xb, w1.reshape(1, 1, Cin, width), (1, 1), 'VALID',
                                 dimension_numbers=dn,
                                 preferred_element_type=jnp.float32)
    y = jnp.maximum(y + b1, 0.0).astype(jnp.bfloat16)
    y = lax.conv_general_dilated(y, w2.reshape(3, 3, width, width), (1, 1),
                                 ((1, 1), (1, 1)), dimension_numbers=dn,
                                 preferred_element_type=jnp.float32)
    y = jnp.maximum(y + b2, 0.0).astype(jnp.bfloat16)
    y = lax.conv_general_dilated(y, w3.reshape(1, 1, width, Cout), (1, 1), 'VALID',
                                 dimension_numbers=dn,
                                 preferred_element_type=jnp.float32)
    y = y + b3
    return jnp.maximum(y + x_nhwc, 0.0)     # f32 identity, matching the kernel


if __name__ == "__main__":
    # Module config: Bottleneck(in_channel=64, out_channel=16) with defaults
    # -> width = 16, output channels = 16 * expansion(4) = 64 = in_channel,
    # so the identity shortcut (downsample=None) is valid.
    in_channel, out_channel = 64, 16
    groups, width_per_group, expansion = 1, 64, 4
    width = int(out_channel * (width_per_group / 64.0)) * groups   # 16
    c_out = out_channel * expansion                                # 64
    N, H, W = 2, 8, 8

    key = jax.random.PRNGKey(0)
    ks = jax.random.split(key, 8)

    x = jax.random.normal(ks[0], (N, H, W, in_channel), dtype=jnp.float32)

    w1 = jax.random.normal(ks[1], (in_channel, width), dtype=jnp.float32) * 0.05
    w2 = jax.random.normal(ks[2], (3, 3, width, width), dtype=jnp.float32) * 0.05
    w3 = jax.random.normal(ks[3], (width, c_out), dtype=jnp.float32) * 0.05

    def bn_raw(k, c):
        kg, kb, km, kv = jax.random.split(k, 4)
        return (jax.random.uniform(kg, (c,), minval=0.5, maxval=1.5),
                jax.random.normal(kb, (c,)) * 0.1,
                jax.random.normal(km, (c,)) * 0.1,
                jax.random.uniform(kv, (c,), minval=0.5, maxval=1.5))

    bn1 = bn_raw(ks[4], width)
    bn2 = bn_raw(ks[5], width)
    bn3 = bn_raw(ks[6], c_out)

    params = prepare_params(w1, bn1, w2, bn2, w3, bn3)

    out = jax.block_until_ready(bottleneck_pallas(x, params))
    ref = jax.block_until_ready(reference_forward(x, params))

    assert out.shape == (N, H, W, c_out), out.shape
    max_err = jnp.max(jnp.abs(out - ref))
    assert jnp.allclose(out, ref, atol=1e-2, rtol=1e-2), f"max abs err {max_err}"

    print("KERNEL_OK")
</pallas_src>

<mosaic_0001>
module attributes {stable_mosaic.version = 11 : i64} {
  func.func @kernel(%arg0: i32, %arg1: memref<2x64x64xf32, #tpu.memory_space<vmem>>, %arg2: memref<64x16xbf16, #tpu.memory_space<vmem>>, %arg3: memref<1x16xf32, #tpu.memory_space<vmem>>, %arg4: memref<9x16x16xbf16, #tpu.memory_space<vmem>>, %arg5: memref<1x16xf32, #tpu.memory_space<vmem>>, %arg6: memref<16x64xbf16, #tpu.memory_space<vmem>>, %arg7: memref<1x64xf32, #tpu.memory_space<vmem>>, %arg8: memref<2x64x64xf32, #tpu.memory_space<vmem>>, %arg9: memref<2x10x10x16xbf16, #tpu.memory_space<vmem>>) attributes {dimension_semantics = [#tpu.dimension_semantics<parallel>], iteration_bounds = array<i64: 1>, scalar_prefetch = 0 : i64, scratch_operands = 1 : i64, tpu.core_type = #tpu.core_type<tc>, window_params = [{transform_indices = @transform_0, window_bounds = array<i64: 2, 64, 64>}, {pipeline_mode = #tpu.pipeline_mode<synchronous>, transform_indices = @transform_1, window_bounds = array<i64: 64, 16>}, {pipeline_mode = #tpu.pipeline_mode<synchronous>, transform_indices = @transform_2, window_bounds = array<i64: 1, 16>}, {pipeline_mode = #tpu.pipeline_mode<synchronous>, transform_indices = @transform_3, window_bounds = array<i64: 9, 16, 16>}, {pipeline_mode = #tpu.pipeline_mode<synchronous>, transform_indices = @transform_4, window_bounds = array<i64: 1, 16>}, {pipeline_mode = #tpu.pipeline_mode<synchronous>, transform_indices = @transform_5, window_bounds = array<i64: 16, 64>}, {pipeline_mode = #tpu.pipeline_mode<synchronous>, transform_indices = @transform_6, window_bounds = array<i64: 1, 64>}, {transform_indices = @transform_7, window_bounds = array<i64: 2, 64, 64>}]} {
    %c0 = arith.constant 0 : index
    %c0_0 = arith.constant 0 : index
    %c0_1 = arith.constant 0 : index
    %0 = vector.load %arg1[%c0, %c0_0, %c0_1] : memref<2x64x64xf32, #tpu.memory_space<vmem>>, vector<2x64x64xf32>
    %1 = vector.shape_cast %0 : vector<2x64x64xf32> to vector<128x64xf32>
    %2 = arith.truncf %1 : vector<128x64xf32> to vector<128x64xbf16>
    %c0_2 = arith.constant 0 : index
    %c0_3 = arith.constant 0 : index
    %3 = vector.load %arg2[%c0_2, %c0_3] : memref<64x16xbf16, #tpu.memory_space<vmem>>, vector<64x16xbf16>
    %cst = arith.constant dense<0.000000e+00> : vector<128x16xf32>
    %4 = tpu.matmul %2, %3, %cst {dimension_numbers = #tpu.dot_dimension_numbers<[1], [0], [0], [1], [0, 0, 1, 1], [], []>} : vector<128x64xbf16>, vector<64x16xbf16>, vector<128x16xf32> -> vector<128x16xf32>
    %c0_4 = arith.constant 0 : index
    %c0_5 = arith.constant 0 : index
    %5 = vector.load %arg3[%c0_4, %c0_5] : memref<1x16xf32, #tpu.memory_space<vmem>>, vector<1x16xf32>
    %6 = vector.broadcast %5 : vector<1x16xf32> to vector<128x16xf32>
    %7 = arith.addf %4, %6 : vector<128x16xf32>
    %cst_6 = arith.constant 0.000000e+00 : f32
    %8 = vector.broadcast %cst_6 : f32 to vector<128x16xf32>
    %9 = arith.maximumf %7, %8 : vector<128x16xf32>
    %10 = arith.truncf %9 : vector<128x16xf32> to vector<128x16xbf16>
    %cst_7 = arith.constant 0.000000e+00 : bf16
    %11 = vector.broadcast %cst_7 : bf16 to vector<2x1x10x16xbf16>
    %c0_8 = arith.constant 0 : index
    %c0_9 = arith.constant 0 : index
    %c0_10 = arith.constant 0 : index
    %c0_11 = arith.constant 0 : index
    %12 = vector.load %arg9[%c0_8, %c0_9, %c0_10, %c0_11] : memref<2x10x10x16xbf16, #tpu.memory_space<vmem>>, vector<2x1x10x16xbf16>
    tpu.vector_store %arg9[%c0_8, %c0_9, %c0_10, %c0_11], %11 {strides = array<i32>} : memref<2x10x10x16xbf16, #tpu.memory_space<vmem>>, vector<2x1x10x16xbf16>,
    %cst_12 = arith.constant 0.000000e+00 : bf16
    %13 = vector.broadcast %cst_12 : bf16 to vector<2x1x10x16xbf16>
    %c0_13 = arith.constant 0 : index
    %c9 = arith.constant 9 : index
    %c0_14 = arith.constant 0 : index
    %c0_15 = arith.constant 0 : index
    %14 = vector.load %arg9[%c0_13, %c9, %c0_14, %c0_15] : memref<2x10x10x16xbf16, #tpu.memory_space<vmem>>, vector<2x1x10x16xbf16>
    tpu.vector_store %arg9[%c0_13, %c9, %c0_14, %c0_15], %13 {strides = array<i32>} : memref<2x10x10x16xbf16, #tpu.memory_space<vmem>>, vector<2x1x10x16xbf16>,
    %cst_16 = arith.constant 0.000000e+00 : bf16
    %15 = vector.broadcast %cst_16 : bf16 to vector<2x10x1x16xbf16>
    %c0_17 = arith.constant 0 : index
    %c0_18 = arith.constant 0 : index
    %c0_19 = arith.constant 0 : index
    %c0_20 = arith.constant 0 : index
    %16 = vector.load %arg9[%c0_17, %c0_18, %c0_19, %c0_20] : memref<2x10x10x16xbf16, #tpu.memory_space<vmem>>, vector<2x10x1x16xbf16>
    tpu.vector_store %arg9[%c0_17, %c0_18, %c0_19, %c0_20], %15 {strides = array<i32>} : memref<2x10x10x16xbf16, #tpu.memory_space<vmem>>, vector<2x10x1x16xbf16>,
    %cst_21 = arith.constant 0.000000e+00 : bf16
    %17 = vector.broadcast %cst_21 : bf16 to vector<2x10x1x16xbf16>
    %c0_22 = arith.constant 0 : index
    %c0_23 = arith.constant 0 : index
    %c9_24 = arith.constant 9 : index
    %c0_25 = arith.constant 0 : index
    %18 = vector.load %arg9[%c0_22, %c0_23, %c9_24, %c0_25] : memref<2x10x10x16xbf16, #tpu.memory_space<vmem>>, vector<2x10x1x16xbf16>
    tpu.vector_store %arg9[%c0_22, %c0_23, %c9_24, %c0_25], %17 {strides = array<i32>} : memref<2x10x10x16xbf16, #tpu.memory_space<vmem>>, vector<2x10x1x16xbf16>,
    %19 = vector.shape_cast %10 : vector<128x16xbf16> to vector<2x8x8x16xbf16>
    %c0_26 = arith.constant 0 : index
    %c1 = arith.constant 1 : index
    %c1_27 = arith.constant 1 : index
    %c0_28 = arith.constant 0 : index
    %20 = vector.load %arg9[%c0_26, %c1, %c1_27, %c0_28] : memref<2x10x10x16xbf16, #tpu.memory_space<vmem>>, vector<2x8x8x16xbf16>
    tpu.vector_store %arg9[%c0_26, %c1, %c1_27, %c0_28], %19 {strides = array<i32>} : memref<2x10x10x16xbf16, #tpu.memory_space<vmem>>, vector<2x8x8x16xbf16>,
    %cst_29 = arith.constant 0.000000e+00 : f32
    %21 = vector.broadcast %cst_29 : f32 to vector<128x16xf32>
    %c0_30 = arith.constant 0 : index
    %c0_31 = arith.constant 0 : index
    %c0_32 = arith.constant 0 : index
    %c0_33 = arith.constant 0 : index
    %22 = vector.load %arg9[%c0_30, %c0_31, %c0_32, %c0_33] : memref<2x10x10x16xbf16, #tpu.memory_space<vmem>>, vector<2x8x8x16xbf16>
    %23 = vector.shape_cast %22 : vector<2x8x8x16xbf16> to vector<128x16xbf16>
    %c0_34 = arith.constant 0 : index
    %c0_35 = arith.constant 0 : index
    %c0_36 = arith.constant 0 : index
    %24 = vector.load %arg4[%c0_34, %c0_35, %c0_36] : memref<9x16x16xbf16, #tpu.memory_space<vmem>>, vector<1x16x16xbf16>
    %25 = vector.shape_cast %24 : vector<1x16x16xbf16> to vector<16x16xbf16>
    %cst_37 = arith.constant dense<0.000000e+00> : vector<128x16xf32>
    %26 = tpu.matmul %23, %25, %cst_37 {dimension_numbers = #tpu.dot_dimension_numbers<[1], [0], [0], [1], [0, 0, 1, 1], [], []>} : vector<128x16xbf16>, vector<16x16xbf16>, vector<128x16xf32> -> vector<128x16xf32>
    %27 = arith.addf %21, %26 : vector<128x16xf32>
    %c0_38 = arith.constant 0 : index
    %c0_39 = arith.constant 0 : index
    %c1_40 = arith.constant 1 : index
    %c0_41 = arith.constant 0 : index
    %28 = vector.load %arg9[%c0_38, %c0_39, %c1_40, %c0_41] : memref<2x10x10x16xbf16, #tpu.memory_space<vmem>>, vector<2x8x8x16xbf16>
    %29 = vector.shape_cast %28 : vector<2x8x8x16xbf16> to vector<128x16xbf16>
    %c1_42 = arith.constant 1 : index
    %c0_43 = arith.constant 0 : index
    %c0_44 = arith.constant 0 : index
    %30 = vector.load %arg4[%c1_42, %c0_43, %c0_44] : memref<9x16x16xbf16, #tpu.memory_space<vmem>>, vector<1x16x16xbf16>
    %31 = vector.shape_cast %30 : vector<1x16x16xbf16> to vector<16x16xbf16>
    %cst_45 = arith.constant dense<0.000000e+00> : vector<128x16xf32>
    %32 = tpu.matmul %29, %31, %cst_45 {dimension_numbers = #tpu.dot_dimension_numbers<[1], [0], [0], [1], [0, 0, 1, 1], [], []>} : vector<128x16xbf16>, vector<16x16xbf16>, vector<128x16xf32> -> vector<128x16xf32>
    %33 = arith.addf %27, %32 : vector<128x16xf32>
    %c0_46 = arith.constant 0 : index
    %c0_47 = arith.constant 0 : index
    %c2 = arith.constant 2 : index
    %c0_48 = arith.constant 0 : index
    %34 = vector.load %arg9[%c0_46, %c0_47, %c2, %c0_48] : memref<2x10x10x16xbf16, #tpu.memory_space<vmem>>, vector<2x8x8x16xbf16>
    %35 = vector.shape_cast %34 : vector<2x8x8x16xbf16> to vector<128x16xbf16>
    %c2_49 = arith.constant 2 : index
    %c0_50 = arith.constant 0 : index
    %c0_51 = arith.constant 0 : index
    %36 = vector.load %arg4[%c2_49, %c0_50, %c0_51] : memref<9x16x16xbf16, #tpu.memory_space<vmem>>, vector<1x16x16xbf16>
    %37 = vector.shape_cast %36 : vector<1x16x16xbf16> to vector<16x16xbf16>
    %cst_52 = arith.constant dense<0.000000e+00> : vector<128x16xf32>
    %38 = tpu.matmul %35, %37, %cst_52 {dimension_numbers = #tpu.dot_dimension_numbers<[1], [0], [0], [1], [0, 0, 1, 1], [], []>} : vector<128x16xbf16>, vector<16x16xbf16>, vector<128x16xf32> -> vector<128x16xf32>
    %39 = arith.addf %33, %38 : vector<128x16xf32>
    %c0_53 = arith.constant 0 : index
    %c1_54 = arith.constant 1 : index
    %c0_55 = arith.constant 0 : index
    %c0_56 = arith.constant 0 : index
    %40 = vector.load %arg9[%c0_53, %c1_54, %c0_55, %c0_56] : memref<2x10x10x16xbf16, #tpu.memory_space<vmem>>, vector<2x8x8x16xbf16>
    %41 = vector.shape_cast %40 : vector<2x8x8x16xbf16> to vector<128x16xbf16>
    %c3 = arith.constant 3 : index
    %c0_57 = arith.constant 0 : index
    %c0_58 = arith.constant 0 : index
    %42 = vector.load %arg4[%c3, %c0_57, %c0_58] : memref<9x16x16xbf16, #tpu.memory_space<vmem>>, vector<1x16x16xbf16>
    %43 = vector.shape_cast %42 : vector<1x16x16xbf16> to vector<16x16xbf16>
    %cst_59 = arith.constant dense<0.000000e+00> : vector<128x16xf32>
    %44 = tpu.matmul %41, %43, %cst_59 {dimension_numbers = #tpu.dot_dimension_numbers<[1], [0], [0], [1], [0, 0, 1, 1], [], []>} : vector<128x16xbf16>, vector<16x16xbf16>, vector<128x16xf32> -> vector<128x16xf32>
    %45 = arith.addf %39, %44 : vector<128x16xf32>
    %c0_60 = arith.constant 0 : index
    %c1_61 = arith.constant 1 : index
    %c1_62 = arith.constant 1 : index
    %c0_63 = arith.constant 0 : index
    %46 = vector.load %arg9[%c0_60, %c1_61, %c1_62, %c0_63] : memref<2x10x10x16xbf16, #tpu.memory_space<vmem>>, vector<2x8x8x16xbf16>
    %47 = vector.shape_cast %46 : vector<2x8x8x16xbf16> to vector<128x16xbf16>
    %c4 = arith.constant 4 : index
    %c0_64 = arith.constant 0 : index
    %c0_65 = arith.constant 0 : index
    %48 = vector.load %arg4[%c4, %c0_64, %c0_65] : memref<9x16x16xbf16, #tpu.memory_space<vmem>>, vector<1x16x16xbf16>
    %49 = vector.shape_cast %48 : vector<1x16x16xbf16> to vector<16x16xbf16>
    %cst_66 = arith.constant dense<0.000000e+00> : vector<128x16xf32>
    %50 = tpu.matmul %47, %49, %cst_66 {dimension_numbers = #tpu.dot_dimension_numbers<[1], [0], [0], [1], [0, 0, 1, 1], [], []>} : vector<128x16xbf16>, vector<16x16xbf16>, vector<128x16xf32> -> vector<128x16xf32>
    %51 = arith.addf %45, %50 : vector<128x16xf32>
    %c0_67 = arith.constant 0 : index
    %c1_68 = arith.constant 1 : index
    %c2_69 = arith.constant 2 : index
    %c0_70 = arith.constant 0 : index
    %52 = vector.load %arg9[%c0_67, %c1_68, %c2_69, %c0_70] : memref<2x10x10x16xbf16, #tpu.memory_space<vmem>>, vector<2x8x8x16xbf16>
    %53 = vector.shape_cast %52 : vector<2x8x8x16xbf16> to vector<128x16xbf16>
    %c5 = arith.constant 5 : index
    %c0_71 = arith.constant 0 : index
    %c0_72 = arith.constant 0 : index
    %54 = vector.load %arg4[%c5, %c0_71, %c0_72] : memref<9x16x16xbf16, #tpu.memory_space<vmem>>, vector<1x16x16xbf16>
    %55 = vector.shape_cast %54 : vector<1x16x16xbf16> to vector<16x16xbf16>
    %cst_73 = arith.constant dense<0.000000e+00> : vector<128x16xf32>
    %56 = tpu.matmul %53, %55, %cst_73 {dimension_numbers = #tpu.dot_dimension_numbers<[1], [0], [0], [1], [0, 0, 1, 1], [], []>} : vector<128x16xbf16>, vector<16x16xbf16>, vector<128x16xf32> -> vector<128x16xf32>
    %57 = arith.addf %51, %56 : vector<128x16xf32>
    %c0_74 = arith.constant 0 : index
    %c2_75 = arith.constant 2 : index
    %c0_76 = arith.constant 0 : index
    %c0_77 = arith.constant 0 : index
    %58 = vector.load %arg9[%c0_74, %c2_75, %c0_76, %c0_77] : memref<2x10x10x16xbf16, #tpu.memory_space<vmem>>, vector<2x8x8x16xbf16>
    %59 = vector.shape_cast %58 : vector<2x8x8x16xbf16> to vector<128x16xbf16>
    %c6 = arith.constant 6 : index
    %c0_78 = arith.constant 0 : index
    %c0_79 = arith.constant 0 : index
    %60 = vector.load %arg4[%c6, %c0_78, %c0_79] : memref<9x16x16xbf16, #tpu.memory_space<vmem>>, vector<1x16x16xbf16>
    %61 = vector.shape_cast %60 : vector<1x16x16xbf16> to vector<16x16xbf16>
    %cst_80 = arith.constant dense<0.000000e+00> : vector<128x16xf32>
    %62 = tpu.matmul %59, %61, %cst_80 {dimension_numbers = #tpu.dot_dimension_numbers<[1], [0], [0], [1], [0, 0, 1, 1], [], []>} : vector<128x16xbf16>, vector<16x16xbf16>, vector<128x16xf32> -> vector<128x16xf32>
    %63 = arith.addf %57, %62 : vector<128x16xf32>
    %c0_81 = arith.constant 0 : index
    %c2_82 = arith.constant 2 : index
    %c1_83 = arith.constant 1 : index
    %c0_84 = arith.constant 0 : index
    %64 = vector.load %arg9[%c0_81, %c2_82, %c1_83, %c0_84] : memref<2x10x10x16xbf16, #tpu.memory_space<vmem>>, vector<2x8x8x16xbf16>
    %65 = vector.shape_cast %64 : vector<2x8x8x16xbf16> to vector<128x16xbf16>
    %c7 = arith.constant 7 : index
    %c0_85 = arith.constant 0 : index
    %c0_86 = arith.constant 0 : index
    %66 = vector.load %arg4[%c7, %c0_85, %c0_86] : memref<9x16x16xbf16, #tpu.memory_space<vmem>>, vector<1x16x16xbf16>
    %67 = vector.shape_cast %66 : vector<1x16x16xbf16> to vector<16x16xbf16>
    %cst_87 = arith.constant dense<0.000000e+00> : vector<128x16xf32>
    %68 = tpu.matmul %65, %67, %cst_87 {dimension_numbers = #tpu.dot_dimension_numbers<[1], [0], [0], [1], [0, 0, 1, 1], [], []>} : vector<128x16xbf16>, vector<16x16xbf16>, vector<128x16xf32> -> vector<128x16xf32>
    %69 = arith.addf %63, %68 : vector<128x16xf32>
    %c0_88 = arith.constant 0 : index
    %c2_89 = arith.constant 2 : index
    %c2_90 = arith.constant 2 : index
    %c0_91 = arith.constant 0 : index
    %70 = vector.load %arg9[%c0_88, %c2_89, %c2_90, %c0_91] : memref<2x10x10x16xbf16, #tpu.memory_space<vmem>>, vector<2x8x8x16xbf16>
    %71 = vector.shape_cast %70 : vector<2x8x8x16xbf16> to vector<128x16xbf16>
    %c8 = arith.constant 8 : index
    %c0_92 = arith.constant 0 : index
    %c0_93 = arith.constant 0 : index
    %72 = vector.load %arg4[%c8, %c0_92, %c0_93] : memref<9x16x16xbf16, #tpu.memory_space<vmem>>, vector<1x16x16xbf16>
    %73 = vector.shape_cast %72 : vector<1x16x16xbf16> to vector<16x16xbf16>
    %cst_94 = arith.constant dense<0.000000e+00> : vector<128x16xf32>
    %74 = tpu.matmul %71, %73, %cst_94 {dimension_numbers = #tpu.dot_dimension_numbers<[1], [0], [0], [1], [0, 0, 1, 1], [], []>} : vector<128x16xbf16>, vector<16x16xbf16>, vector<128x16xf32> -> vector<128x16xf32>
    %75 = arith.addf %69, %74 : vector<128x16xf32>
    %c0_95 = arith.constant 0 : index
    %c0_96 = arith.constant 0 : index
    %76 = vector.load %arg5[%c0_95, %c0_96] : memref<1x16xf32, #tpu.memory_space<vmem>>, vector<1x16xf32>
    %77 = vector.broadcast %76 : vector<1x16xf32> to vector<128x16xf32>
    %78 = arith.addf %75, %77 : vector<128x16xf32>
    %cst_97 = arith.constant 0.000000e+00 : f32
    %79 = vector.broadcast %cst_97 : f32 to vector<128x16xf32>
    %80 = arith.maximumf %78, %79 : vector<128x16xf32>
    %81 = arith.truncf %80 : vector<128x16xf32> to vector<128x16xbf16>
    %c0_98 = arith.constant 0 : index
    %c0_99 = arith.constant 0 : index
    %82 = vector.load %arg6[%c0_98, %c0_99] : memref<16x64xbf16, #tpu.memory_space<vmem>>, vector<16x64xbf16>
    %cst_100 = arith.constant dense<0.000000e+00> : vector<128x64xf32>
    %83 = tpu.matmul %81, %82, %cst_100 {dimension_numbers = #tpu.dot_dimension_numbers<[1], [0], [0], [1], [0, 0, 1, 1], [], []>} : vector<128x16xbf16>, vector<16x64xbf16>, vector<128x64xf32> -> vector<128x64xf32>
    %c0_101 = arith.constant 0 : index
    %c0_102 = arith.constant 0 : index
    %84 = vector.load %arg7[%c0_101, %c0_102] : memref<1x64xf32, #tpu.memory_space<vmem>>, vector<1x64xf32>
    %85 = vector.broadcast %84 : vector<1x64xf32> to vector<128x64xf32>
    %86 = arith.addf %83, %85 : vector<128x64xf32>
    %87 = arith.addf %86, %1 : vector<128x64xf32>
    %cst_103 = arith.constant 0.000000e+00 : f32
    %88 = vector.broadcast %cst_103 : f32 to vector<128x64xf32>
    %89 = arith.maximumf %87, %88 : vector<128x64xf32>
    %90 = vector.shape_cast %89 : vector<128x64xf32> to vector<2x64x64xf32>
    %c0_104 = arith.constant 0 : index
    %c0_105 = arith.constant 0 : index
    %c0_106 = arith.constant 0 : index
    %91 = vector.load %arg8[%c0_104, %c0_105, %c0_106] : memref<2x64x64xf32, #tpu.memory_space<vmem>>, vector<2x64x64xf32>
    tpu.vector_store %arg8[%c0_104, %c0_105, %c0_106], %90 {strides = array<i32>} : memref<2x64x64xf32, #tpu.memory_space<vmem>>, vector<2x64x64xf32>,
    return
  }
  func.func @transform_0(%arg0: i32) -> (i32, i32, i32) {
    %c0_i32 = arith.constant 0 : i32
    %c0_i32_0 = arith.constant 0 : i32
    %c0_i32_1 = arith.constant 0 : i32
    return %arg0, %c0_i32, %c0_i32_0 : i32, i32, i32
  }
  func.func @transform_1(%arg0: i32) -> (i32, i32) {
    %c0_i32 = arith.constant 0 : i32
    %c0_i32_0 = arith.constant 0 : i32
    %c0_i32_1 = arith.constant 0 : i32
    return %c0_i32, %c0_i32_0 : i32, i32
  }
  func.func @transform_2(%arg0: i32) -> (i32, i32) {
    %c0_i32 = arith.constant 0 : i32
    %c0_i32_0 = arith.constant 0 : i32
    %c0_i32_1 = arith.constant 0 : i32
    return %c0_i32, %c0_i32_0 : i32, i32
  }
  func.func @transform_3(%arg0: i32) -> (i32, i32, i32) {
    %c0_i32 = arith.constant 0 : i32
    %c0_i32_0 = arith.constant 0 : i32
    %c0_i32_1 = arith.constant 0 : i32
    %c0_i32_2 = arith.constant 0 : i32
    return %c0_i32, %c0_i32_0, %c0_i32_1 : i32, i32, i32
  }
  func.func @transform_4(%arg0: i32) -> (i32, i32) {
    %c0_i32 = arith.constant 0 : i32
    %c0_i32_0 = arith.constant 0 : i32
    %c0_i32_1 = arith.constant 0 : i32
    return %c0_i32, %c0_i32_0 : i32, i32
  }
  func.func @transform_5(%arg0: i32) -> (i32, i32) {
    %c0_i32 = arith.constant 0 : i32
    %c0_i32_0 = arith.constant 0 : i32
    %c0_i32_1 = arith.constant 0 : i32
    return %c0_i32, %c0_i32_0 : i32, i32
  }
  func.func @transform_6(%arg0: i32) -> (i32, i32) {
    %c0_i32 = arith.constant 0 : i32
    %c0_i32_0 = arith.constant 0 : i32
    %c0_i32_1 = arith.constant 0 : i32
    return %c0_i32, %c0_i32_0 : i32, i32
  }
  func.func @transform_7(%arg0: i32) -> (i32, i32, i32) {
    %c0_i32 = arith.constant 0 : i32
    %c0_i32_0 = arith.constant 0 : i32
    %c0_i32_1 = arith.constant 0 : i32
    return %arg0, %c0_i32, %c0_i32_0 : i32, i32, i32
  }
}

</mosaic_0001>

<bundles_post_ra>
// kernel: bottleneck_pallas.1
= control target key start
LH: loop header
LB: loop body
LE: loop exit
PB: predicated region body
PF: predicated region fallthrough
CT: control target
= control target key end

     0   :  { %12 = vsyncpa [#allocation4], 0  ;;  %s5611_s0 = inlined_call_operand.hbm [shape: f32[2,64,64], index: 0, kind: input, shape index: {}]   ;;  %s5612_s1 = inlined_call_operand.vmem [shape: bf16[64,16], index: 1, kind: input, shape index: {}]   ;;  %s5613_s2 = inlined_call_operand.vmem [shape: f32[1,16], index: 2, kind: input, shape index: {}]   ;;  %s5614_s3 = inlined_call_operand.hbm [shape: bf16[9,16,16], index: 3, kind: input, shape index: {}]   ;;  %s5615_s4 = inlined_call_operand.vmem [shape: f32[1,16], index: 4, kind: input, shape index: {}]   ;;  %s5616_s5 = inlined_call_operand.vmem [shape: bf16[16,64], index: 5, kind: input, shape index: {}]   ;;  %s5617_s6 = inlined_call_operand.vmem [shape: f32[1,64], index: 6, kind: input, shape index: {}]   ;;  %s5618_s7 = inlined_call_operand.hbm [shape: f32[2,64,64], index: 7, kind: output, shape index: {}]  }
   0x1   :  { %13 = vsyncpa [#allocation7], 0 }
   0x2   :  { %14 = vsyncpa [#allocation5], 0  ;;  %s4332_s24 = smov [#allocation3]  }
   0x3   :  { %s20_s25 = sshll.u32 %s4332_s24, 4  ;;  %s21_s25 = int_to_ptr.vmem [resolvable:$true] %s20_s25 }
   0x4   :  { %s4274_s26 = scalar_lea.vmem %s21_s25, 2048  ;;  %p4279_p1 = scmp.lt.s32.totalorder %s21_s25, %s21_s25 }
   0x5   :  { %p4275_p0 = scmp.ne.s32.totalorder %s21_s25, %s4274_s26  ;;  %p4280_p2 = scmp.lt.s32.totalorder %s4274_s26, %s4274_s26 }
   0x7   :  { %p4281_p3 = por %p4280_p2, %p4279_p1 }
   0x9   :  { %p4282_p4 = pnand %p4281_p3, %p4275_p0 }
   0xb   :  { %4285 = shalt.err (!%p4282_p4)
}
   0xc   :  { %s4333_s27 = smov 128   ;;  %s4334_s28 = smov 8  }
   0xd   :  { %26 = dma.hbm_to_vmem [thread:$0]  %s5611_s0, 2048, %s21_s25, [#allocation4], %s4333_s27, %s4333_s27, %s4334_s28  }
   0xe   :  { %s4335_s8 = smov [#allocation6]  }
   0xf   :  { %s36_s9 = sshll.u32 %s4335_s8, 4  ;;  %s37_s9 = int_to_ptr.vmem [resolvable:$true] %s36_s9 }
  0x10   :  { %s4294_s10 = scalar_lea.vmem %s37_s9, 1152  ;;  %p4299_p6 = scmp.lt.s32.totalorder %s37_s9, %s37_s9 }
  0x11   :  { %p4295_p5 = scmp.ne.s32.totalorder %s37_s9, %s4294_s10  ;;  %p4300_p7 = scmp.lt.s32.totalorder %s4294_s10, %s4294_s10 }
  0x13   :  { %p4301_p8 = por %p4300_p7, %p4299_p6 }
  0x15   :  { %p4302_p9 = pnand %p4301_p8, %p4295_p5 }
  0x17   :  { %4305 = shalt.err (!%p4302_p9)
}
  0x18   :  { %s4336_s11 = smov 64   ;;  %s4337_s12 = smov 4  }
  0x19   :  { %42 = dma.hbm_to_vmem [thread:$0]  %s5614_s3, 1152, %s37_s9, [#allocation7], %s4336_s11, %s4336_s11, %s4337_s12  }
  0x1a   :  { %4326 = dma.done.wait [#allocation4], 2048  }
  0x1b   :  { %4327 = vsyncadd [#allocation4], 4294965248 }
  0x1c   :  { %4328 = dma.done.wait [#allocation7], 1152  }
  0x1d   :  { %4329 = vsyncadd [#allocation7], 4294966144  ;;  %v4211_v0 = vld [vmem:[%s5612_s1 + $0x18] sm:$0xff]   ;;  %v4212_v1 = vld [vmem:[%s5612_s1 + $0x10] sm:$0xff]   ;;  %vm119_vm0 = vcmask 523264   ;;  %vm267_vm1 = vcmask 122880  }
  0x1e   :  { %3997 = vmatprep.subr.bf16.mxu0 %v4211_v0  ;;  %v4213_v2 = vld [vmem:[%s5612_s1 + $0x8] sm:$0xff]   ;;  %v56_v3 = vld [vmem:[#allocation3] sm:$0xff]  ;;  %v58_v7 = vld [vmem:[#allocation3 + $0x10] sm:$0xff]  ;;  %vm277_vm2 = vsmask.f32 256  ;;  %vm265_vm6 = vcmask 125952  }
  0x1f   :  { %3998 = vmatpush3.bf16.msra.mxu0 %v4211_v0  ;;  %v57_v4 = vld [vmem:[#allocation3 + $0x8] sm:$0xff]  ;;  %v4214_v6 = vld [vmem:[%s5612_s1] sm:$0xff]   ;;  %v59_v8 = vld [vmem:[#allocation3 + $0x18] sm:$0xff]  ;;  %vm339_vm3 = vsmask.f32 7938  ;;  %v4338_v51 = vmov 0  }
  0x20   :  { %3999 = vmatprep.subr.bf16.mxu0 %v4212_v1  ;;  %v72_v5 = vpack.c.bf16 %v57_v4, %v56_v3  ;;  %v60_v9 = vld [vmem:[#allocation3 + $0x20] sm:$0xff]  ;;  %v61_v10 = vld [vmem:[#allocation3 + $0x28] sm:$0xff]  ;;  %v73_v11 = vpack.c.bf16 %v59_v8, %v58_v7  ;;  %v62_v13 = vld [vmem:[#allocation3 + $0x30] sm:$0xff]  ;;  %266 = vst.msk [vmem:[#allocation2] sm:$0xf] %vm265_vm6, %v4338_v51  ;;  %vm1331_vm10 = vcmask 1042432  }
  0x21   :  { %v74_v12 = vpack.c.bf16 %v61_v10, %v60_v9  ;;  %v63_v14 = vld [vmem:[#allocation3 + $0x38] sm:$0xff]  ;;  %v64_v15 = vld [vmem:[#allocation3 + $0x40] sm:$0xff]  ;;  %v65_v16 = vld [vmem:[#allocation3 + $0x48] sm:$0xff]  ;;  %268 = vst.msk [vmem:[#allocation2 + $0x4] sm:$0x1] %vm267_vm1, %v4338_v51  ;;  %vm1332_vm11 = vcmask 1046532  }
  0x22   :  { %4005 = vmatprep.mubr.msk.bf16.mxu0 %vm119_vm0, %v72_v5  ;;  %v75_v17 = vpack.c.bf16 %v63_v14, %v62_v13  ;;  %v76_v18 = vpack.c.bf16 %v65_v16, %v64_v15  ;;  %v66_v19 = vld [vmem:[#allocation3 + $0x50] sm:$0xff]  ;;  %v67_v20 = vld [vmem:[#allocation3 + $0x58] sm:$0xff]  ;;  %v68_v21 = vld [vmem:[#allocation3 + $0x60] sm:$0xff]  ;;  %269 = vst.msk [vmem:[#allocation2 + $0x50] sm:$0xf] %vm265_vm6, %v4338_v51  ;;  %vm994_vm14 = vcmask 130048  }
  0x23   :  { %4000 = vmatpush3.bf16.msra.mxu0 %v4212_v1  ;;  %v69_v22 = vld [vmem:[#allocation3 + $0x68] sm:$0xff]  ;;  %v77_v23 = vpack.c.bf16 %v67_v20, %v66_v19  ;;  %v70_v25 = vld [vmem:[#allocation3 + $0x70] sm:$0xff]  ;;  %v71_v26 = vld [vmem:[#allocation3 + $0x78] sm:$0xff]  ;;  %270 = vst.msk [vmem:[#allocation2 + $0x54] sm:$0x1] %vm267_vm1, %v4338_v51 }
  0x24   :  { %4001 = vmatprep.subr.bf16.mxu0 %v4213_v2  ;;  %v78_v24 = vpack.c.bf16 %v69_v22, %v68_v21  ;;  %v79_v27 = vpack.c.bf16 %v71_v26, %v70_v25  ;;  %vm4410_vm4 = vmand %vm267_vm1, %vm277_vm2  ;;  %v288_v29 = vld [vmem:[#allocation2 + $0x18] sm:$0x1]  ;;  %v350_v30 = vld [vmem:[#allocation2 + $0x1c] sm:$0x1]  ;;  %272 = vst.msk [vmem:[#allocation2 + $0x48] sm:$0xf] %vm265_vm6, %v4338_v51 }
  0x25   :  { %v289_v31 = vsel %vm4410_vm4, 0, %v288_v29  ;;  %vm4418_vm5 = vmand %vm267_vm1, %vm339_vm3  ;;  %v282_v34 = vld [vmem:[#allocation2 + $0x8] sm:$0x1]  ;;  %v344_v35 = vld [vmem:[#allocation2 + $0xc] sm:$0x1] }
  0x26   :  { %290 = vst [vmem:[#allocation2 + $0x18] sm:$0x1] %v289_v31  ;;  %v351_v33 = vsel %vm4418_vm5, 0, %v350_v30  ;;  %v283_v36 = vsel %vm4410_vm4, 0, %v282_v34  ;;  %v345_v37 = vsel %vm4418_vm5, 0, %v344_v35  ;;  %vm4434_vm7 = vmand %vm265_vm6, %vm339_vm3 }
  0x27   :  { %4002 = vmatpush3.bf16.msra.mxu0 %v4213_v2  ;;  %352 = vst [vmem:[#allocation2 + $0x1c] sm:$0x1] %v351_v33  ;;  %284 = vst [vmem:[#allocation2 + $0x8] sm:$0x1] %v283_v36  ;;  %v291_v38 = vld [vmem:[#allocation2 + $0x20] sm:$0x1] }
  0x28   :  { %4003 = vmatprep.subr.bf16.mxu0 %v4214_v6  ;;  %346 = vst [vmem:[#allocation2 + $0xc] sm:$0x1] %v345_v37  ;;  %v353_v39 = vld [vmem:[#allocation2 + $0x24] sm:$0x1]  ;;  %v292_v40 = vsel %vm4410_vm4, 0, %v291_v38  ;;  %v4215_v36 = vld [vmem:[#allocation6 + $0x8] sm:$0xff]   ;;  %vm4538_vm13 = vmor %vm1331_vm10, %vm1332_vm11 }
  0x29   :  { %v354_v41 = vsel %vm4418_vm5, 0, %v353_v39  ;;  %293 = vst [vmem:[#allocation2 + $0x20] sm:$0x1] %v292_v40  ;;  %v285_v42 = vld [vmem:[#allocation2 + $0x10] sm:$0x1]  ;;  %4201 = vmatprep.subr.bf16.mxu1 %v4215_v36  ;;  %v4504_v40 = vld [vmem:[#allocation6] sm:$0xff]  }
  0x2a   :  { %355 = vst [vmem:[#allocation2 + $0x24] sm:$0x1] %v354_v41  ;;  %v347_v43 = vld [vmem:[#allocation2 + $0x14] sm:$0x1]  ;;  %v286_v45 = vsel %vm4410_vm4, 0, %v285_v42  ;;  %4202 = vmatpush3.bf16.msra.mxu1 %v4215_v36 }
  0x2b   :  { %4004 = vmatpush3.bf16.msra.mxu0 %v4214_v6  ;;  %v348_v46 = vsel %vm4418_vm5, 0, %v347_v43  ;;  %287 = vst [vmem:[#allocation2 + $0x10] sm:$0x1] %v286_v45  ;;  %v300_v47 = vld [vmem:[#allocation2 + $0x38] sm:$0x1]  ;;  %v4502_v39 = vld [vmem:[#allocation6 + $0x10] sm:$0xff]   ;;  %4039 = vmatprep.subr.bf16.mxu1 %v4504_v40 }
  0x2c   :  { %349 = vst [vmem:[#allocation2 + $0x14] sm:$0x1] %v348_v46  ;;  %v362_v48 = vld [vmem:[#allocation2 + $0x3c] sm:$0x1]  ;;  %v301_v49 = vsel %vm4410_vm4, 0, %v300_v47  ;;  %4021 = vmatprep.subr.bf16.mxu0 %v4215_v36 }
  0x2d   :  { %v363_v50 = vsel %vm4418_vm5, 0, %v362_v48  ;;  %302 = vst [vmem:[#allocation2 + $0x38] sm:$0x1] %v301_v49  ;;  %273 = vst.msk [vmem:[#allocation2 + $0x4c] sm:$0x1] %vm267_vm1, %v4338_v51 }
  0x2e   :  { %4006 = vmatmul.mubr.msk.bf16.vlgmr.msra.gmra.mxu0 %vm119_vm0, %v73_v11  ;;  %364 = vst [vmem:[#allocation2 + $0x3c] sm:$0x1] %v363_v50  ;;  %274 = vst.msk [vmem:[#allocation2 + $0x98] sm:$0xf] %vm265_vm6, %v4338_v51  ;;  %v294_v52 = vld [vmem:[#allocation2 + $0x28] sm:$0x1] }
  0x2f   :  { %4009 = vmatprep.mubr.msk.bf16.mxu0 %vm119_vm0, %v74_v12  ;;  %275 = vst.msk [vmem:[#allocation2 + $0x9c] sm:$0x1] %vm267_vm1, %v4338_v51  ;;  %v356_v53 = vld [vmem:[#allocation2 + $0x2c] sm:$0x1]  ;;  %v295_v54 = vsel %vm4410_vm4, 0, %v294_v52  ;;  %4022 = vmatpush3.bf16.msra.mxu0 %v4215_v36 }
  0x30   :  { %v357_v55 = vsel %vm4418_vm5, 0, %v356_v53  ;;  %296 = vst [vmem:[#allocation2 + $0x28] sm:$0x1] %v295_v54  ;;  %v303_v56 = vld [vmem:[#allocation2 + $0x40] sm:$0x1]  ;;  %4057 = vmatprep.subr.bf16.mxu0 %v4502_v39 }
  0x31   :  { %358 = vst [vmem:[#allocation2 + $0x2c] sm:$0x1] %v357_v55  ;;  %v365_v57 = vld [vmem:[#allocation2 + $0x44] sm:$0x1]  ;;  %v304_v58 = vsel %vm4410_vm4, 0, %v303_v56 }
  0x32   :  { %v366_v59 = vsel %vm4418_vm5, 0, %v365_v57  ;;  %305 = vst [vmem:[#allocation2 + $0x40] sm:$0x1] %v304_v58  ;;  %v297_v60 = vld [vmem:[#allocation2 + $0x30] sm:$0x1] }
  0x33   :  { %367 = vst [vmem:[#allocation2 + $0x44] sm:$0x1] %v366_v59  ;;  %v359_v61 = vld [vmem:[#allocation2 + $0x34] sm:$0x1]  ;;  %v298_v62 = vsel %vm4410_vm4, 0, %v297_v60 }
  0x34   :  { %v360_v63 = vsel %vm4418_vm5, 0, %v359_v61  ;;  %v279_v0 = vld [vmem:[#allocation2] sm:$0x1]  ;;  %299 = vst [vmem:[#allocation2 + $0x30] sm:$0x1] %v298_v62 }
  0x35   :  { %361 = vst [vmem:[#allocation2 + $0x34] sm:$0x1] %v360_v63  ;;  %v318_v1 = vld [vmem:[#allocation2 + $0x68] sm:$0x1]  ;;  %v380_v2 = vld [vmem:[#allocation2 + $0x6c] sm:$0x1] }
  0x36   :  { %4010 = vmatmul.mubr.msk.bf16.gmra.mxu0 %vm119_vm0, %v75_v17  ;;  %v319_v3 = vsel %vm4410_vm4, 0, %v318_v1  ;;  %v381_v4 = vsel %vm4418_vm5, 0, %v380_v2  ;;  %v280_v5 = vsel %vm4410_vm4, 0, %v279_v0  ;;  %v341_v6 = vld [vmem:[#allocation2 + $0x4] sm:$0x1] }
  0x37   :  { %4013 = vmatprep.mubr.msk.bf16.mxu0 %vm119_vm0, %v76_v18  ;;  %320 = vst [vmem:[#allocation2 + $0x68] sm:$0x1] %v319_v3  ;;  %382 = vst [vmem:[#allocation2 + $0x6c] sm:$0x1] %v381_v4  ;;  %v342_v7 = vsel %vm4418_vm5, 0, %v341_v6 }
  0x38   :  { %281 = vst [vmem:[#allocation2] sm:$0x1] %v280_v5  ;;  %v312_v8 = vld [vmem:[#allocation2 + $0x58] sm:$0x1]  ;;  %v374_v9 = vld [vmem:[#allocation2 + $0x5c] sm:$0x1] }
  0x39   :  { %343 = vst [vmem:[#allocation2 + $0x4] sm:$0x1] %v342_v7  ;;  %v313_v10 = vsel %vm4410_vm4, 0, %v312_v8  ;;  %v375_v11 = vsel %vm4418_vm5, 0, %v374_v9  ;;  %v321_v12 = vld [vmem:[#allocation2 + $0x70] sm:$0x1] }
  0x3a   :  { %314 = vst [vmem:[#allocation2 + $0x58] sm:$0x1] %v313_v10  ;;  %376 = vst [vmem:[#allocation2 + $0x5c] sm:$0x1] %v375_v11  ;;  %v383_v13 = vld [vmem:[#allocation2 + $0x74] sm:$0x1] }
  0x3b   :  { %v322_v14 = vsel %vm4410_vm4, 0, %v321_v12  ;;  %v384_v15 = vsel %vm4418_vm5, 0, %v383_v13  ;;  %v315_v16 = vld [vmem:[#allocation2 + $0x60] sm:$0x1]  ;;  %v377_v17 = vld [vmem:[#allocation2 + $0x64] sm:$0x1] }
  0x3c   :  { %323 = vst [vmem:[#allocation2 + $0x70] sm:$0x1] %v322_v14  ;;  %385 = vst [vmem:[#allocation2 + $0x74] sm:$0x1] %v384_v15  ;;  %v316_v18 = vsel %vm4410_vm4, 0, %v315_v16  ;;  %v378_v19 = vsel %vm4418_vm5, 0, %v377_v17 }
  0x3d   :  { %317 = vst [vmem:[#allocation2 + $0x60] sm:$0x1] %v316_v18  ;;  %379 = vst [vmem:[#allocation2 + $0x64] sm:$0x1] %v378_v19  ;;  %v330_v20 = vld [vmem:[#allocation2 + $0x88] sm:$0x1] }
  0x3e   :  { %4014 = vmatmul.mubr.msk.bf16.gmra.mxu0 %vm119_vm0, %v77_v23  ;;  %v392_v21 = vld [vmem:[#allocation2 + $0x8c] sm:$0x1]  ;;  %v331_v22 = vsel %vm4410_vm4, 0, %v330_v20  ;;  %v386_v25 = vld [vmem:[#allocation2 + $0x7c] sm:$0x1] }
  0x3f   :  { %4017 = vmatprep.mubr.msk.bf16.mxu0 %vm119_vm0, %v78_v24  ;;  %v393_v23 = vsel %vm4418_vm5, 0, %v392_v21  ;;  %332 = vst [vmem:[#allocation2 + $0x88] sm:$0x1] %v331_v22  ;;  %v324_v24 = vld [vmem:[#allocation2 + $0x78] sm:$0x1] }
  0x40   :  { %394 = vst [vmem:[#allocation2 + $0x8c] sm:$0x1] %v393_v23  ;;  %v325_v26 = vsel %vm4410_vm4, 0, %v324_v24  ;;  %v333_v29 = vld [vmem:[#allocation2 + $0x90] sm:$0x1] }
  0x41   :  { %326 = vst [vmem:[#allocation2 + $0x78] sm:$0x1] %v325_v26  ;;  %v395_v30 = vld [vmem:[#allocation2 + $0x94] sm:$0x1]  ;;  %v334_v31 = vsel %vm4410_vm4, 0, %v333_v29 }
  0x42   :  { %v396_v33 = vsel %vm4418_vm5, 0, %v395_v30  ;;  %335 = vst [vmem:[#allocation2 + $0x90] sm:$0x1] %v334_v31  ;;  %v327_v34 = vld [vmem:[#allocation2 + $0x80] sm:$0x1] }
  0x43   :  { %397 = vst [vmem:[#allocation2 + $0x94] sm:$0x1] %v396_v33  ;;  %v389_v35 = vld [vmem:[#allocation2 + $0x84] sm:$0x1]  ;;  %v328_v37 = vsel %vm4410_vm4, 0, %v327_v34 }
  0x44   :  { %v390_v38 = vsel %vm4418_vm5, 0, %v389_v35  ;;  %329 = vst [vmem:[#allocation2 + $0x80] sm:$0x1] %v328_v37  ;;  %v309_v41 = vld [vmem:[#allocation2 + $0x50] sm:$0x1] }
  0x45   :  { %391 = vst [vmem:[#allocation2 + $0x84] sm:$0x1] %v390_v38  ;;  %v371_v42 = vld [vmem:[#allocation2 + $0x54] sm:$0x1]  ;;  %v310_v43 = vsel %vm4410_vm4, 0, %v309_v41 }
  0x46   :  { %4018 = vmatmul.mubr.msk.bf16.gmra.mxu0 %vm119_vm0, %v79_v27  ;;  %v387_v27 = vsel %vm4418_vm5, 0, %v386_v25  ;;  %v372_v45 = vsel %vm4418_vm5, 0, %v371_v42  ;;  %311 = vst [vmem:[#allocation2 + $0x50] sm:$0x1] %v310_v43  ;;  %v306_v46 = vld [vmem:[#allocation2 + $0x48] sm:$0x1] }
  0x47   :  { %388 = vst [vmem:[#allocation2 + $0x7c] sm:$0x1] %v387_v27  ;;  %373 = vst [vmem:[#allocation2 + $0x54] sm:$0x1] %v372_v45  ;;  %v307_v47 = vsel %vm4410_vm4, 0, %v306_v46 }
  0x48   :  { %308 = vst [vmem:[#allocation2 + $0x48] sm:$0x1] %v307_v47  ;;  %v700_v48 = vld [vmem:[#allocation2] sm:$0xf]  ;;  %v718_v56 = vld [vmem:[#allocation2 + $0x4] sm:$0x1] }
  0x49   :  { %v738_v49 = vshrl.u32 %v700_v48, 16  ;;  %v741_v50 = vshll.u32 %v700_v48, 16  ;;  %v4517_v57 = vld [vmem:[%s5613_s2] ss:$0 sm:$0xff]  ;;  %v747_v59 = vshll.u32 %v718_v56, 16  ;;  %v1336_v12 = vrot.slane %v718_v56, 5 }
  0x4a   :  { %vm734_vm8 = vsmask.f32 3328  ;;  %vm735_vm9 = vsmask.f32 7440  ;;  %v1283_v0 = vld [vmem:[#allocation2] sm:$0xe] }
  0x4b   :  { %v740_v52 = vrot.slane %v738_v49, 4  ;;  %v743_v53 = vrot.slane %v741_v50, 5  ;;  %v1291_v2 = vld [vmem:[#allocation2 + $0x50] sm:$0xe]  ;;  %v4522_v5 = vrot.slane %v747_v59, 5  ;;  %v3701_v11 = vrot.slane %v1283_v0, 9  ;;  %vm4528_vm12 = vmor %vm734_vm8, %vm735_vm9 }
  0x4c   :  { %v3709_v13 = vrot.slane %v1291_v2, 9  ;;  %v616_v37 = vld [vmem:[#allocation2 + $0x18] sm:$0xf]  ;;  %v619_v38 = vld [vmem:[#allocation2 + $0x1c] sm:$0x1] }
  0x4d   :  { %v708_v51 = vld [vmem:[#allocation2 + $0x50] sm:$0xf]  ;;  %v744_v58 = vor.u32 %v743_v53, %v740_v52  ;;  %v4549_v30 = vsel %vm4538_vm13, %v3701_v11, %v1336_v12  ;;  %v607_v52 = vld [vmem:[#allocation2 + $0xc] sm:$0x1] }
  0x4e   :  { %v850_v54 = vshrl.u32 %v708_v51, 16  ;;  %v853_v55 = vshll.u32 %v708_v51, 16  ;;  %v726_v1 = vld [vmem:[#allocation2 + $0x54] sm:$0x1]  ;;  %v604_v51 = vld [vmem:[#allocation2 + $0x8] sm:$0xf] }
  0x4f   :  { %v4520_v4 = vrot.slane %v744_v58, 4  ;;  %v859_v7 = vshll.u32 %v726_v1, 16  ;;  %v1368_v14 = vrot.slane %v726_v1, 5 }
  0x50   :  { %v852_v60 = vrot.slane %v850_v54, 4  ;;  %v855_v61 = vrot.slane %v853_v55, 5 }
  0x51   :  { %v4534_v21 = vrot.slane %v859_v7, 5  ;;  %v750_v29 = vsel %vm4528_vm12, %v4520_v4, %v4522_v5  ;;  %v4553_v31 = vsel %vm4538_vm13, %v3709_v13, %v1368_v14 }
  0x52   :  { %v856_v6 = vor.u32 %v855_v61, %v852_v60 }
  0x54   :  { %v4532_v20 = vrot.slane %v856_v6, 4 }
  0x56   :  { %v862_v46 = vsel %vm4528_vm12, %v4532_v20, %v4534_v21 }
  0xee   :  { %v4007_v62 = vpop.f32.mrf.mxu0 }
  0xef   :  { %v187_v63 = vadd.f32 %v4007_v62, %v4517_v57 }
  0xf0   :  { %v178_v3 = vpop.f32.mrf.mxu0 }
  0xf1   :  { %v243_v8 = vmax.f32 %v187_v63, 0.0  ;;  %v179_v9 = vadd.f32 %v4517_v57, %v178_v3 }
  0xf2   :  { %v4008_v10 = vpop.f32.mrf.mxu0 }
  0xf3   :  { %v3881_v15 = vpack.c.bf16 %v243_v8, %v243_v8  ;;  %v241_v16 = vmax.f32 %v179_v9, 0.0  ;;  %v190_v17 = vadd.f32 %v4008_v10, %v4517_v57  ;;  %v622_v8 = vld [vmem:[#allocation2 + $0x20] sm:$0xf]  ;;  %v625_v9 = vld [vmem:[#allocation2 + $0x24] sm:$0x1] }
  0xf4   :  { %v181_v18 = vpop.f32.mrf.mxu0 }
  0xf5   :  { %v458_v22 = vshrl.u32 %v3881_v15, 16  ;;  %v3879_v23 = vpack.c.bf16 %v241_v16, %v241_v16  ;;  %v244_v24 = vmax.f32 %v190_v17, 0.0  ;;  %v182_v26 = vadd.f32 %v4517_v57, %v181_v18  ;;  %v610_v17 = vld [vmem:[#allocation2 + $0x10] sm:$0xf]  ;;  %v613_v18 = vld [vmem:[#allocation2 + $0x14] sm:$0x1] }
  0xf6   :  { %v4011_v27 = vpop.f32.mrf.mxu0  ;;  %v461_v34 = vshll.u32 %v3881_v15, 16 }
  0xf7   :  { %v460_v33 = vrot.slane %v458_v22, 7  ;;  %v442_v35 = vshrl.u32 %v3879_v23, 16  ;;  %v3882_v36 = vpack.c.bf16 %v244_v24, %v244_v24  ;;  %v445_v41 = vshll.u32 %v3879_v23, 16 }
  0xf8   :  { %v242_v42 = vmax.f32 %v182_v26, 0.0  ;;  %v203_v43 = vadd.f32 %v4011_v27, %v4517_v57  ;;  %v194_v45 = vpop.f32.mrf.mxu0 }
  0xf9   :  { %v463_v47 = vor.u32 %v461_v34, %v460_v33  ;;  %v464_v48 = vrot.slane %v460_v33, 4  ;;  %v444_v49 = vrot.slane %v442_v35, 7  ;;  %v466_v50 = vshrl.u32 %v3882_v36, 16 }
  0xfa   :  { %v469_v53 = vshll.u32 %v3882_v36, 16  ;;  %v3880_v54 = vpack.c.bf16 %v242_v42, %v242_v42  ;;  %v247_v55 = vmax.f32 %v203_v43, 0.0  ;;  %v195_v56 = vadd.f32 %v4517_v57, %v194_v45  ;;  %v4012_v58 = vpop.f32.mrf.mxu0 }
  0xfb   :  { %v617_v59 = vsel %vm4434_vm7, %v463_v47, %v616_v37  ;;  %v620_v60 = vsel %vm4410_vm4, %v464_v48, %v619_v38  ;;  %v447_v61 = vor.u32 %v445_v41, %v444_v49  ;;  %v448_v62 = vrot.slane %v444_v49, 4  ;;  %v640_v47 = vld [vmem:[#allocation2 + $0x38] sm:$0xf]  ;;  %v643_v48 = vld [vmem:[#allocation2 + $0x3c] sm:$0x1] }
  0xfc   :  { %618 = vst [vmem:[#allocation2 + $0x18] sm:$0xf] %v617_v59  ;;  %621 = vst [vmem:[#allocation2 + $0x1c] sm:$0x1] %v620_v60  ;;  %v468_v63 = vrot.slane %v466_v50, 7  ;;  %v450_v0 = vshrl.u32 %v3880_v54, 16  ;;  %v3885_v2 = vpack.c.bf16 %v247_v55, %v247_v55  ;;  %v197_v3 = vpop.f32.mrf.mxu0  ;;  %v206_v11 = vadd.f32 %v4012_v58, %v4517_v57 }
  0xfd   :  { %v453_v1 = vshll.u32 %v3880_v54, 16  ;;  %v605_v6 = vsel %vm4434_vm7, %v447_v61, %v604_v51  ;;  %v608_v7 = vsel %vm4410_vm4, %v448_v62, %v607_v52  ;;  %v245_v10 = vmax.f32 %v195_v56, 0.0  ;;  %v628_v56 = vld [vmem:[#allocation2 + $0x28] sm:$0xf]  ;;  %v631_v58 = vld [vmem:[#allocation2 + $0x2c] sm:$0x1] }
  0xfe   :  { %606 = vst [vmem:[#allocation2 + $0x8] sm:$0xf] %v605_v6  ;;  %609 = vst [vmem:[#allocation2 + $0xc] sm:$0x1] %v608_v7  ;;  %v471_v12 = vor.u32 %v469_v53, %v468_v63  ;;  %v472_v13 = vrot.slane %v468_v63, 4  ;;  %v452_v14 = vrot.slane %v450_v0, 7  ;;  %v4015_v16 = vpop.f32.mrf.mxu0  ;;  %v198_v26 = vadd.f32 %v4517_v57, %v197_v3 }
  0xff   :  { %v490_v15 = vshrl.u32 %v3885_v2, 16  ;;  %v493_v22 = vshll.u32 %v3885_v2, 16  ;;  %v3883_v23 = vpack.c.bf16 %v245_v10, %v245_v10  ;;  %v248_v24 = vmax.f32 %v206_v11, 0.0 }
 0x100   :  { %v623_v27 = vsel %vm4434_vm7, %v471_v12, %v622_v8  ;;  %v626_v33 = vsel %vm4410_vm4, %v472_v13, %v625_v9  ;;  %v455_v34 = vor.u32 %v453_v1, %v452_v14  ;;  %v456_v35 = vrot.slane %v452_v14, 4  ;;  %v210_v36 = vpop.f32.mrf.mxu0  ;;  %v646_v13 = vld [vmem:[#allocation2 + $0x40] sm:$0xf]  ;;  %v649_v14 = vld [vmem:[#allocation2 + $0x44] sm:$0x1] }
 0x101   :  { %624 = vst [vmem:[#allocation2 + $0x20] sm:$0xf] %v623_v27  ;;  %627 = vst [vmem:[#allocation2 + $0x24] sm:$0x1] %v626_v33  ;;  %v492_v37 = vrot.slane %v490_v15, 7  ;;  %v474_v38 = vshrl.u32 %v3883_v23, 16  ;;  %v3886_v42 = vpack.c.bf16 %v248_v24, %v248_v24  ;;  %v219_v50 = vadd.f32 %v4015_v16, %v4517_v57 }
 0x102   :  { %v477_v41 = vshll.u32 %v3883_v23, 16  ;;  %v611_v43 = vsel %vm4434_vm7, %v455_v34, %v610_v17  ;;  %v614_v45 = vsel %vm4410_vm4, %v456_v35, %v613_v18  ;;  %v246_v49 = vmax.f32 %v198_v26, 0.0  ;;  %v4016_v51 = vpop.f32.mrf.mxu0  ;;  %v634_v26 = vld [vmem:[#allocation2 + $0x30] sm:$0xf]  ;;  %v637_v27 = vld [vmem:[#allocation2 + $0x34] sm:$0x1] }
 0x103   :  { %612 = vst [vmem:[#allocation2 + $0x10] sm:$0xf] %v611_v43  ;;  %615 = vst [vmem:[#allocation2 + $0x14] sm:$0x1] %v614_v45  ;;  %v495_v52 = vor.u32 %v493_v22, %v492_v37  ;;  %v496_v53 = vrot.slane %v492_v37, 4  ;;  %v476_v54 = vrot.slane %v474_v38, 7  ;;  %v211_v62 = vadd.f32 %v4517_v57, %v210_v36 }
 0x104   :  { %v498_v55 = vshrl.u32 %v3886_v42, 16  ;;  %v501_v59 = vshll.u32 %v3886_v42, 16  ;;  %v3884_v60 = vpack.c.bf16 %v246_v49, %v246_v49  ;;  %v251_v61 = vmax.f32 %v219_v50, 0.0  ;;  %v213_v63 = vpop.f32.mrf.mxu0 }
 0x105   :  { %v641_v0 = vsel %vm4434_vm7, %v495_v52, %v640_v47  ;;  %v644_v1 = vsel %vm4410_vm4, %v496_v53, %v643_v48  ;;  %v479_v2 = vor.u32 %v477_v41, %v476_v54  ;;  %v480_v3 = vrot.slane %v476_v54, 4  ;;  %v667_v52 = vld [vmem:[#allocation2 + $0x6c] sm:$0x1]  ;;  %v2196_v28 = vld [vmem:[#allocation2 + $0x8] sm:$0xe] }
 0x106   :  { %642 = vst [vmem:[#allocation2 + $0x38] sm:$0xf] %v641_v0  ;;  %645 = vst [vmem:[#allocation2 + $0x3c] sm:$0x1] %v644_v1  ;;  %v500_v6 = vrot.slane %v498_v55, 7  ;;  %v482_v7 = vshrl.u32 %v3884_v60, 16  ;;  %v3889_v9 = vpack.c.bf16 %v251_v61, %v251_v61  ;;  %v4019_v10 = vpop.f32.mrf.mxu0  ;;  %v222_v16 = vadd.f32 %v4016_v51, %v4517_v57 }
 0x107   :  { %v485_v8 = vshll.u32 %v3884_v60, 16  ;;  %v629_v11 = vsel %vm4434_vm7, %v479_v2, %v628_v56  ;;  %v632_v12 = vsel %vm4410_vm4, %v480_v3, %v631_v58  ;;  %v249_v15 = vmax.f32 %v211_v62, 0.0  ;;  %v664_v51 = vld [vmem:[#allocation2 + $0x68] sm:$0xf]  ;;  %v652_v61 = vld [vmem:[#allocation2 + $0x58] sm:$0xf] }
 0x108   :  { %630 = vst [vmem:[#allocation2 + $0x28] sm:$0xf] %v629_v11  ;;  %633 = vst [vmem:[#allocation2 + $0x2c] sm:$0x1] %v632_v12  ;;  %v503_v17 = vor.u32 %v501_v59, %v500_v6  ;;  %v504_v18 = vrot.slane %v500_v6, 4  ;;  %v484_v22 = vrot.slane %v482_v7, 7  ;;  %v226_v24 = vpop.f32.mrf.mxu0  ;;  %v214_v36 = vadd.f32 %v4517_v57, %v213_v63 }
 0x109   :  { %v522_v23 = vshrl.u32 %v3889_v9, 16  ;;  %v525_v33 = vshll.u32 %v3889_v9, 16  ;;  %v3887_v34 = vpack.c.bf16 %v249_v15, %v249_v15  ;;  %v252_v35 = vmax.f32 %v222_v16, 0.0  ;;  %v655_v62 = vld [vmem:[#allocation2 + $0x5c] sm:$0x1] }
 0x10a   :  { %v647_v37 = vsel %vm4434_vm7, %v503_v17, %v646_v13  ;;  %v650_v38 = vsel %vm4410_vm4, %v504_v18, %v649_v14  ;;  %v487_v41 = vor.u32 %v485_v8, %v484_v22  ;;  %v488_v42 = vrot.slane %v484_v22, 4  ;;  %v4020_v55 = vpop.f32.mrf.mxu0  ;;  %v670_v16 = vld [vmem:[#allocation2 + $0x70] sm:$0xf]  ;;  %v673_v17 = vld [vmem:[#allocation2 + $0x74] sm:$0x1] }
 0x10b   :  { %648 = vst [vmem:[#allocation2 + $0x40] sm:$0xf] %v647_v37  ;;  %651 = vst [vmem:[#allocation2 + $0x44] sm:$0x1] %v650_v38  ;;  %v524_v43 = vrot.slane %v522_v23, 7  ;;  %v506_v45 = vshrl.u32 %v3887_v34, 16  ;;  %v3890_v48 = vpack.c.bf16 %v252_v35, %v252_v35  ;;  %v235_v54 = vadd.f32 %v4019_v10, %v4517_v57 }
 0x10c   :  { %v509_v47 = vshll.u32 %v3887_v34, 16  ;;  %v635_v49 = vsel %vm4434_vm7, %v487_v41, %v634_v26  ;;  %v638_v50 = vsel %vm4410_vm4, %v488_v42, %v637_v27  ;;  %v250_v53 = vmax.f32 %v214_v36, 0.0  ;;  %v229_v13 = vpop.f32.mrf.mxu0  ;;  %v658_v27 = vld [vmem:[#allocation2 + $0x60] sm:$0xf]  ;;  %v661_v34 = vld [vmem:[#allocation2 + $0x64] sm:$0x1] }
 0x10d   :  { %636 = vst [vmem:[#allocation2 + $0x30] sm:$0xf] %v635_v49  ;;  %639 = vst [vmem:[#allocation2 + $0x34] sm:$0x1] %v638_v50  ;;  %v527_v56 = vor.u32 %v525_v33, %v524_v43  ;;  %v528_v58 = vrot.slane %v524_v43, 4  ;;  %v508_v59 = vrot.slane %v506_v45, 7  ;;  %v227_v2 = vadd.f32 %v4517_v57, %v226_v24 }
 0x10e   :  { %v530_v60 = vshrl.u32 %v3890_v48, 16  ;;  %v533_v63 = vshll.u32 %v3890_v48, 16  ;;  %v3888_v0 = vpack.c.bf16 %v250_v53, %v250_v53  ;;  %v255_v1 = vmax.f32 %v235_v54, 0.0  ;;  %v4611_v41 = vld [vmem:[#allocation2 + $0x8] sm:$0xf] }
 0x10f   :  { %v665_v3 = vsel %vm4434_vm7, %v527_v56, %v664_v51  ;;  %v668_v6 = vsel %vm4410_vm4, %v528_v58, %v667_v52  ;;  %v511_v7 = vor.u32 %v509_v47, %v508_v59  ;;  %v512_v8 = vrot.slane %v508_v59, 4  ;;  %v688_v48 = vld [vmem:[#allocation2 + $0x88] sm:$0xf]  ;;  %v691_v50 = vld [vmem:[#allocation2 + $0x8c] sm:$0x1] }
 0x110   :  { %666 = vst [vmem:[#allocation2 + $0x68] sm:$0xf] %v665_v3  ;;  %669 = vst [vmem:[#allocation2 + $0x6c] sm:$0x1] %v668_v6  ;;  %v532_v9 = vrot.slane %v530_v60, 7  ;;  %v514_v10 = vshrl.u32 %v3888_v0, 16  ;;  %v3893_v12 = vpack.c.bf16 %v255_v1, %v255_v1  ;;  %v238_v22 = vadd.f32 %v4020_v55, %v4517_v57 }
 0x111   :  { %v517_v11 = vshll.u32 %v3888_v0, 16  ;;  %v653_v14 = vsel %vm4434_vm7, %v511_v7, %v652_v61  ;;  %v656_v15 = vsel %vm4410_vm4, %v512_v8, %v655_v62  ;;  %v253_v18 = vmax.f32 %v227_v2, 0.0  ;;  %v676_v55 = vld [vmem:[#allocation2 + $0x78] sm:$0xf]  ;;  %v679_v56 = vld [vmem:[#allocation2 + $0x7c] sm:$0x1] }
 0x112   :  { %654 = vst [vmem:[#allocation2 + $0x58] sm:$0xf] %v653_v14  ;;  %657 = vst [vmem:[#allocation2 + $0x5c] sm:$0x1] %v656_v15  ;;  %v535_v23 = vor.u32 %v533_v63, %v532_v9  ;;  %v536_v24 = vrot.slane %v532_v9, 4  ;;  %v516_v26 = vrot.slane %v514_v10, 7  ;;  %v230_v38 = vadd.f32 %v4517_v57, %v229_v13 }
 0x113   :  { %v554_v33 = vshrl.u32 %v3893_v12, 16  ;;  %v557_v35 = vshll.u32 %v3893_v12, 16  ;;  %v3891_v36 = vpack.c.bf16 %v253_v18, %v253_v18  ;;  %v256_v37 = vmax.f32 %v238_v22, 0.0  ;;  %v4622_v0 = vld [vmem:[#allocation2 + $0xc] sm:$0x1] }
 0x114   :  { %v671_v42 = vsel %vm4434_vm7, %v535_v23, %v670_v16  ;;  %v674_v43 = vsel %vm4410_vm4, %v536_v24, %v673_v17  ;;  %v519_v45 = vor.u32 %v517_v11, %v516_v26  ;;  %v520_v47 = vrot.slane %v516_v26, 4  ;;  %v4625_v7 = vld [vmem:[#allocation2 + $0x10] sm:$0xf]  ;;  %v4631_v17 = vld [vmem:[#allocation2 + $0x14] sm:$0x1] }
 0x115   :  { %672 = vst [vmem:[#allocation2 + $0x70] sm:$0xf] %v671_v42  ;;  %675 = vst [vmem:[#allocation2 + $0x74] sm:$0x1] %v674_v43  ;;  %v556_v49 = vrot.slane %v554_v33, 7  ;;  %v538_v51 = vshrl.u32 %v3891_v36, 16  ;;  %v3894_v53 = vpack.c.bf16 %v256_v37, %v256_v37 }
 0x116   :  { %v541_v52 = vshll.u32 %v3891_v36, 16  ;;  %v659_v57 = vsel %vm4434_vm7, %v519_v45, %v658_v27  ;;  %v662_v54 = vsel %vm4410_vm4, %v520_v47, %v661_v34  ;;  %v254_v58 = vmax.f32 %v230_v38, 0.0  ;;  %v694_v12 = vld [vmem:[#allocation2 + $0x90] sm:$0xf]  ;;  %v697_v23 = vld [vmem:[#allocation2 + $0x94] sm:$0x1] }
 0x117   :  { %v752_v59 = vshrl.u32 %v4611_v41, 16  ;;  %660 = vst [vmem:[#allocation2 + $0x60] sm:$0xf] %v659_v57  ;;  %663 = vst [vmem:[#allocation2 + $0x64] sm:$0x1] %v662_v54  ;;  %v559_v60 = vor.u32 %v557_v35, %v556_v49  ;;  %v560_v61 = vrot.slane %v556_v49, 4 }
 0x118   :  { %v540_v62 = vrot.slane %v538_v51, 7  ;;  %v562_v63 = vshrl.u32 %v3894_v53, 16  ;;  %v565_v1 = vshll.u32 %v3894_v53, 16  ;;  %v3892_v2 = vpack.c.bf16 %v254_v58, %v254_v58  ;;  %v682_v24 = vld [vmem:[#allocation2 + $0x80] sm:$0xf] }
 0x119   :  { %v754_v3 = vrot.slane %v752_v59, 4  ;;  %v755_v6 = vshll.u32 %v4611_v41, 16  ;;  %v689_v8 = vsel %vm4434_vm7, %v559_v60, %v688_v48  ;;  %v692_v9 = vsel %vm4410_vm4, %v560_v61, %v691_v50  ;;  %v685_v36 = vld [vmem:[#allocation2 + $0x84] sm:$0x1]  ;;  %v4639_v38 = vld [vmem:[#allocation2 + $0x18] sm:$0xf] }
 0x11a   :  { %v543_v10 = vor.u32 %v541_v52, %v540_v62  ;;  %v544_v11 = vrot.slane %v540_v62, 4  ;;  %690 = vst [vmem:[#allocation2 + $0x88] sm:$0xf] %v689_v8  ;;  %693 = vst [vmem:[#allocation2 + $0x8c] sm:$0x1] %v692_v9  ;;  %v564_v13 = vrot.slane %v562_v63, 7 }
 0x11b   :  { %v546_v14 = vshrl.u32 %v3892_v2, 16  ;;  %v549_v15 = vshll.u32 %v3892_v2, 16  ;;  %v757_v16 = vrot.slane %v755_v6, 5  ;;  %v761_v26 = vshll.u32 %v4622_v0, 16  ;;  %v4641_v43 = vld [vmem:[#allocation2 + $0x1c] sm:$0x1] }
 0x11c   :  { %v677_v18 = vsel %vm4434_vm7, %v543_v10, %v676_v55  ;;  %v680_v22 = vsel %vm4410_vm4, %v544_v11, %v679_v56  ;;  %v766_v27 = vshrl.u32 %v4625_v7, 16  ;;  %v567_v33 = vor.u32 %v565_v1, %v564_v13  ;;  %v1284_v53 = vld [vmem:[#allocation2 + $0x8] sm:$0xe]  ;;  %v4656_v62 = vld [vmem:[#allocation2 + $0x20] sm:$0xf] }
 0x11d   :  { %678 = vst [vmem:[#allocation2 + $0x78] sm:$0xf] %v677_v18  ;;  %681 = vst [vmem:[#allocation2 + $0x7c] sm:$0x1] %v680_v22  ;;  %v568_v34 = vrot.slane %v564_v13, 4  ;;  %v548_v35 = vrot.slane %v546_v14, 7  ;;  %v758_v37 = vor.u32 %v757_v16, %v754_v3 }
 0x11e   :  { %v763_v42 = vrot.slane %v761_v26, 5  ;;  %v768_v45 = vrot.slane %v766_v27, 4  ;;  %v769_v47 = vshll.u32 %v4625_v7, 16  ;;  %v775_v48 = vshll.u32 %v4631_v17, 16  ;;  %v4658_v63 = vld [vmem:[#allocation2 + $0x24] sm:$0x1] }
 0x11f   :  { %v695_v49 = vsel %vm4434_vm7, %v567_v33, %v694_v12  ;;  %v698_v50 = vsel %vm4410_vm4, %v568_v34, %v697_v23  ;;  %v551_v51 = vor.u32 %v549_v15, %v548_v35  ;;  %v552_v52 = vrot.slane %v548_v35, 4  ;;  %v4662_v6 = vld [vmem:[#allocation2 + $0x28] sm:$0xf]  ;;  %v4676_v22 = vld [vmem:[#allocation2 + $0x2c] sm:$0x1] }
 0x120   :  { %696 = vst [vmem:[#allocation2 + $0x90] sm:$0xf] %v695_v49  ;;  %699 = vst [vmem:[#allocation2 + $0x94] sm:$0x1] %v698_v50  ;;  %v759_v57 = vrot.slane %v758_v37, 4  ;;  %v771_v54 = vrot.slane %v769_v47, 5 }
 0x121   :  { %v777_v55 = vrot.slane %v775_v48, 5  ;;  %v780_v56 = vshrl.u32 %v4639_v38, 16  ;;  %v683_v58 = vsel %vm4434_vm7, %v551_v51, %v682_v24  ;;  %v686_v59 = vsel %vm4410_vm4, %v552_v52, %v685_v36  ;;  %v4683_v26 = vld [vmem:[#allocation2 + $0x30] sm:$0xf]  ;;  %v4685_v36 = vld [vmem:[#allocation2 + $0x34] sm:$0x1] }
 0x122   :  { %v783_v60 = vshll.u32 %v4639_v38, 16  ;;  %v789_v61 = vshll.u32 %v4641_v43, 16  ;;  %684 = vst [vmem:[#allocation2 + $0x80] sm:$0xf] %v683_v58  ;;  %687 = vst [vmem:[#allocation2 + $0x84] sm:$0x1] %v686_v59  ;;  %v764_v1 = vsel %vm4528_vm12, %v759_v57, %v763_v42  ;;  %v772_v2 = vor.u32 %v771_v54, %v768_v45 }
 0x123   :  { %v782_v3 = vrot.slane %v780_v56, 4  ;;  %v3702_v44 = vrot.slane %v1284_v53, 9  ;;  %v3667_v8 = vcombine.low %v750_v29, %v764_v1  ;;  %v1340_v11 = vrot.slane %v4622_v0, 5  ;;  %v4690_v48 = vld [vmem:[#allocation2 + $0x38] sm:$0xf]  ;;  %v4699_v58 = vld [vmem:[#allocation6 + $0x20] sm:$0xff]  }
 0x124   :  { %v785_v9 = vrot.slane %v783_v60, 5  ;;  %v791_v10 = vrot.slane %v789_v61, 5  ;;  %v773_v12 = vrot.slane %v772_v2, 4  ;;  %v794_v13 = vshrl.u32 %v4656_v62, 16  ;;  %v4694_v50 = vld [vmem:[#allocation2 + $0x3c] sm:$0x1] }
 0x125   :  { %v797_v14 = vshll.u32 %v4656_v62, 16  ;;  %v803_v15 = vshll.u32 %v4658_v63, 16  ;;  %4023 = vmatprep.mubr.msk.bf16.mxu0 %vm994_vm14, %v3667_v8  ;;  %v1341_v18 = vsel %vm4538_vm13, %v3702_v44, %v1340_v11  ;;  %v808_v4 = vshrl.u32 %v4662_v6, 16  ;;  %v1285_v56 = vld [vmem:[#allocation2 + $0x10] sm:$0xe] }
 0x126   :  { %v786_v16 = vor.u32 %v785_v9, %v782_v3  ;;  %v811_v5 = vshll.u32 %v4662_v6, 16  ;;  %v778_v29 = vsel %vm4528_vm12, %v773_v12, %v777_v55  ;;  %v3717_v0 = vcombine.low %v4549_v30, %v1341_v18  ;;  %v1286_v1 = vld [vmem:[#allocation2 + $0x18] sm:$0xe]  ;;  %v1287_v9 = vld [vmem:[#allocation2 + $0x20] sm:$0xe] }
 0x127   :  { %v796_v23 = vrot.slane %v794_v13, 4  ;;  %v799_v24 = vrot.slane %v797_v14, 5  ;;  %v805_v33 = vrot.slane %v803_v15, 5  ;;  %v810_v34 = vrot.slane %v808_v4, 4  ;;  %v1288_v14 = vld [vmem:[#allocation2 + $0x28] sm:$0xe] }
 0x128   :  { %v787_v27 = vrot.slane %v786_v16, 4  ;;  %v813_v35 = vrot.slane %v811_v5, 5  ;;  %v817_v42 = vshll.u32 %v4676_v22, 16  ;;  %v1352_v45 = vrot.slane %v4658_v63, 5  ;;  %v4711_v15 = vld [vmem:[#allocation2 + $0x58] sm:$0xf] }
 0x129   :  { %v800_v37 = vor.u32 %v799_v24, %v796_v23  ;;  %v1356_v47 = vrot.slane %v4676_v22, 5  ;;  %v822_v51 = vshrl.u32 %v4683_v26, 16  ;;  %v825_v52 = vshll.u32 %v4683_v26, 16  ;;  %v4714_v5 = vld [vmem:[#allocation2 + $0x5c] sm:$0x1] }
 0x12a   :  { %v792_v30 = vsel %vm4528_vm12, %v787_v27, %v791_v10  ;;  %v814_v49 = vor.u32 %v813_v35, %v810_v34  ;;  %v819_v54 = vrot.slane %v817_v42, 5  ;;  %v831_v55 = vshll.u32 %v4685_v36, 16  ;;  %v4718_v24 = vld [vmem:[#allocation2 + $0x60] sm:$0xf] }
 0x12b   :  { %v3668_v53 = vcombine.low %v778_v29, %v792_v30  ;;  %v801_v57 = vrot.slane %v800_v37, 4  ;;  %v824_v60 = vrot.slane %v822_v51, 4  ;;  %v827_v61 = vrot.slane %v825_v52, 5  ;;  %v4731_v30 = vld [vmem:[#allocation2 + $0x68] sm:$0xf] }
 0x12c   :  { %v815_v59 = vrot.slane %v814_v49, 4  ;;  %v836_v63 = vshrl.u32 %v4690_v48, 16  ;;  %v833_v3 = vrot.slane %v831_v55, 5  ;;  %v839_v44 = vshll.u32 %v4690_v48, 16  ;;  %v4733_v49 = vld [vmem:[#allocation2 + $0x64] sm:$0x1] }
 0x12d   :  { %4024 = vmatmul.mubr.msk.bf16.vlgmr.msra.gmra.mxu0 %vm994_vm14, %v3668_v53  ;;  %v806_v2 = vsel %vm4528_vm12, %v801_v57, %v805_v33  ;;  %v845_v8 = vshll.u32 %v4694_v50, 16  ;;  %v828_v11 = vor.u32 %v827_v61, %v824_v60  ;;  %v3703_v13 = vrot.slane %v1285_v56, 9  ;;  %v4737_v55 = vld [vmem:[#allocation6 + $0x30] sm:$0xff]  }
 0x12e   :  { %4059 = vmatprep.mubr.msk.bf16.mxu0 %vm994_vm14, %v3717_v0  ;;  %v820_v10 = vsel %vm4528_vm12, %v815_v59, %v819_v54  ;;  %4058 = vmatpush3.bf16.msra.mxu0 %v4502_v39  ;;  %v838_v12 = vrot.slane %v836_v63, 4  ;;  %v841_v18 = vrot.slane %v839_v44, 5  ;;  %v1344_v4 = vrot.slane %v4631_v17, 5  ;;  %v1289_v54 = vld [vmem:[#allocation2 + $0x30] sm:$0xe] }
 0x12f   :  { %v3669_v16 = vcombine.low %v806_v2, %v820_v10  ;;  %v847_v22 = vrot.slane %v845_v8, 5  ;;  %4093 = vmatprep.subr.bf16.mxu0 %v4699_v58  ;;  %v829_v29 = vrot.slane %v828_v11, 4  ;;  %v3704_v0 = vrot.slane %v1286_v1, 9  ;;  %v1290_v11 = vld [vmem:[#allocation2 + $0x38] sm:$0xe] }
 0x130   :  { %v1348_v23 = vrot.slane %v4641_v43, 5  ;;  %v3705_v39 = vrot.slane %v1287_v9, 9  ;;  %v842_v27 = vor.u32 %v841_v18, %v838_v12  ;;  %v1345_v33 = vsel %vm4538_vm13, %v3703_v13, %v1344_v4  ;;  %v1292_v18 = vld [vmem:[#allocation2 + $0x58] sm:$0xe] }
 0x131   :  { %4027 = vmatprep.mubr.msk.bf16.mxu1 %vm994_vm14, %v3669_v16  ;;  %v3706_v34 = vrot.slane %v1288_v14, 9  ;;  %v864_v17 = vshrl.u32 %v4711_v15, 16  ;;  %v834_v35 = vsel %vm4528_vm12, %v829_v29, %v833_v3  ;;  %v867_v42 = vshll.u32 %v4711_v15, 16  ;;  %v4749_v3 = vld [vmem:[#allocation6 + $0x18] sm:$0xff]  }
 0x132   :  { %v1349_v37 = vsel %vm4538_vm13, %v3704_v0, %v1348_v23  ;;  %v1353_v43 = vsel %vm4538_vm13, %v3705_v39, %v1352_v45  ;;  %v843_v51 = vrot.slane %v842_v27, 4  ;;  %v873_v60 = vshll.u32 %v4714_v5, 16  ;;  %v4740_v45 = vld [vmem:[#allocation2 + $0x6c] sm:$0x1]  ;;  %v4758_v23 = vld [vmem:[#allocation2 + $0x70] sm:$0xf] }
 0x133   :  { %v3718_v52 = vcombine.low %v1345_v33, %v1349_v37  ;;  %v1357_v53 = vsel %vm4538_vm13, %v3706_v34, %v1356_v47  ;;  %v866_v57 = vrot.slane %v864_v17, 4  ;;  %v869_v59 = vrot.slane %v867_v42, 5  ;;  %v4762_v34 = vld [vmem:[#allocation2 + $0x74] sm:$0x1] }
 0x134   :  { %v3719_v56 = vcombine.low %v1353_v43, %v1357_v53  ;;  %v878_v61 = vshrl.u32 %v4718_v24, 16  ;;  %v848_v63 = vsel %vm4528_vm12, %v843_v51, %v847_v22  ;;  %v881_v1 = vshll.u32 %v4718_v24, 16 }
 0x135   :  { %4060 = vmatmul.mubr.msk.bf16.vlgmr.msra.gmra.mxu0 %vm994_vm14, %v3718_v52  ;;  %v887_v47 = vshll.u32 %v4733_v49, 16  ;;  %v892_v2 = vshrl.u32 %v4731_v30, 16  ;;  %v3670_v44 = vcombine.low %v834_v35, %v848_v63  ;;  %v870_v8 = vor.u32 %v869_v59, %v866_v57  ;;  %v4778_v52 = vld [vmem:[#allocation2 + $0x7c] sm:$0x1]  ;;  %v4783_v59 = vld [vmem:[#allocation2 + $0x80] sm:$0xf] }
 0x136   :  { %4063 = vmatprep.mubr.msk.bf16.mxu0 %vm994_vm14, %v3719_v56  ;;  %v875_v9 = vrot.slane %v873_v60, 5  ;;  %v880_v10 = vrot.slane %v878_v61, 4  ;;  %4094 = vmatpush3.bf16.msra.mxu0 %v4699_v58  ;;  %v883_v12 = vrot.slane %v881_v1, 5  ;;  %v895_v16 = vshll.u32 %v4731_v30, 16  ;;  %v4785_v60 = vld [vmem:[#allocation2 + $0x88] sm:$0xf] }
 0x137   :  { %v889_v13 = vrot.slane %v887_v47, 5  ;;  %v894_v14 = vrot.slane %v892_v2, 4  ;;  %4129 = vmatprep.subr.bf16.mxu0 %v4737_v55  ;;  %4028 = vmatmul.mubr.msk.bf16.vlgmr.msra.gmra.mxu1 %vm994_vm14, %v3670_v44  ;;  %v871_v22 = vrot.slane %v870_v8, 4  ;;  %v901_v4 = vshll.u32 %v4740_v45, 16  ;;  %v4796_v2 = vld [vmem:[#allocation2 + $0x84] sm:$0x1] }
 0x138   :  { %v3707_v29 = vrot.slane %v1289_v54, 9  ;;  %v1360_v0 = vrot.slane %v4685_v36, 5  ;;  %4040 = vmatpush3.bf16.msra.mxu1 %v4504_v40  ;;  %v884_v58 = vor.u32 %v883_v12, %v880_v10  ;;  %v897_v39 = vrot.slane %v895_v16, 5  ;;  %v4768_v36 = vld [vmem:[#allocation2 + $0x78] sm:$0xf] }
 0x139   :  { %v3708_v27 = vrot.slane %v1290_v11, 9  ;;  %v1364_v33 = vrot.slane %v4694_v50, 5  ;;  %v876_v17 = vsel %vm4528_vm12, %v871_v22, %v875_v9  ;;  %v903_v35 = vrot.slane %v901_v4, 5  ;;  %4075 = vmatprep.subr.bf16.mxu1 %v4749_v3  ;;  %v1294_v16 = vld [vmem:[#allocation2 + $0x68] sm:$0xe] }
 0x13a   :  { %v1361_v37 = vsel %vm4538_vm13, %v3707_v29, %v1360_v0  ;;  %v3710_v43 = vrot.slane %v1292_v18, 9  ;;  %v3671_v40 = vcombine.low %v862_v46, %v876_v17  ;;  %v885_v50 = vrot.slane %v884_v58, 4 }
 0x13b   :  { %v898_v42 = vor.u32 %v897_v39, %v894_v14  ;;  %v1365_v51 = vsel %vm4538_vm13, %v3708_v27, %v1364_v33  ;;  %v1372_v57 = vrot.slane %v4714_v5, 5  ;;  %v906_v54 = vshrl.u32 %v4758_v23, 16  ;;  %v4802_v14 = vld [vmem:[#allocation2 + $0x8c] sm:$0x1]  ;;  %v1293_v27 = vld [vmem:[#allocation2 + $0x60] sm:$0xe] }
 0x13c   :  { %v3720_v53 = vcombine.low %v1361_v37, %v1365_v51  ;;  %v909_v56 = vshll.u32 %v4758_v23, 16  ;;  %4031 = vmatprep.mubr.msk.bf16.mxu1 %vm994_vm14, %v3671_v40  ;;  %v890_v20 = vsel %vm4528_vm12, %v885_v50, %v889_v13  ;;  %v915_v46 = vshll.u32 %v4762_v34, 16 }
 0x13d   :  { %v899_v21 = vrot.slane %v898_v42, 4  ;;  %v920_v61 = vshrl.u32 %v4768_v36, 16  ;;  %v1373_v5 = vsel %vm4538_vm13, %v3710_v43, %v1372_v57  ;;  %v908_v63 = vrot.slane %v906_v54, 4  ;;  %v1295_v43 = vld [vmem:[#allocation2 + $0x70] sm:$0xe] }
 0x13e   :  { %4064 = vmatmul.mubr.msk.bf16.gmra.mxu0 %vm994_vm14, %v3720_v53  ;;  %v911_v1 = vrot.slane %v909_v56, 5  ;;  %v923_v47 = vshll.u32 %v4768_v36, 16  ;;  %v3721_v8 = vcombine.low %v4553_v31, %v1373_v5  ;;  %v929_v13 = vshll.u32 %v4778_v52, 16 }
 0x13f   :  { %v904_v44 = vsel %vm4528_vm12, %v899_v21, %v903_v35  ;;  %v922_v9 = vrot.slane %v920_v61, 4  ;;  %v934_v18 = vshrl.u32 %v4783_v59, 16  ;;  %v937_v22 = vshll.u32 %v4783_v59, 16 }
 0x140   :  { %v3672_v10 = vcombine.low %v890_v20, %v904_v44  ;;  %v912_v11 = vor.u32 %v911_v1, %v908_v63  ;;  %v925_v12 = vrot.slane %v923_v47, 5  ;;  %4067 = vmatprep.mubr.msk.bf16.mxu0 %vm994_vm14, %v3721_v8  ;;  %v943_v4 = vshll.u32 %v4796_v2, 16  ;;  %v1296_v20 = vld [vmem:[#allocation2 + $0x78] sm:$0xe]  ;;  %v1298_v63 = vld [vmem:[#allocation2 + $0x88] sm:$0xe] }
 0x141   :  { %v948_v29 = vshrl.u32 %v4785_v60, 16  ;;  %v917_v0 = vrot.slane %v915_v46, 5  ;;  %v951_v39 = vshll.u32 %v4785_v60, 16  ;;  %v931_v33 = vrot.slane %v929_v13, 5 }
 0x142   :  { %4032 = vmatmul.mubr.msk.bf16.gmra.mxu1 %vm994_vm14, %v3672_v10  ;;  %v913_v31 = vrot.slane %v912_v11, 4  ;;  %v926_v58 = vor.u32 %v925_v12, %v922_v9  ;;  %v936_v17 = vrot.slane %v934_v18, 4  ;;  %v939_v35 = vrot.slane %v937_v22, 5  ;;  %v1297_v9 = vld [vmem:[#allocation2 + $0x80] sm:$0xe] }
 0x143   :  { %v950_v37 = vrot.slane %v948_v29, 4  ;;  %v945_v50 = vrot.slane %v943_v4, 5  ;;  %v953_v42 = vrot.slane %v951_v39, 5  ;;  %v957_v51 = vshll.u32 %v4802_v14, 16  ;;  %v4827_v4 = vld [vmem:[#allocation2 + $0xc] sm:$0x1] }
 0x144   :  { %v927_v40 = vrot.slane %v926_v58, 4  ;;  %v940_v53 = vor.u32 %v939_v35, %v936_v17  ;;  %v3711_v57 = vrot.slane %v1293_v27, 9  ;;  %v1376_v54 = vrot.slane %v4733_v49, 5  ;;  %v1770_v49 = vld [vmem:[#allocation2 + $0x8] sm:$0xf] }
 0x145   :  { %v3712_v56 = vrot.slane %v1294_v16, 9  ;;  %v918_v21 = vsel %vm4528_vm12, %v913_v31, %v917_v0  ;;  %v954_v61 = vor.u32 %v953_v42, %v950_v37  ;;  %v1380_v5 = vrot.slane %v4740_v45, 5  ;;  %v1772_v29 = vld [vmem:[#allocation2 + $0x10] sm:$0xf]  ;;  %v1774_v17 = vld [vmem:[#allocation2 + $0x18] sm:$0xf] }
 0x146   :  { %v932_v46 = vsel %vm4528_vm12, %v927_v40, %v931_v33  ;;  %v941_v47 = vrot.slane %v940_v53, 4  ;;  %v959_v44 = vrot.slane %v957_v51, 5  ;;  %v1377_v8 = vsel %vm4538_vm13, %v3711_v57, %v1376_v54  ;;  %v4248_v35 = vld [vmem:[#allocation2] sm:$0xf]  ;;  %v4844_v57 = vld [vmem:[#allocation2 + $0x1c] sm:$0x1] }
 0x147   :  { %v3673_v1 = vcombine.low %v918_v21, %v932_v46  ;;  %v955_v10 = vrot.slane %v954_v61, 4  ;;  %v1381_v11 = vsel %vm4538_vm13, %v3712_v56, %v1380_v5  ;;  %v3713_v12 = vrot.slane %v1295_v43, 9  ;;  %v1776_v54 = vld [vmem:[#allocation2 + $0x20] sm:$0xf] }
 0x148   :  { %v1384_v13 = vrot.slane %v4762_v34, 5  ;;  %v946_v45 = vsel %vm4528_vm12, %v941_v47, %v945_v50  ;;  %v3722_v16 = vcombine.low %v1377_v8, %v1381_v11  ;;  %v3714_v18 = vrot.slane %v1296_v20, 9  ;;  %v4833_v34 = vld [vmem:[#allocation2 + $0x14] sm:$0x1]  ;;  %v4856_v47 = vld [vmem:[#allocation2 + $0x24] sm:$0x1] }
 0x149   :  { %4035 = vmatprep.mubr.msk.bf16.mxu1 %vm994_vm14, %v3673_v1  ;;  %v1388_v22 = vrot.slane %v4778_v52, 5  ;;  %v960_v31 = vsel %vm4528_vm12, %v955_v10, %v959_v44  ;;  %v3715_v58 = vrot.slane %v1297_v9, 9  ;;  %v1392_v52 = vrot.slane %v4796_v2, 5  ;;  %v4859_v10 = vld [vmem:[#allocation2 + $0x2c] sm:$0x1] }
 0x14a   :  { %v1385_v0 = vsel %vm4538_vm13, %v3713_v12, %v1384_v13  ;;  %v3674_v39 = vcombine.low %v946_v45, %v960_v31  ;;  %4068 = vmatmul.mubr.msk.bf16.gmra.mxu0 %vm994_vm14, %v3722_v16  ;;  %v3716_v33 = vrot.slane %v1298_v63, 9  ;;  %v3684_v37 = vcombine.low %v4248_v35, %v4611_v41  ;;  %v4861_v16 = vld [vmem:[#allocation6 + $0x28] sm:$0xff]  }
 0x14b   :  { %v1389_v27 = vsel %vm4538_vm13, %v3714_v18, %v1388_v22  ;;  %v1396_v40 = vrot.slane %v4802_v14, 5  ;;  %v1803_v50 = vshrl.u32 %v1770_v49, 16  ;;  %v1393_v42 = vsel %vm4538_vm13, %v3715_v58, %v1392_v52 }
 0x14c   :  { %v3723_v43 = vcombine.low %v1385_v0, %v1389_v27  ;;  %4036 = vmatmul.mubr.msk.bf16.gmra.mxu1 %vm994_vm14, %v3674_v39  ;;  %v1806_v51 = vshll.u32 %v1770_v49, 16  ;;  %v1817_v53 = vshrl.u32 %v1772_v29, 16  ;;  %v3685_v41 = vcombine.low %v4625_v7, %v4639_v38  ;;  %v1778_v7 = vld [vmem:[#allocation2 + $0x28] sm:$0xf] }
 0x14d   :  { %4041 = vmatprep.mubr.msk.bf16.mxu1 %vm994_vm14, %v3684_v37  ;;  %v1805_v2 = vrot.slane %v1803_v50, 4  ;;  %v1812_v14 = vshll.u32 %v4827_v4, 16  ;;  %v1820_v56 = vshll.u32 %v1772_v29, 16  ;;  %v1397_v20 = vsel %vm4538_vm13, %v3716_v33, %v1396_v40  ;;  %v1780_v29 = vld [vmem:[#allocation2 + $0x30] sm:$0xf] }
 0x14e   :  { %4071 = vmatprep.mubr.msk.bf16.mxu0 %vm994_vm14, %v3723_v43  ;;  %v1808_v21 = vrot.slane %v1806_v51, 5  ;;  %v1819_v46 = vrot.slane %v1817_v53, 4  ;;  %v1826_v61 = vshll.u32 %v4833_v34, 16  ;;  %v3724_v5 = vcombine.low %v1393_v42, %v1397_v20  ;;  %v4872_v43 = vld [vmem:[#allocation2 + $0x34] sm:$0x1] }
 0x14f   :  { %v3686_v63 = vcombine.low %v4656_v62, %v4662_v6  ;;  %v1822_v1 = vrot.slane %v1820_v56, 5  ;;  %v1831_v44 = vshrl.u32 %v1774_v17, 16  ;;  %v1834_v8 = vshll.u32 %v1774_v17, 16 }
 0x150   :  { %v1809_v38 = vor.u32 %v1808_v21, %v1805_v2  ;;  %v1840_v9 = vshll.u32 %v4844_v57, 16  ;;  %v1845_v49 = vshrl.u32 %v1776_v54, 16  ;;  %v1814_v11 = vrot.slane %v1812_v14, 5 }
 0x151   :  { %v1823_v12 = vor.u32 %v1822_v1, %v1819_v46  ;;  %v1833_v13 = vrot.slane %v1831_v44, 4  ;;  %v1848_v45 = vshll.u32 %v1776_v54, 16  ;;  %v1828_v6 = vrot.slane %v1826_v61, 5  ;;  %v4884_v44 = vld [vmem:[#allocation2 + $0x3c] sm:$0x1] }
 0x152   :  { %4072 = vmatmul.mubr.msk.bf16.gmra.mxu0 %vm994_vm14, %v3724_v5  ;;  %v1810_v62 = vrot.slane %v1809_v38, 4  ;;  %v1836_v18 = vrot.slane %v1834_v8, 5  ;;  %v1847_v22 = vrot.slane %v1845_v49, 4  ;;  %v1842_v0 = vrot.slane %v1840_v9, 5  ;;  %v1784_v5 = vld [vmem:[#allocation2 + $0x40] sm:$0xf] }
 0x153   :  { %v1824_v31 = vrot.slane %v1823_v12, 4  ;;  %v1850_v58 = vrot.slane %v1848_v45, 5  ;;  %v1854_v39 = vshll.u32 %v4856_v47, 16  ;;  %v1859_v33 = vshrl.u32 %v1778_v7, 16  ;;  %v4886_v8 = vld [vmem:[#allocation6 + $0x40] sm:$0xff]  }
 0x154   :  { %4042 = vmatmul.mubr.msk.bf16.vlgmr.msra.gmra.mxu1 %vm994_vm14, %v3685_v41  ;;  %v1815_v27 = vsel %vm4528_vm12, %v1810_v62, %v1814_v11  ;;  %v1837_v52 = vor.u32 %v1836_v18, %v1833_v13  ;;  %v1862_v17 = vshll.u32 %v1778_v7, 16  ;;  %v1868_v40 = vshll.u32 %v4859_v10, 16  ;;  %v1782_v41 = vld [vmem:[#allocation2 + $0x38] sm:$0xf]  ;;  %v4249_v49 = vld [vmem:[#allocation2 + $0x50] sm:$0xf] }
 0x155   :  { %4076 = vmatpush3.bf16.msra.mxu1 %v4749_v3  ;;  %4045 = vmatprep.mubr.msk.bf16.mxu1 %vm994_vm14, %v3686_v63  ;;  %v1829_v35 = vsel %vm4528_vm12, %v1824_v31, %v1828_v6  ;;  %v1851_v37 = vor.u32 %v1850_v58, %v1847_v22  ;;  %v1873_v50 = vshrl.u32 %v1780_v29, 16  ;;  %v1861_v53 = vrot.slane %v1859_v33, 4  ;;  %v4889_v12 = vld [vmem:[#allocation2 + $0x44] sm:$0x1]  ;;  %v1786_v13 = vld [vmem:[#allocation2 + $0x58] sm:$0xf] }
 0x156   :  { %v3751_v42 = vcombine.low %v1815_v27, %v1829_v35  ;;  %v1838_v51 = vrot.slane %v1837_v52, 4  ;;  %v1864_v54 = vrot.slane %v1862_v17, 5  ;;  %4111 = vmatprep.subr.bf16.mxu1 %v4861_v16  ;;  %v1856_v3 = vrot.slane %v1854_v39, 5  ;;  %v4891_v22 = vld [vmem:[#allocation2 + $0x5c] sm:$0x1] }
 0x157   :  { %v1852_v2 = vrot.slane %v1851_v37, 4  ;;  %v1875_v14 = vrot.slane %v1873_v50, 4  ;;  %v1876_v56 = vshll.u32 %v1780_v29, 16  ;;  %v3687_v20 = vcombine.low %v4683_v26, %v4690_v48  ;;  %v1788_v58 = vld [vmem:[#allocation2 + $0x60] sm:$0xf] }
 0x158   :  { %4095 = vmatprep.mubr.msk.bf16.mxu0 %vm994_vm14, %v3751_v42  ;;  %v1843_v21 = vsel %vm4528_vm12, %v1838_v51, %v1842_v0  ;;  %v1865_v46 = vor.u32 %v1864_v54, %v1861_v53  ;;  %v1882_v61 = vshll.u32 %v4872_v43, 16  ;;  %v1887_v7 = vshrl.u32 %v1782_v41, 16  ;;  %v4906_v50 = vld [vmem:[#allocation2 + $0x64] sm:$0x1] }
 0x159   :  { %v1857_v63 = vsel %vm4528_vm12, %v1852_v2, %v1856_v3  ;;  %v1878_v1 = vrot.slane %v1876_v56, 5  ;;  %v1890_v38 = vshll.u32 %v1782_v41, 16  ;;  %v3688_v26 = vcombine.low %v4249_v49, %v4711_v15  ;;  %v1790_v2 = vld [vmem:[#allocation2 + $0x68] sm:$0xf] }
 0x15a   :  { %v3752_v9 = vcombine.low %v1843_v21, %v1857_v63  ;;  %v1866_v48 = vrot.slane %v1865_v46, 4  ;;  %v1870_v11 = vrot.slane %v1868_v40, 5  ;;  %v1889_v62 = vrot.slane %v1887_v7, 4  ;;  %v1792_v21 = vld [vmem:[#allocation2 + $0x70] sm:$0xf] }
 0x15b   :  { %v1879_v45 = vor.u32 %v1878_v1, %v1875_v14  ;;  %v1892_v6 = vrot.slane %v1890_v38, 5  ;;  %v1901_v18 = vshrl.u32 %v1784_v5, 16  ;;  %v1884_v29 = vrot.slane %v1882_v61, 5  ;;  %v4913_v1 = vld [vmem:[#allocation2 + $0x6c] sm:$0x1] }
 0x15c   :  { %4046 = vmatmul.mubr.msk.bf16.gmra.mxu1 %vm994_vm14, %v3687_v20  ;;  %4096 = vmatmul.mubr.msk.bf16.vlgmr.msra.gmra.mxu0 %vm994_vm14, %v3752_v9  ;;  %v3689_v31 = vcombine.low %v4718_v24, %v4731_v30  ;;  %v1896_v15 = vshll.u32 %v4884_v44, 16  ;;  %v1904_v0 = vshll.u32 %v1784_v5, 16  ;;  %v1871_v39 = vsel %vm4528_vm12, %v1866_v48, %v1870_v11  ;;  %v4917_v9 = vld [vmem:[#allocation2 + $0x74] sm:$0x1] }
 0x15d   :  { %4049 = vmatprep.mubr.msk.bf16.mxu1 %vm994_vm14, %v3688_v26  ;;  %v1880_v27 = vrot.slane %v1879_v45, 4  ;;  %v1893_v52 = vor.u32 %v1892_v6, %v1889_v62  ;;  %v1903_v33 = vrot.slane %v1901_v18, 4  ;;  %4130 = vmatpush3.bf16.msra.mxu0 %v4737_v55  ;;  %v1910_v35 = vshll.u32 %v4889_v12, 16 }
 0x15e   :  { %v1906_v17 = vrot.slane %v1904_v0, 5  ;;  %v1915_v37 = vshrl.u32 %v1786_v13, 16  ;;  %v1918_v40 = vshll.u32 %v1786_v13, 16  ;;  %4165 = vmatprep.subr.bf16.mxu0 %v4886_v8  ;;  %v1924_v42 = vshll.u32 %v4891_v22, 16  ;;  %v1794_v13 = vld [vmem:[#allocation2 + $0x78] sm:$0xf] }
 0x15f   :  { %v1885_v24 = vsel %vm4528_vm12, %v1880_v27, %v1884_v29  ;;  %v1894_v30 = vrot.slane %v1893_v52, 4  ;;  %v1929_v51 = vshrl.u32 %v1788_v58, 16  ;;  %v1898_v3 = vrot.slane %v1896_v15, 5  ;;  %v1796_v29 = vld [vmem:[#allocation2 + $0x80] sm:$0xf] }
 0x160   :  { %v3753_v53 = vcombine.low %v1871_v39, %v1885_v24  ;;  %v1907_v54 = vor.u32 %v1906_v17, %v1903_v33  ;;  %v1917_v41 = vrot.slane %v1915_v37, 4  ;;  %v1920_v55 = vrot.slane %v1918_v40, 5 }
 0x161   :  { %v3690_v14 = vcombine.low %v4758_v23, %v4768_v36  ;;  %v1931_v56 = vrot.slane %v1929_v51, 4  ;;  %v1932_v20 = vshll.u32 %v1788_v58, 16  ;;  %v1912_v61 = vrot.slane %v1910_v35, 5 }
 0x162   :  { %4099 = vmatprep.mubr.msk.bf16.mxu0 %vm994_vm14, %v3753_v53  ;;  %v1908_v46 = vrot.slane %v1907_v54, 4  ;;  %v1921_v5 = vor.u32 %v1920_v55, %v1917_v41  ;;  %v1938_v63 = vshll.u32 %v4906_v50, 16  ;;  %v1899_v7 = vsel %vm4528_vm12, %v1894_v30, %v1898_v3  ;;  %v1798_v53 = vld [vmem:[#allocation2 + $0x88] sm:$0xf] }
 0x163   :  { %v1934_v38 = vrot.slane %v1932_v20, 5  ;;  %v1943_v49 = vshrl.u32 %v1790_v2, 16  ;;  %v1946_v23 = vshll.u32 %v1790_v2, 16  ;;  %v1926_v48 = vrot.slane %v1924_v42, 5  ;;  %v4932_v42 = vld [vmem:[#allocation2 + $0x7c] sm:$0x1] }
 0x164   :  { %4050 = vmatmul.mubr.msk.bf16.gmra.mxu1 %vm994_vm14, %v3689_v31  ;;  %v1913_v36 = vsel %vm4528_vm12, %v1908_v46, %v1912_v61  ;;  %v1922_v26 = vrot.slane %v1921_v5, 4  ;;  %v1957_v11 = vshrl.u32 %v1792_v21, 16  ;;  %v1940_v15 = vrot.slane %v1938_v63, 5  ;;  %v4934_v2 = vld [vmem:[#allocation2 + $0x84] sm:$0x1] }
 0x165   :  { %v3754_v45 = vcombine.low %v1899_v7, %v1913_v36  ;;  %4053 = vmatprep.mubr.msk.bf16.mxu1 %vm994_vm14, %v3690_v14  ;;  %v1935_v62 = vor.u32 %v1934_v38, %v1931_v56  ;;  %v1945_v6 = vrot.slane %v1943_v49, 4  ;;  %v1948_v18 = vrot.slane %v1946_v23, 5  ;;  %v1800_v14 = vld [vmem:[#allocation2 + $0x90] sm:$0xf] }
 0x166   :  { %v1952_v0 = vshll.u32 %v4913_v1, 16  ;;  %v1959_v58 = vrot.slane %v1957_v11, 4  ;;  %v1960_v39 = vshll.u32 %v1792_v21, 16  ;;  %v1966_v52 = vshll.u32 %v4917_v9, 16  ;;  %v4227_v21 = vld [vmem:[#allocation2 + $0x8] ss:$8 sps:$4 sm:$0xff]  }
 0x167   :  { %4100 = vmatmul.mubr.msk.bf16.gmra.mxu0 %vm994_vm14, %v3754_v45  ;;  %v1936_v31 = vrot.slane %v1935_v62, 4  ;;  %v1949_v27 = vor.u32 %v1948_v18, %v1945_v6  ;;  %v1971_v33 = vshrl.u32 %v1794_v13, 16  ;;  %v1974_v35 = vshll.u32 %v1794_v13, 16  ;;  %v4945_v6 = vld [vmem:[#allocation2 + $0x8c] sm:$0x1] }
 0x168   :  { %v1962_v17 = vrot.slane %v1960_v39, 5  ;;  %v1985_v37 = vshrl.u32 %v1796_v29, 16  ;;  %v1927_v40 = vsel %vm4528_vm12, %v1922_v26, %v1926_v48  ;;  %v3691_v30 = vcombine.low %v4783_v59, %v4785_v60  ;;  %v4947_v18 = vld [vmem:[#allocation2 + $0x94] sm:$0x1] }
 0x169   :  { %v1941_v24 = vsel %vm4528_vm12, %v1936_v31, %v1940_v15  ;;  %v1973_v51 = vrot.slane %v1971_v33, 4  ;;  %v1950_v41 = vrot.slane %v1949_v27, 4  ;;  %v1976_v3 = vrot.slane %v1974_v35, 5  ;;  %v4229_v27 = vld [vmem:[#allocation2 + $0x18] ss:$8 sps:$4 sm:$0xff]  }
 0x16a   :  { %v3755_v54 = vcombine.low %v1927_v40, %v1941_v24  ;;  %v1963_v55 = vor.u32 %v1962_v17, %v1959_v58  ;;  %v1954_v56 = vrot.slane %v1952_v0, 5  ;;  %v1968_v20 = vrot.slane %v1966_v52, 5  ;;  %v4952_v35 = vld [vmem:[#allocation6 + $0x38] sm:$0xff]   ;;  %v4230_v24 = vld [vmem:[#allocation2 + $0x28] ss:$8 sps:$4 sm:$0xff]  }
 0x16b   :  { %v1987_v46 = vrot.slane %v1985_v37, 4  ;;  %v1988_v61 = vshll.u32 %v1796_v29, 16  ;;  %v1977_v60 = vor.u32 %v1976_v3, %v1973_v51  ;;  %v1999_v5 = vshrl.u32 %v1798_v53, 16 }
 0x16c   :  { %4103 = vmatprep.mubr.msk.bf16.mxu0 %vm994_vm14, %v3755_v54  ;;  %4054 = vmatmul.mubr.msk.bf16.gmra.mxu1 %vm994_vm14, %v3691_v30  ;;  %v1964_v59 = vrot.slane %v1963_v55, 4  ;;  %v2002_v63 = vshll.u32 %v1798_v53, 16  ;;  %v1980_v7 = vshll.u32 %v4932_v42, 16  ;;  %v1994_v49 = vshll.u32 %v4934_v2, 16  ;;  %v336_v30 = vld [vmem:[#allocation2 + $0x98] sm:$0x1] }
 0x16d   :  { %4077 = vmatprep.mubr.msk.bf16.mxu1 %vm994_vm14, %v4227_v21  ;;  %v1990_v38 = vrot.slane %v1988_v61, 5  ;;  %v2013_v23 = vshrl.u32 %v1800_v14, 16  ;;  %v1955_v36 = vsel %vm4528_vm12, %v1950_v41, %v1954_v56  ;;  %v2001_v48 = vrot.slane %v1999_v5, 4  ;;  %v4232_v21 = vld [vmem:[#allocation2 + $0x10] ss:$8 sps:$4 sm:$0xff]  }
 0x16e   :  { %v1969_v26 = vsel %vm4528_vm12, %v1964_v59, %v1968_v20  ;;  %v2004_v11 = vrot.slane %v2002_v63, 5  ;;  %v1978_v45 = vrot.slane %v1977_v60, 4  ;;  %v2016_v0 = vshll.u32 %v1800_v14, 16  ;;  %v2197_v61 = vld [vmem:[#allocation2 + $0x10] sm:$0xe] }
 0x16f   :  { %v3756_v13 = vcombine.low %v1955_v36, %v1969_v26  ;;  %v1991_v62 = vor.u32 %v1990_v38, %v1987_v46  ;;  %v2015_v15 = vrot.slane %v2013_v23, 4  ;;  %v1982_v58 = vrot.slane %v1980_v7, 5  ;;  %v4233_v46 = vld [vmem:[#allocation2 + $0x38] ss:$8 sps:$4 sm:$0xff]   ;;  %v2201_v5 = vld [vmem:[#allocation2 + $0x30] sm:$0xe] }
 0x170   :  { %v2005_v29 = vor.u32 %v2004_v11, %v2001_v48  ;;  %v1996_v31 = vrot.slane %v1994_v49, 5  ;;  %v2008_v52 = vshll.u32 %v4945_v6, 16  ;;  %v2018_v33 = vrot.slane %v2016_v0, 5  ;;  %v2199_v59 = vld [vmem:[#allocation2 + $0x20] sm:$0xe] }
 0x171   :  { %4104 = vmatmul.mubr.msk.bf16.gmra.mxu0 %vm994_vm14, %v3756_v13  ;;  %v1992_v39 = vrot.slane %v1991_v62, 4  ;;  %v2022_v17 = vshll.u32 %v4947_v18, 16  ;;  %v1983_v37 = vsel %vm4528_vm12, %v1978_v45, %v1982_v58  ;;  %v337_v14 = vsel %vm4410_vm4, 0, %v336_v30  ;;  %v4235_v60 = vld [vmem:[#allocation2 + $0x58] ss:$8 sps:$4 sm:$0xff]  }
 0x172   :  { %v2006_v53 = vrot.slane %v2005_v29, 4  ;;  %v2019_v54 = vor.u32 %v2018_v33, %v2015_v15  ;;  %v2010_v41 = vrot.slane %v2008_v52, 5  ;;  %338 = vst [vmem:[#allocation2 + $0x98] sm:$0x1] %v337_v14  ;;  %v2198_v63 = vld [vmem:[#allocation2 + $0x18] sm:$0xe] }
 0x173   :  { %v1997_v40 = vsel %vm4528_vm12, %v1992_v39, %v1996_v31  ;;  %v2024_v3 = vrot.slane %v2022_v17, 5  ;;  %v3769_v7 = vrot.slane %v2197_v61, 9  ;;  %v2250_v38 = vrot.slane %v4833_v34, 5  ;;  %v2200_v36 = vld [vmem:[#allocation2 + $0x28] sm:$0xe] }
 0x174   :  { %v3757_v51 = vcombine.low %v1983_v37, %v1997_v40  ;;  %4078 = vmatmul.mubr.msk.bf16.vlgmr.msra.gmra.mxu1 %vm994_vm14, %v4229_v27  ;;  %v2020_v55 = vrot.slane %v2019_v54, 4  ;;  %v2011_v56 = vsel %vm4528_vm12, %v2006_v53, %v2010_v41  ;;  %v3771_v49 = vrot.slane %v2199_v59, 9  ;;  %v368_v11 = vld [vmem:[#allocation2 + $0x4c] sm:$0x1]  ;;  %v4234_v13 = vld [vmem:[#allocation2 + $0x20] ss:$8 sps:$4 sm:$0xff]  }
 0x175   :  { %4112 = vmatpush3.bf16.msra.mxu1 %v4861_v16  ;;  %4081 = vmatprep.mubr.msk.bf16.mxu1 %vm994_vm14, %v4230_v24  ;;  %v2258_v23 = vrot.slane %v4856_v47, 5  ;;  %v3773_v26 = vrot.slane %v2201_v5, 9  ;;  %v2266_v48 = vrot.slane %v4872_v43, 5  ;;  %v3768_v45 = vrot.slane %v2196_v28, 9  ;;  %v4236_v0 = vld [vmem:[#allocation2 + $0x30] ss:$8 sps:$4 sm:$0xff]  }
 0x176   :  { %4107 = vmatprep.mubr.msk.bf16.mxu0 %vm994_vm14, %v3757_v51  ;;  %4147 = vmatprep.subr.bf16.mxu1 %v4952_v35  ;;  %v2025_v20 = vsel %vm4528_vm12, %v2020_v55, %v2024_v3  ;;  %v2246_v62 = vrot.slane %v4827_v4, 5  ;;  %v3770_v29 = vrot.slane %v2198_v63, 9  ;;  %v2254_v15 = vrot.slane %v4844_v57, 5  ;;  %v4237_v58 = vld [vmem:[#allocation2 + $0x68] ss:$8 sps:$4 sm:$0xff]  }
 0x177   :  { %v3758_v16 = vcombine.low %v2011_v56, %v2025_v20  ;;  %v3772_v39 = vrot.slane %v2200_v36, 9  ;;  %v2262_v34 = vrot.slane %v4859_v10, 5  ;;  %v4979_v31 = vld [vmem:[#allocation2 + $0x14] sm:$0x1]  ;;  %v4239_v47 = vld [vmem:[#allocation2 + $0x78] ss:$8 sps:$4 sm:$0xff]   ;;  %v4983_v27 = vsel %vm4538_vm13, %v3769_v7, %v2250_v38 }
 0x178   :  { %v4987_v43 = vsel %vm4538_vm13, %v3771_v49, %v2258_v23  ;;  %v4989_v4 = vld [vmem:[#allocation2 + $0x1c] sm:$0x1]  ;;  %v3107_v52 = vld [vmem:[#allocation2 + $0x10] sm:$0xe]  ;;  %v3108_v57 = vld [vmem:[#allocation2 + $0x18] sm:$0xe]  ;;  %v4993_v33 = vsel %vm4538_vm13, %v3773_v26, %v2266_v48  ;;  %v5000_v40 = vsel %vm4538_vm13, %v3768_v45, %v2246_v62  ;;  %v5004_v24 = vsel %vm4538_vm13, %v3770_v29, %v2254_v15 }
 0x179   :  { %4108 = vmatmul.mubr.msk.bf16.gmra.mxu0 %vm994_vm14, %v3758_v16  ;;  %v2202_v10 = vld [vmem:[#allocation2 + $0x38] sm:$0xe]  ;;  %v2203_v17 = vld [vmem:[#allocation2 + $0x40] sm:$0xe]  ;;  %v369_v37 = vsel %vm4418_vm5, 0, %v368_v11  ;;  %v3784_v41 = vcombine.low %v5000_v40, %v4983_v27  ;;  %v3785_v55 = vcombine.low %v5004_v24, %v4987_v43  ;;  %v5018_v3 = vsel %vm4538_vm13, %v3772_v39, %v2262_v34 }
 0x17a   :  { %4131 = vmatprep.mubr.msk.bf16.mxu0 %vm994_vm14, %v4232_v21  ;;  %v5006_v30 = vld [vmem:[#allocation2 + $0x24] sm:$0x1]  ;;  %v5008_v51 = vld [vmem:[#allocation2 + $0x2c] sm:$0x1]  ;;  %v3109_v53 = vld [vmem:[#allocation2 + $0x20] sm:$0xe]  ;;  %v3786_v21 = vcombine.low %v5018_v3, %v4993_v33 }
 0x17b   :  { %v3110_v54 = vld [vmem:[#allocation2 + $0x28] sm:$0xe]  ;;  %370 = vst [vmem:[#allocation2 + $0x4c] sm:$0x1] %v369_v37  ;;  %v3835_v14 = vrot.slane %v3107_v52, 9  ;;  %v3836_v61 = vrot.slane %v3108_v57, 9 }
 0x17c   :  { %4082 = vmatmul.mubr.msk.bf16.gmra.mxu1 %vm994_vm14, %v4233_v46  ;;  %v2204_v56 = vld [vmem:[#allocation2 + $0x58] sm:$0xe]  ;;  %v2205_v20 = vld [vmem:[#allocation2 + $0x60] sm:$0xe]  ;;  %v5020_v16 = vld [vmem:[#allocation2 + $0x34] sm:$0x1] }
 0x17d   :  { %4085 = vmatprep.mubr.msk.bf16.mxu1 %vm994_vm14, %v4235_v60  ;;  %v3157_v46 = vrot.slane %v4979_v31, 5  ;;  %v3161_v59 = vrot.slane %v4989_v4, 5  ;;  %v3111_v60 = vld [vmem:[#allocation2 + $0x30] sm:$0xe]  ;;  %v3775_v5 = vrot.slane %v2203_v17, 9  ;;  %v2274_v28 = vrot.slane %v4889_v12, 5 }
 0x17e   :  { %v3838_v63 = vrot.slane %v3110_v54, 9  ;;  %v3169_v7 = vrot.slane %v5008_v51, 5  ;;  %v5030_v38 = vld [vmem:[#allocation2 + $0x3c] sm:$0x1]  ;;  %v3774_v49 = vrot.slane %v2202_v10, 9  ;;  %v2270_v23 = vrot.slane %v4884_v44, 5 }
 0x17f   :  { %v3777_v36 = vrot.slane %v2205_v20, 9  ;;  %v2282_v26 = vrot.slane %v4906_v50, 5  ;;  %v3112_v48 = vld [vmem:[#allocation2 + $0x38] sm:$0xe]  ;;  %v3837_v11 = vrot.slane %v3109_v53, 9  ;;  %v3173_v45 = vrot.slane %v5020_v16, 5 }
 0x180   :  { %v2206_v62 = vld [vmem:[#allocation2 + $0x68] sm:$0xe]  ;;  %v5038_v29 = vsel %vm4538_vm13, %v3835_v14, %v3157_v46  ;;  %v5042_v15 = vsel %vm4538_vm13, %v3836_v61, %v3161_v59  ;;  %v3776_v44 = vrot.slane %v2204_v56, 9  ;;  %v2278_v50 = vrot.slane %v4891_v22, 5  ;;  %v2209_v37 = vld [vmem:[#allocation2 + $0x80] sm:$0xe] }
 0x181   :  { %4132 = vmatmul.mubr.msk.bf16.vlgmr.msra.gmra.mxu0 %vm994_vm14, %v4234_v13  ;;  %v3165_v13 = vrot.slane %v5006_v30, 5  ;;  %v4238_v12 = vld [vmem:[#allocation2 + $0x40] ss:$8 sps:$4 sm:$0xff]   ;;  %v5047_v34 = vsel %vm4538_vm13, %v3775_v5, %v2274_v28  ;;  %v3840_v27 = vrot.slane %v3112_v48, 9  ;;  %v3177_v52 = vrot.slane %v5030_v38, 5 }
 0x182   :  { %4135 = vmatprep.mubr.msk.bf16.mxu0 %vm994_vm14, %v4236_v0  ;;  %4166 = vmatpush3.bf16.msra.mxu0 %v4886_v8  ;;  %v3839_v8 = vrot.slane %v3111_v60, 9  ;;  %v2207_v0 = vld [vmem:[#allocation2 + $0x70] sm:$0xe]  ;;  %v5057_v57 = vsel %vm4538_vm13, %v3774_v49, %v2270_v23  ;;  %v5061_v22 = vsel %vm4538_vm13, %v3777_v36, %v2282_v26  ;;  %v3778_v10 = vrot.slane %v2206_v62, 9  ;;  %v5075_v56 = vld [vmem:[#allocation2 + $0x44] sm:$0x1] }
 0x183   :  { %v4241_v39 = vld [vmem:[#allocation2 + $0x88] ss:$8 sps:$4 sm:$0xff]   ;;  %v2286_v17 = vrot.slane %v4913_v1, 5  ;;  %v5068_v40 = vsel %vm4538_vm13, %v3837_v11, %v3165_v13  ;;  %v3779_v54 = vrot.slane %v2207_v0, 9  ;;  %v2290_v14 = vrot.slane %v4917_v9, 5 }
 0x184   :  { %4086 = vmatmul.mubr.msk.bf16.gmra.mxu1 %vm994_vm14, %v4237_v58  ;;  %v4240_v58 = vld [vmem:[#allocation2 + $0x60] ss:$8 sps:$4 sm:$0xff]   ;;  %v5072_v53 = vsel %vm4538_vm13, %v3839_v8, %v3173_v45  ;;  %v3851_v1 = vcombine.low %v5038_v29, %v5042_v15  ;;  %v3787_v46 = vcombine.low %v5057_v57, %v5047_v34  ;;  %v5086_v59 = vsel %vm4538_vm13, %v3776_v44, %v2278_v50  ;;  %v2208_v60 = vld [vmem:[#allocation2 + $0x78] sm:$0xe]  ;;  %v5088_v9 = vld [vmem:[#allocation2 + $0x64] sm:$0x1] }
 0x185   :  { %4089 = vmatprep.mubr.msk.bf16.mxu1 %vm994_vm14, %v4239_v47  ;;  %v5051_v47 = vsel %vm4538_vm13, %v3838_v63, %v3169_v7  ;;  %v3113_v20 = vld [vmem:[#allocation2 + $0x40] sm:$0xe]  ;;  %v5094_v28 = vsel %vm4538_vm13, %v3840_v27, %v3177_v52  ;;  %v5096_v63 = vld [vmem:[#allocation2 + $0x48] sm:$0xe]  ;;  %v3781_v7 = vrot.slane %v2209_v37, 9  ;;  %v2298_v49 = vrot.slane %v4934_v2, 5 }
 0x186   :  { %v3115_v5 = vld [vmem:[#allocation2 + $0x60] sm:$0xe]  ;;  %v3116_v23 = vld [vmem:[#allocation2 + $0x68] sm:$0xe]  ;;  %v2681_v36 = vld [vmem:[#allocation2 + $0x10] sm:$0xf]  ;;  %v5103_v11 = vsel %vm4538_vm13, %v3778_v10, %v2286_v17  ;;  %v5110_v2 = vsel %vm4538_vm13, %v3779_v54, %v2290_v14 }
 0x187   :  { %v4242_v26 = vld [vmem:[#allocation2 + $0x70] ss:$8 sps:$4 sm:$0xff]   ;;  %v3841_v13 = vrot.slane %v3113_v20, 9  ;;  %v3181_v8 = vrot.slane %v5075_v56, 5  ;;  %v5106_v45 = vld [vmem:[#allocation2 + $0x6c] sm:$0x1]  ;;  %v5116_v37 = vsel %vm4538_vm13, %v3781_v7, %v2298_v49 }
 0x188   :  { %v2210_v62 = vld [vmem:[#allocation2 + $0x88] sm:$0xe]  ;;  %v3780_v44 = vrot.slane %v2208_v60, 9  ;;  %v2294_v50 = vrot.slane %v4932_v42, 5  ;;  %v3843_v0 = vrot.slane %v3115_v5, 9  ;;  %v3844_v27 = vrot.slane %v3116_v23, 9 }
 0x189   :  { %4136 = vmatmul.mubr.msk.bf16.gmra.mxu0 %vm994_vm14, %v4238_v12  ;;  %v4243_v12 = vld [vmem:[#allocation2 + $0x80] ss:$8 sps:$4 sm:$0xff]   ;;  %v2683_v52 = vld [vmem:[#allocation2 + $0x18] sm:$0xf]  ;;  %v2714_v10 = vshrl.u32 %v2681_v36, 16  ;;  %v2717_v17 = vshll.u32 %v2681_v36, 16 }
 0x18a   :  { %4139 = vmatprep.mubr.msk.bf16.mxu0 %vm994_vm14, %v4240_v58  ;;  %v2211_v58 = vld [vmem:[#allocation2 + $0x90] sm:$0xe]  ;;  %v3193_v20 = vrot.slane %v5106_v45, 5  ;;  %v3782_v48 = vrot.slane %v2210_v62, 9  ;;  %v2302_v54 = vrot.slane %v4945_v6, 5  ;;  %v3842_v23 = vrot.slane %v5096_v63, 9 }
 0x18b   :  { %v5120_v14 = vld [vmem:[#allocation2 + $0x74] sm:$0x1]  ;;  %v5122_v42 = vld [vmem:[#allocation2 + $0x7c] sm:$0x1]  ;;  %v3783_v36 = vrot.slane %v2211_v58, 9  ;;  %v2306_v7 = vrot.slane %v4947_v18, 5  ;;  %v5136_v6 = vsel %vm4538_vm13, %v3841_v13, %v3181_v8 }
 0x18c   :  { %4090 = vmatmul.mubr.msk.bf16.gmra.mxu1 %vm994_vm14, %v4241_v39  ;;  %v3189_v39 = vrot.slane %v5088_v9, 5  ;;  %v398_v60 = vld [vmem:[#allocation2 + $0x9c] sm:$0x1]  ;;  %v3117_v49 = vld [vmem:[#allocation2 + $0x70] sm:$0xe]  ;;  %v2728_v62 = vshrl.u32 %v2683_v52, 16  ;;  %v5165_v33 = vsel %vm4538_vm13, %v3782_v48, %v2302_v54 }
 0x18d   :  { %4113 = vmatprep.mubr.msk.bf16.mxu1 %vm994_vm14, %v3784_v41  ;;  %v3788_v41 = vcombine.low %v5086_v59, %v5061_v22  ;;  %v3118_v63 = vld [vmem:[#allocation2 + $0x78] sm:$0xe]  ;;  %v2731_v58 = vshll.u32 %v2683_v52, 16  ;;  %v5142_v18 = vld [vmem:[#allocation2 + $0x84] sm:$0x1]  ;;  %v2716_v24 = vrot.slane %v2714_v10, 4  ;;  %v5169_v32 = vsel %vm4538_vm13, %v3783_v36, %v2306_v7 }
 0x18e   :  { %v2687_v13 = vld [vmem:[#allocation2 + $0x28] sm:$0xf]  ;;  %v399_v8 = vsel %vm4418_vm5, 0, %v398_v60  ;;  %v3845_v3 = vrot.slane %v3117_v49, 9  ;;  %v3846_v52 = vrot.slane %v3118_v63, 9  ;;  %v2730_v10 = vrot.slane %v2728_v62, 4 }
 0x18f   :  { %400 = vst [vmem:[#allocation2 + $0x9c] sm:$0x1] %v399_v8  ;;  %v2756_v48 = vshrl.u32 %v2687_v13, 16  ;;  %v2759_v54 = vshll.u32 %v2687_v13, 16  ;;  %v4245_v60 = vld [vmem:[#allocation2 + $0x90] ss:$8 sps:$4 sm:$0xff]   ;;  %v3791_v63 = vcombine.low %v5165_v33, %v5169_v32 }
 0x190   :  { %v3205_v36 = vrot.slane %v5142_v18, 5  ;;  %v2689_v13 = vld [vmem:[#allocation2 + $0x30] sm:$0xf]  ;;  %v2737_v15 = vshll.u32 %v4989_v4, 16 }
 0x191   :  { %4140 = vmatmul.mubr.msk.bf16.gmra.mxu0 %vm994_vm14, %v4242_v26  ;;  %v5140_v26 = vsel %vm4538_vm13, %v3780_v44, %v2294_v50  ;;  %v5157_v44 = vsel %vm4538_vm13, %v3843_v0, %v3189_v39  ;;  %v3197_v50 = vrot.slane %v5120_v14, 5  ;;  %v3201_v0 = vrot.slane %v5122_v42, 5  ;;  %v5173_v39 = vld [vmem:[#allocation2 + $0x8c] sm:$0x1] }
 0x192   :  { %4143 = vmatprep.mubr.msk.bf16.mxu0 %vm994_vm14, %v4243_v12  ;;  %v5153_v12 = vld [vmem:[#allocation2 + $0x4c] sm:$0x1] }
 0x193   :  { %v3185_v49 = vrot.slane %v5153_v12, 5  ;;  %v5184_v62 = vsel %vm4538_vm13, %v3845_v3, %v3197_v50  ;;  %v2758_v50 = vrot.slane %v2756_v48, 4 }
 0x194   :  { %4114 = vmatmul.mubr.msk.bf16.vlgmr.msra.gmra.mxu1 %vm994_vm14, %v3785_v55  ;;  %v2719_v55 = vrot.slane %v2717_v17, 5  ;;  %v2733_v17 = vrot.slane %v2731_v58, 5  ;;  %v5188_v58 = vsel %vm4538_vm13, %v3846_v52, %v3201_v0  ;;  %v2761_v52 = vrot.slane %v2759_v54, 5  ;;  %v2691_v0 = vld [vmem:[#allocation2 + $0x38] sm:$0xf] }
 0x195   :  { %4148 = vmatpush3.bf16.msra.mxu1 %v4952_v35  ;;  %4117 = vmatprep.mubr.msk.bf16.mxu1 %vm994_vm14, %v3786_v21  ;;  %v5161_v35 = vsel %vm4538_vm13, %v3844_v27, %v3193_v20  ;;  %v3119_v21 = vld [vmem:[#allocation2 + $0x80] sm:$0xe]  ;;  %v3120_v20 = vld [vmem:[#allocation2 + $0x88] sm:$0xe]  ;;  %v3856_v22 = vcombine.low %v5184_v62, %v5188_v58  ;;  %v2751_v54 = vshll.u32 %v5006_v30, 16  ;;  %v5630_v30 = vcombine.low %v5072_v53, %v5094_v28 }
 0x196   :  { %v2685_v27 = vld [vmem:[#allocation2 + $0x20] sm:$0xf]  ;;  %v2720_v8 = vor.u32 %v2719_v55, %v2716_v24  ;;  %v3847_v43 = vrot.slane %v3119_v21, 9  ;;  %v3855_v7 = vcombine.low %v5157_v44, %v5161_v35  ;;  %v2723_v24 = vshll.u32 %v4979_v31, 16  ;;  %v5247_v28 = vld [vmem:[#allocation2 + $0x94] sm:$0x1] }
 0x197   :  { %v2742_v5 = vshrl.u32 %v2685_v27, 16  ;;  %v2745_v61 = vshll.u32 %v2685_v27, 16  ;;  %v3848_v55 = vrot.slane %v3120_v20, 9  ;;  %v2734_v3 = vor.u32 %v2733_v17, %v2730_v10  ;;  %v2693_v20 = vld [vmem:[#allocation2 + $0x40] sm:$0xf] }
 0x198   :  { %v3209_v21 = vrot.slane %v5173_v39, 5  ;;  %v5206_v31 = vsel %vm4538_vm13, %v3842_v23, %v3185_v49  ;;  %v2721_v29 = vrot.slane %v2720_v8, 4  ;;  %v5211_v34 = vsel %vm4538_vm13, %v3847_v43, %v3205_v36  ;;  %v2705_v44 = vld [vmem:[#allocation2 + $0x80] sm:$0xf] }
 0x199   :  { %4144 = vmatmul.mubr.msk.bf16.gmra.mxu0 %vm994_vm14, %v4245_v60  ;;  %v2744_v57 = vrot.slane %v2742_v5, 4  ;;  %v2773_v27 = vshll.u32 %v2689_v13, 16  ;;  %v2725_v59 = vrot.slane %v2723_v24, 5  ;;  %v2787_v10 = vshll.u32 %v2691_v0, 16  ;;  %v2695_v60 = vld [vmem:[#allocation2 + $0x48] sm:$0xf] }
 0x19a   :  { %4167 = vmatprep.mubr.msk.bf16.mxu0 %vm994_vm14, %v3851_v1  ;;  %v2747_v1 = vrot.slane %v2745_v61, 5  ;;  %v3854_v23 = vcombine.low %v5136_v6, %v5206_v31  ;;  %v2735_v17 = vrot.slane %v2734_v3, 4  ;;  %v5219_v4 = vsel %vm4538_vm13, %v3848_v55, %v3209_v21  ;;  %v2697_v24 = vld [vmem:[#allocation2 + $0x60] sm:$0xf] }
 0x19b   :  { %v2762_v43 = vor.u32 %v2761_v52, %v2758_v50  ;;  %v2726_v61 = vsel %vm4528_vm12, %v2721_v29, %v2725_v59  ;;  %v2739_v5 = vrot.slane %v2737_v15, 5  ;;  %v3857_v48 = vcombine.low %v5211_v34, %v5219_v4  ;;  %v2699_v59 = vld [vmem:[#allocation2 + $0x68] sm:$0xf] }
 0x19c   :  { %4118 = vmatmul.mubr.msk.bf16.gmra.mxu1 %vm994_vm14, %v3787_v46  ;;  %v2770_v46 = vshrl.u32 %v2689_v13, 16  ;;  %v2748_v49 = vor.u32 %v2747_v1, %v2744_v57  ;;  %v2765_v6 = vshll.u32 %v5008_v51, 16  ;;  %v2775_v36 = vrot.slane %v2773_v27, 5  ;;  %v5231_v13 = vld [vmem:[#allocation2 + $0x90] sm:$0xe] }
 0x19d   :  { %4121 = vmatprep.mubr.msk.bf16.mxu1 %vm994_vm14, %v3788_v41  ;;  %v2784_v41 = vshrl.u32 %v2691_v0, 16  ;;  %v5629_v55 = vcombine.low %v5068_v40, %v5051_v47  ;;  %v2789_v21 = vrot.slane %v2787_v10, 5  ;;  %v2798_v50 = vshrl.u32 %v2693_v20, 16 }
 0x19e   :  { %v2772_v8 = vrot.slane %v2770_v46, 4  ;;  %v2801_v52 = vshll.u32 %v2693_v20, 16  ;;  %v5631_v51 = vcombine.low %v5103_v11, %v5110_v2  ;;  %v2740_v47 = vsel %vm4528_vm12, %v2735_v17, %v2739_v5 }
 0x19f   :  { %v2786_v3 = vrot.slane %v2784_v41, 4  ;;  %v2763_v40 = vrot.slane %v2762_v43, 4  ;;  %v2812_v0 = vshrl.u32 %v2695_v60, 16  ;;  %v2815_v31 = vshll.u32 %v2695_v60, 16  ;;  %v3122_v41 = vld [vmem:[#allocation2 + $0x98] sm:$0xe] }
 0x1a0   :  { %v5632_v29 = vcombine.low %v5140_v26, %v5116_v37  ;;  %v3818_v15 = vcombine.low %v2726_v61, %v2740_v47  ;;  %v2753_v53 = vrot.slane %v2751_v54, 5  ;;  %v2826_v57 = vshrl.u32 %v2697_v24, 16  ;;  %v5254_v54 = vld [vmem:[#allocation2 + $0x9c] sm:$0x1] }
 0x1a1   :  { %4168 = vmatmul.mubr.msk.bf16.vlgmr.msra.gmra.mxu0 %vm994_vm14, %v5629_v55  ;;  %v2829_v1 = vshll.u32 %v2697_v24, 16  ;;  %v2749_v11 = vrot.slane %v2748_v49, 4  ;;  %v2767_v2 = vrot.slane %v2765_v6, 5  ;;  %v3849_v46 = vrot.slane %v5231_v13, 9 }
 0x1a2   :  { %4171 = vmatprep.mubr.msk.bf16.mxu0 %vm994_vm14, %v5630_v30  ;;  %v2776_v27 = vor.u32 %v2775_v36, %v2772_v8  ;;  %v2779_v10 = vshll.u32 %v5020_v16, 16  ;;  %v2790_v17 = vor.u32 %v2789_v21, %v2786_v3  ;;  %v2800_v43 = vrot.slane %v2798_v50, 4 }
 0x1a3   :  { %v2803_v37 = vrot.slane %v2801_v52, 5  ;;  %v2768_v26 = vsel %vm4528_vm12, %v2763_v40, %v2767_v2  ;;  %v2793_v20 = vshll.u32 %v5030_v38, 16  ;;  %v2814_v61 = vrot.slane %v2812_v0, 4  ;;  %v2703_v52 = vld [vmem:[#allocation2 + $0x78] sm:$0xf] }
 0x1a4   :  { %4122 = vmatmul.mubr.msk.bf16.gmra.mxu1 %vm994_vm14, %v5631_v51  ;;  %v2817_v5 = vrot.slane %v2815_v31, 5  ;;  %v2828_v60 = vrot.slane %v2826_v57, 4  ;;  %v2831_v49 = vrot.slane %v2829_v1, 5  ;;  %v2840_v6 = vshrl.u32 %v2699_v59, 16  ;;  %v2701_v31 = vld [vmem:[#allocation2 + $0x70] sm:$0xf] }
 0x1a5   :  { %4125 = vmatprep.mubr.msk.bf16.mxu1 %vm994_vm14, %v5632_v29  ;;  %v2843_v8 = vshll.u32 %v2699_v59, 16  ;;  %v3213_v36 = vrot.slane %v5247_v28, 5  ;;  %v3850_v24 = vrot.slane %v3122_v41, 9  ;;  %v2777_v16 = vrot.slane %v2776_v27, 4 }
 0x1a6   :  { %v2807_v55 = vshll.u32 %v5075_v56, 16  ;;  %v2754_v3 = vsel %vm4528_vm12, %v2749_v11, %v2753_v53  ;;  %v2791_v38 = vrot.slane %v2790_v17, 4  ;;  %v2804_v21 = vor.u32 %v2803_v37, %v2800_v43 }
 0x1a7   :  { %v2821_v50 = vshll.u32 %v5153_v12, 16  ;;  %v3819_v56 = vcombine.low %v2754_v3, %v2768_v26  ;;  %v2781_v30 = vrot.slane %v2779_v10, 5  ;;  %v2795_v51 = vrot.slane %v2793_v20, 5 }
 0x1a8   :  { %v2818_v47 = vor.u32 %v2817_v5, %v2814_v61  ;;  %v2832_v12 = vor.u32 %v2831_v49, %v2828_v60  ;;  %v2842_v40 = vrot.slane %v2840_v6, 4  ;;  %v2845_v0 = vrot.slane %v2843_v8, 5  ;;  %v2709_v60 = vld [vmem:[#allocation2 + $0x90] sm:$0xf] }
 0x1a9   :  { %4172 = vmatmul.mubr.msk.bf16.gmra.mxu0 %vm994_vm14, %v3854_v23  ;;  %v3217_v23 = vrot.slane %v5254_v54, 5  ;;  %v2782_v35 = vsel %vm4528_vm12, %v2777_v16, %v2781_v30  ;;  %v2868_v33 = vshrl.u32 %v2703_v52, 16  ;;  %v2871_v32 = vshll.u32 %v2703_v52, 16 }
 0x1aa   :  { %4175 = vmatprep.mubr.msk.bf16.mxu0 %vm994_vm14, %v3855_v7  ;;  %v2809_v7 = vrot.slane %v2807_v55, 5  ;;  %v2805_v29 = vrot.slane %v2804_v21, 4  ;;  %v2823_v53 = vrot.slane %v2821_v50, 5  ;;  %v2835_v57 = vshll.u32 %v5088_v9, 16 }
 0x1ab   :  { %v2849_v1 = vshll.u32 %v5106_v45, 16  ;;  %v2854_v11 = vshrl.u32 %v2701_v31, 16  ;;  %v2882_v2 = vshrl.u32 %v2705_v44, 16  ;;  %v2885_v27 = vshll.u32 %v2705_v44, 16 }
 0x1ac   :  { %4126 = vmatmul.mubr.msk.bf16.gmra.mxu1 %vm994_vm14, %v3791_v63  ;;  %v2796_v63 = vsel %vm4528_vm12, %v2791_v38, %v2795_v51  ;;  %v2819_v59 = vrot.slane %v2818_v47, 4  ;;  %v2833_v41 = vrot.slane %v2832_v12, 4  ;;  %v2846_v10 = vor.u32 %v2845_v0, %v2842_v40 }
 0x1ad   :  { %4149 = vmatprep.mubr.msk.bf16.mxu1 %vm994_vm14, %v3818_v15  ;;  %v2707_v15 = vld [vmem:[#allocation2 + $0x88] sm:$0xf]  ;;  %v2857_v17 = vshll.u32 %v2701_v31, 16  ;;  %v2870_v43 = vrot.slane %v2868_v33, 4  ;;  %v2873_v37 = vrot.slane %v2871_v32, 5  ;;  %v3214_v9 = vsel %vm4538_vm13, %v3849_v46, %v3213_v36 }
 0x1ae   :  { %v2896_v26 = vshrl.u32 %v2707_v15, 16  ;;  %v2899_v20 = vshll.u32 %v2707_v15, 16  ;;  %v3218_v45 = vsel %vm4538_vm13, %v3850_v24, %v3217_v23  ;;  %v3820_v61 = vcombine.low %v2782_v35, %v2796_v63  ;;  %v2711_v46 = vld [vmem:[#allocation2 + $0x98] sm:$0xf] }
 0x1af   :  { %v2810_v5 = vsel %vm4528_vm12, %v2805_v29, %v2809_v7  ;;  %v2837_v62 = vrot.slane %v2835_v57, 5  ;;  %v2851_v58 = vrot.slane %v2849_v1, 5  ;;  %v2887_v13 = vrot.slane %v2885_v27, 5 }
 0x1b0   :  { %v2824_v25 = vsel %vm4528_vm12, %v2819_v59, %v2823_v53  ;;  %v2847_v49 = vrot.slane %v2846_v10, 4  ;;  %v2856_v6 = vrot.slane %v2854_v11, 4  ;;  %v2859_v8 = vrot.slane %v2857_v17, 5 }
 0x1b1   :  { %4176 = vmatmul.mubr.msk.bf16.gmra.mxu0 %vm994_vm14, %v3856_v22  ;;  %v2884_v22 = vrot.slane %v2882_v2, 4  ;;  %v2838_v34 = vsel %vm4528_vm12, %v2833_v41, %v2837_v62  ;;  %v2874_v4 = vor.u32 %v2873_v37, %v2870_v43  ;;  %v2901_v36 = vrot.slane %v2899_v20, 5  ;;  %v4247_v20 = vld [vmem:[%s5616_s5] sm:$0xff]  }
 0x1b2   :  { %4179 = vmatprep.mubr.msk.bf16.mxu0 %vm994_vm14, %v3857_v48  ;;  %v2898_v48 = vrot.slane %v2896_v26, 4  ;;  %v2910_v24 = vshrl.u32 %v2709_v60, 16  ;;  %v2913_v16 = vshll.u32 %v2709_v60, 16  ;;  %v2924_v55 = vshrl.u32 %v2711_v46, 16  ;;  %4183 = vmatprep.subr.bf16.mxu1 %v4247_v20 }
 0x1b3   :  { %v2927_v3 = vshll.u32 %v2711_v46, 16  ;;  %v3858_v38 = vcombine.low %v3214_v9, %v3218_v45  ;;  %v2863_v21 = vshll.u32 %v5120_v14, 16  ;;  %v2888_v50 = vor.u32 %v2887_v13, %v2884_v22 }
 0x1b4   :  { %4150 = vmatmul.mubr.msk.bf16.vlgmr.msra.gmra.mxu1 %vm994_vm14, %v3819_v56  ;;  %v3821_v52 = vcombine.low %v2810_v5, %v2824_v25  ;;  %v2852_v56 = vsel %vm4528_vm12, %v2847_v49, %v2851_v58  ;;  %v2860_v23 = vor.u32 %v2859_v8, %v2856_v6  ;;  %v2877_v30 = vshll.u32 %v5122_v42, 16 }
 0x1b5   :  { %4153 = vmatprep.mubr.msk.bf16.mxu1 %vm994_vm14, %v3820_v61  ;;  %v3822_v51 = vcombine.low %v2838_v34, %v2852_v56  ;;  %v2875_v47 = vrot.slane %v2874_v4, 4  ;;  %v2891_v12 = vshll.u32 %v5142_v18, 16  ;;  %v2902_v40 = vor.u32 %v2901_v36, %v2898_v48  ;;  %4184 = vmatpush3.bf16.msra.mxu1 %v4247_v20 }
 0x1b6   :  { %v2912_v0 = vrot.slane %v2910_v24, 4  ;;  %v2915_v31 = vrot.slane %v2913_v16, 5  ;;  %v2926_v44 = vrot.slane %v2924_v55, 4  ;;  %v2929_v35 = vrot.slane %v2927_v3, 5 }
 0x1b7   :  { %v2889_v14 = vrot.slane %v2888_v50, 4  ;;  %v2905_v7 = vshll.u32 %v5173_v39, 16  ;;  %v2861_v33 = vrot.slane %v2860_v23, 4  ;;  %v2879_v42 = vrot.slane %v2877_v30, 5 }
 0x1b8   :  { %v2865_v32 = vrot.slane %v2863_v21, 5  ;;  %v2893_v63 = vrot.slane %v2891_v12, 5  ;;  %v2903_v29 = vrot.slane %v2902_v40, 4  ;;  %v2916_v53 = vor.u32 %v2915_v31, %v2912_v0 }
 0x1b9   :  { %4180 = vmatmul.mubr.msk.bf16.gmra.mxu0 %vm994_vm14, %v3858_v38  ;;  %v2880_v18 = vsel %vm4528_vm12, %v2875_v47, %v2879_v42  ;;  %v2930_v57 = vor.u32 %v2929_v35, %v2926_v44  ;;  %v2933_v15 = vshll.u32 %v5254_v54, 16  ;;  %v2907_v11 = vrot.slane %v2905_v7, 5 }
 0x1ba   :  { %v2894_v1 = vsel %vm4528_vm12, %v2889_v14, %v2893_v63  ;;  %v2866_v39 = vsel %vm4528_vm12, %v2861_v33, %v2865_v32  ;;  %v2919_v2 = vshll.u32 %v5247_v28, 16  ;;  %v2917_v10 = vrot.slane %v2916_v53, 4 }
 0x1bb   :  { %v3823_v27 = vcombine.low %v2866_v39, %v2880_v18  ;;  %v2908_v59 = vsel %vm4528_vm12, %v2903_v29, %v2907_v11  ;;  %v2931_v17 = vrot.slane %v2930_v57, 4  ;;  %v2935_v43 = vrot.slane %v2933_v15, 5 }
 0x1bc   :  { %4154 = vmatmul.mubr.msk.bf16.gmra.mxu1 %vm994_vm14, %v3821_v52  ;;  %v3824_v41 = vcombine.low %v2894_v1, %v2908_v59  ;;  %v2921_v54 = vrot.slane %v2919_v2, 5 }
 0x1bd   :  { %4157 = vmatprep.mubr.msk.bf16.mxu1 %vm994_vm14, %v3822_v51  ;;  %v2936_v26 = vsel %vm4528_vm12, %v2931_v17, %v2935_v43 }
 0x1be   :  { %v2922_v37 = vsel %vm4528_vm12, %v2917_v10, %v2921_v54 }
 0x1bf   :  { %v3825_v28 = vcombine.low %v2922_v37, %v2936_v26 }
 0x1c4   :  { %4158 = vmatmul.mubr.msk.bf16.gmra.mxu1 %vm994_vm14, %v3823_v27 }
 0x1c5   :  { %4161 = vmatprep.mubr.msk.bf16.mxu1 %vm994_vm14, %v3824_v41 }
 0x1cc   :  { %4162 = vmatmul.mubr.msk.bf16.gmra.mxu1 %vm994_vm14, %v3825_v28 }
 0x1ed   :  { %v4025_v9 = vpop.f32.mrf.mxu0 }
 0x1ef   :  { %v1053_v45 = vpop.f32.mrf.mxu0 }
 0x1f1   :  { %v4026_v61 = vpop.f32.mrf.mxu0 }
 0x1f3   :  { %v1056_v5 = vpop.f32.mrf.mxu0 }
 0x1f5   :  { %v4061_v60 = vpop.f32.mrf.mxu0 }
 0x1f7   :  { %v1489_v62 = vpop.f32.mrf.mxu0  ;;  %v4029_v58 = vpop.f32.mrf.mxu1 }
 0x1f9   :  { %v4062_v22 = vpop.f32.mrf.mxu0  ;;  %v1069_v13 = vpop.f32.mrf.mxu1 }
 0x1fb   :  { %v1492_v19 = vpop.f32.mrf.mxu0  ;;  %v4030_v46 = vpop.f32.mrf.mxu1 }
 0x1fd   :  { %v1072_v25 = vpop.f32.mrf.mxu1 }
 0x1fe   :  { %v4065_v49 = vpop.f32.mrf.mxu0 }
 0x200   :  { %v1505_v6 = vpop.f32.mrf.mxu0 }
 0x202   :  { %v4033_v8 = vpop.f32.mrf.mxu1  ;;  %v4066_v34 = vpop.f32.mrf.mxu0 }
 0x204   :  { %v1085_v4 = vpop.f32.mrf.mxu1  ;;  %v1508_v36 = vpop.f32.mrf.mxu0 }
 0x206   :  { %v4034_v48 = vpop.f32.mrf.mxu1 }
 0x208   :  { %v1088_v24 = vpop.f32.mrf.mxu1 }
 0x20a   :  { %v4069_v16 = vpop.f32.mrf.mxu0 }
 0x20c   :  { %v4037_v55 = vpop.f32.mrf.mxu1  ;;  %v1521_v3 = vpop.f32.mrf.mxu0 }
 0x20e   :  { %v1101_v38 = vpop.f32.mrf.mxu1  ;;  %v4070_v21 = vpop.f32.mrf.mxu0 }
 0x210   :  { %v4038_v50 = vpop.f32.mrf.mxu1  ;;  %v1524_v52 = vpop.f32.mrf.mxu0 }
 0x212   :  { %v1104_v56 = vpop.f32.mrf.mxu1  ;;  %v4073_v23 = vpop.f32.mrf.mxu0 }
 0x214   :  { %v4043_v30 = vpop.f32.mrf.mxu1  ;;  %v1537_v51 = vpop.f32.mrf.mxu0 }
 0x215   :  { %v1229_v47 = vadd.f32 %v4043_v30, %v4025_v9 }
 0x216   :  { %v1220_v12 = vpop.f32.mrf.mxu1  ;;  %v4074_v40 = vpop.f32.mrf.mxu0 }
 0x217   :  { %v1221_v0 = vadd.f32 %v1220_v12, %v1053_v45  ;;  %v5329_v31 = vadd.f32 %v4061_v60, %v1229_v47 }
 0x218   :  { %v4044_v44 = vpop.f32.mrf.mxu1  ;;  %v1540_v35 = vpop.f32.mrf.mxu0 }
 0x219   :  { %v1232_v14 = vadd.f32 %v4044_v44, %v4026_v61  ;;  %v5331_v7 = vadd.f32 %v1489_v62, %v1221_v0 }
 0x21a   :  { %v1223_v33 = vpop.f32.mrf.mxu1 }
 0x21b   :  { %v1224_v42 = vadd.f32 %v1223_v33, %v1056_v5  ;;  %v5333_v32 = vadd.f32 %v4062_v22, %v1232_v14 }
 0x21c   :  { %v4047_v63 = vpop.f32.mrf.mxu1  ;;  %v5335_v29 = vpop.f32.mrf.mxu0 }
 0x21d   :  { %v1245_v18 = vadd.f32 %v4047_v63, %v4029_v58  ;;  %v5337_v53 = vadd.f32 %v1492_v19, %v1224_v42 }
 0x21e   :  { %v1236_v57 = vpop.f32.mrf.mxu1  ;;  %v5339_v15 = vpop.f32.mrf.mxu0 }
 0x21f   :  { %v1237_v1 = vadd.f32 %v1236_v57, %v1069_v13  ;;  %v5341_v11 = vadd.f32 %v4065_v49, %v1245_v18 }
 0x220   :  { %v4048_v39 = vpop.f32.mrf.mxu1  ;;  %v5343_v2 = vpop.f32.mrf.mxu0 }
 0x221   :  { %v1248_v27 = vadd.f32 %v4048_v39, %v4030_v46  ;;  %v5345_v59 = vadd.f32 %v1505_v6, %v1237_v1 }
 0x222   :  { %v1239_v41 = vpop.f32.mrf.mxu1  ;;  %v5347_v17 = vpop.f32.mrf.mxu0 }
 0x223   :  { %v1240_v10 = vadd.f32 %v1239_v41, %v1072_v25  ;;  %v5349_v43 = vadd.f32 %v4066_v34, %v1248_v27 }
 0x224   :  { %v4051_v54 = vpop.f32.mrf.mxu1 }
 0x225   :  { %v1261_v37 = vadd.f32 %v4051_v54, %v4033_v8  ;;  %v5351_v26 = vadd.f32 %v1508_v36, %v1240_v10 }
 0x226   :  { %v1252_v28 = vpop.f32.mrf.mxu1 }
 0x227   :  { %v5353_v20 = vpop.f32.mrf.mxu0  ;;  %v1253_v9 = vadd.f32 %v1252_v28, %v1085_v4  ;;  %v1562_v45 = vadd.f32 %v4069_v16, %v1261_v37 }
 0x228   :  { %v4052_v61 = vpop.f32.mrf.mxu1 }
 0x229   :  { %v5355_v5 = vpop.f32.mrf.mxu0  ;;  %v1264_v60 = vadd.f32 %v4052_v61, %v4034_v48  ;;  %v5357_v62 = vadd.f32 %v1521_v3, %v1253_v9 }
 0x22a   :  { %v1255_v58 = vpop.f32.mrf.mxu1 }
 0x22b   :  { %v5359_v22 = vpop.f32.mrf.mxu0  ;;  %v1256_v13 = vadd.f32 %v1255_v58, %v1088_v24  ;;  %v5361_v19 = vadd.f32 %v4070_v21, %v1264_v60 }
 0x22c   :  { %v4055_v46 = vpop.f32.mrf.mxu1 }
 0x22d   :  { %v5363_v25 = vpop.f32.mrf.mxu0  ;;  %v1277_v49 = vadd.f32 %v4055_v46, %v4037_v55  ;;  %v5365_v6 = vadd.f32 %v1524_v52, %v1256_v13 }
 0x22e   :  { %v1268_v8 = vpop.f32.mrf.mxu1 }
 0x22f   :  { %v1269_v34 = vadd.f32 %v1268_v8, %v1101_v38  ;;  %v1566_v4 = vadd.f32 %v4073_v23, %v1277_v49 }
 0x230   :  { %v4056_v36 = vpop.f32.mrf.mxu1 }
 0x231   :  { %v4105_v16 = vpop.f32.mrf.mxu0  ;;  %v1280_v48 = vadd.f32 %v4056_v36, %v4038_v50  ;;  %v5367_v3 = vadd.f32 %v1537_v51, %v1269_v34 }
 0x232   :  { %v1271_v30 = vpop.f32.mrf.mxu1 }
 0x233   :  { %5633 = vst [vmem:[#allocation12_spill] sm:$0xff] %v5367_v3  ;;  %v5369_v47 = vpop.f32.mrf.mxu0  ;;  %v1272_v24 = vadd.f32 %v1271_v30, %v1104_v56  ;;  %v5371_v21 = vadd.f32 %v4074_v40, %v1280_v48 }
 0x234   :  { %v4079_v12 = vpop.f32.mrf.mxu1 }
 0x235   :  { %5634 = vst [vmem:[#allocation13_spill] sm:$0xff] %v5371_v21  ;;  %v5373_v0 = vpop.f32.mrf.mxu0  ;;  %v5375_v55 = vadd.f32 %v1540_v35, %v1272_v24 }
 0x236   :  { %v1691_v52 = vpop.f32.mrf.mxu1 }
 0x237   :  { %5635 = vst [vmem:[#allocation14_spill] sm:$0xff] %v5375_v55  ;;  %v5377_v44 = vpop.f32.mrf.mxu0 }
 0x238   :  { %5636 = vst [vmem:[#allocation15_spill] sm:$0xff] %v5377_v44  ;;  %v4080_v38 = vpop.f32.mrf.mxu1 }
 0x239   :  { %v4109_v14 = vpop.f32.mrf.mxu0  ;;  %v1757_v44 = vadd.f32 %v4080_v38, %v5333_v32 }
 0x23a   :  { %v1694_v23 = vpop.f32.mrf.mxu1 }
 0x23b   :  { %v5381_v51 = vpop.f32.mrf.mxu0  ;;  %v2183_v32 = vadd.f32 %v5343_v2, %v1757_v44 }
 0x23c   :  { %v5379_v50 = vpop.f32.mrf.mxu1  ;;  %5637 = vst [vmem:[#allocation16_spill] sm:$0xff] %v5381_v51 }
 0x23d   :  { %v5385_v56 = vpop.f32.mrf.mxu0 }
 0x23e   :  { %v5383_v33 = vpop.f32.mrf.mxu1  ;;  %5638 = vst [vmem:[#allocation17_spill] sm:$0xff] %v5385_v56 }
 0x23f   :  { %v5389_v42 = vpop.f32.mrf.mxu0 }
 0x240   :  { %v5387_v40 = vpop.f32.mrf.mxu1  ;;  %5639 = vst [vmem:[#allocation18_spill] sm:$0xff] %v5389_v42 }
 0x241   :  { %v5393_v63 = vpop.f32.mrf.mxu0  ;;  %v1761_v2 = vadd.f32 %v5387_v40, %v5349_v43 }
 0x242   :  { %v5391_v35 = vpop.f32.mrf.mxu1 }
 0x243   :  { %v5395_v57 = vpop.f32.mrf.mxu0 }
 0x244   :  { %v4087_v18 = vpop.f32.mrf.mxu1 }
 0x245   :  { %v1764_v1 = vadd.f32 %v4087_v18, %v1562_v45  ;;  %v5399_v27 = vpop.f32.mrf.mxu0 }
 0x246   :  { %v5397_v39 = vpop.f32.mrf.mxu1 }
 0x247   :  { %v5401_v41 = vadd.f32 %v4105_v16, %v1764_v1  ;;  %v5405_v54 = vpop.f32.mrf.mxu0 }
 0x248   :  { %v5403_v10 = vpop.f32.mrf.mxu1 }
 0x249   :  { %v5409_v28 = vpop.f32.mrf.mxu0 }
 0x24a   :  { %v5407_v37 = vpop.f32.mrf.mxu1 }
 0x24b   :  { %v5411_v61 = vpop.f32.mrf.mxu0 }
 0x24c   :  { %v4091_v9 = vpop.f32.mrf.mxu1 }
 0x24d   :  { %v1768_v60 = vadd.f32 %v4091_v9, %v1566_v4  ;;  %v5415_v45 = vpop.f32.mrf.mxu0 }
 0x24e   :  { %v5413_v58 = vpop.f32.mrf.mxu1 }
 0x24f   :  { %5640 = vst [vmem:[#allocation19_spill] sm:$0xff] %v5413_v58  ;;  %v5417_v13 = vadd.f32 %v4109_v14, %v1768_v60  ;;  %v5421_v49 = vpop.f32.mrf.mxu0 }
 0x250   :  { %v5419_v46 = vpop.f32.mrf.mxu1  ;;  %5643 = vst [vmem:[#allocation22_spill] sm:$0xff] %v5421_v49 }
 0x251   :  { %5641 = vst [vmem:[#allocation20_spill] sm:$0xff] %v5417_v13  ;;  %5642 = vst [vmem:[#allocation21_spill] sm:$0xff] %v5419_v46  ;;  %v5425_v34 = vpop.f32.mrf.mxu0 }
 0x252   :  { %v5423_v8 = vpop.f32.mrf.mxu1  ;;  %5645 = vst [vmem:[#allocation24_spill] sm:$0xff] %v5425_v34 }
 0x253   :  { %5644 = vst [vmem:[#allocation23_spill] sm:$0xff] %v5423_v8  ;;  %v5427_v16 = vpop.f32.mrf.mxu0 }
 0x254   :  { %v4115_v36 = vpop.f32.mrf.mxu1  ;;  %5646 = vst [vmem:[#allocation25_spill] sm:$0xff] %v5427_v16 }
 0x255   :  { %v5429_v30 = vpop.f32.mrf.mxu0 }
 0x256   :  { %v2399_v48 = vpop.f32.mrf.mxu1  ;;  %5647 = vst [vmem:[#allocation26_spill] sm:$0xff] %v5429_v30 }
 0x257   :  { %v5431_v24 = vpop.f32.mrf.mxu0 }
 0x258   :  { %v4116_v4 = vpop.f32.mrf.mxu1  ;;  %5648 = vst [vmem:[#allocation27_spill] sm:$0xff] %v5431_v24 }
 0x259   :  { %v5433_v14 = vpop.f32.mrf.mxu0 }
 0x25a   :  { %v2402_v18 = vpop.f32.mrf.mxu1  ;;  %5649 = vst [vmem:[#allocation28_spill] sm:$0xff] %v5433_v14  ;;  %v1756_v14 = vadd.f32 %v4079_v12, %v5329_v31 }
 0x25b   :  { %v5435_v9 = vpop.f32.mrf.mxu0 }
 0x25c   :  { %v4119_v1 = vpop.f32.mrf.mxu1  ;;  %5650 = vst [vmem:[#allocation29_spill] sm:$0xff] %v5435_v9  ;;  %v2182_v58 = vadd.f32 %v5335_v29, %v1756_v14  ;;  %v1758_v29 = vadd.f32 %v5383_v33, %v5345_v59  ;;  %v2465_v14 = vadd.f32 %v4116_v4, %v2183_v32  ;;  %v1759_v59 = vadd.f32 %v5391_v35, %v5351_v26 }
 0x25d   :  { %v5437_v42 = vpop.f32.mrf.mxu0  ;;  %v1765_v35 = vadd.f32 %v5403_v10, %v5361_v19  ;;  %v1763_v10 = vadd.f32 %v5407_v37, %v5365_v6 }
 0x25e   :  { %v2415_v60 = vpop.f32.mrf.mxu1  ;;  %5651 = vst [vmem:[#allocation30_spill] sm:$0xff] %v5437_v42  ;;  %v1754_v42 = vadd.f32 %v1691_v52, %v5331_v7  ;;  %v2464_v31 = vadd.f32 %v4115_v36, %v2182_v58  ;;  %v1760_v52 = vadd.f32 %v5379_v50, %v5341_v11  ;;  %v2184_v44 = vadd.f32 %v5355_v5, %v1758_v29 }
 0x25f   :  { %v5439_v13 = vpop.f32.mrf.mxu0  ;;  %v1762_v5 = vadd.f32 %v5397_v39, %v5357_v62 }
 0x260   :  { %v4120_v56 = vpop.f32.mrf.mxu1  ;;  %5652 = vst [vmem:[#allocation31_spill] sm:$0xff] %v5439_v13  ;;  %v2180_v12 = vadd.f32 %v5339_v15, %v1754_v42  ;;  %v2667_v15 = vadd.f32 %v5393_v63, %v2464_v31  ;;  %v2186_v36 = vadd.f32 %v5353_v20, %v1760_v52  ;;  %v2466_v4 = vadd.f32 %v2415_v60, %v2184_v44  ;;  %v5491_v20 = vld [vmem:[%s5615_s4] ss:$0 sm:$0xff] }
 0x261   :  { %v4169_v16 = vpop.f32.mrf.mxu0 }
 0x262   :  { %v2418_v51 = vpop.f32.mrf.mxu1  ;;  %v2468_v33 = vadd.f32 %v4119_v1, %v2186_v36  ;;  %v2669_v62 = vadd.f32 %v5411_v61, %v2466_v4  ;;  %v5662_v4 = vld [vmem:[#allocation13_spill] sm:$0xff] }
 0x263   :  { %v3310_v30 = vpop.f32.mrf.mxu0 }
 0x264   :  { %v5441_v8 = vpop.f32.mrf.mxu1 }
 0x265   :  { %v4170_v24 = vpop.f32.mrf.mxu0 }
 0x266   :  { %v5443_v55 = vpop.f32.mrf.mxu1 }
 0x267   :  { %v3313_v21 = vpop.f32.mrf.mxu0 }
 0x268   :  { %v5445_v46 = vpop.f32.mrf.mxu1 }
 0x269   :  { %5653 = vst [vmem:[#allocation32_spill] sm:$0xff] %v5445_v46  ;;  %v5451_v34 = vpop.f32.mrf.mxu0  ;;  %v1755_v46 = vadd.f32 %v1694_v23, %v5337_v53 }
 0x26a   :  { %v5448_v9 = vpop.f32.mrf.mxu1 }
 0x26b   :  { %5654 = vst [vmem:[#allocation33_spill] sm:$0xff] %v5448_v9  ;;  %v5457_v3 = vpop.f32.mrf.mxu0  ;;  %v2181_v53 = vadd.f32 %v5347_v17, %v1755_v46 }
 0x26c   :  { %v5453_v13 = vpop.f32.mrf.mxu1 }
 0x26d   :  { %5655 = vst [vmem:[#allocation34_spill] sm:$0xff] %v5453_v13  ;;  %v5463_v9 = vpop.f32.mrf.mxu0  ;;  %v2462_v13 = vadd.f32 %v2399_v48, %v2180_v12  ;;  %v2463_v58 = vadd.f32 %v2402_v18, %v2181_v53  ;;  %v2668_v48 = vadd.f32 %v5399_v27, %v2465_v14  ;;  %v2187_v27 = vadd.f32 %v5359_v22, %v1761_v2 }
 0x26e   :  { %v5459_v49 = vpop.f32.mrf.mxu1 }
 0x26f   :  { %v5476_v23 = vpop.f32.mrf.mxu0  ;;  %v2665_v50 = vadd.f32 %v5395_v57, %v2462_v13  ;;  %v2666_v26 = vadd.f32 %v5405_v54, %v2463_v58  ;;  %v2185_v13 = vadd.f32 %v5363_v25, %v1759_v59  ;;  %v2469_v12 = vadd.f32 %v4120_v56, %v2187_v27  ;;  %v5656_v58 = vld [vmem:[#allocation22_spill] sm:$0xff] }
 0x270   :  { %v5465_v7 = vpop.f32.mrf.mxu1  ;;  %v2188_v56 = vadd.f32 %v5369_v47, %v1762_v5  ;;  %v5659_v59 = vld [vmem:[#allocation32_spill] sm:$0xff] }
 0x271   :  { %v5486_v18 = vpop.f32.mrf.mxu0  ;;  %v2467_v52 = vadd.f32 %v2418_v51, %v2185_v13  ;;  %v2191_v51 = vadd.f32 %v5373_v0, %v1765_v35  ;;  %v2672_v6 = vadd.f32 %v5415_v45, %v2469_v12  ;;  %v5661_v45 = vld [vmem:[#allocation24_spill] sm:$0xff] }
 0x272   :  { %v5472_v38 = vpop.f32.mrf.mxu1  ;;  %v5667_v12 = vld [vmem:[#allocation33_spill] sm:$0xff] }
 0x273   :  { %v5502_v54 = vpop.f32.mrf.mxu0  ;;  %v2473_v44 = vadd.f32 %v5659_v59, %v2191_v51 }
 0x274   :  { %v4151_v42 = vpop.f32.mrf.mxu1 }
 0x275   :  { %v3093_v11 = vadd.f32 %v4151_v42, %v2667_v15  ;;  %v2470_v15 = vadd.f32 %v5443_v55, %v2188_v56 }
 0x276   :  { %v3028_v17 = vpop.f32.mrf.mxu1 }
 0x277   :  { %v3375_v63 = vadd.f32 %v4169_v16, %v3093_v11  ;;  %v3091_v46 = vadd.f32 %v3028_v17, %v2665_v50  ;;  %v5657_v11 = vld [vmem:[#allocation12_spill] sm:$0xff]  ;;  %v5658_v50 = vld [vmem:[#allocation19_spill] sm:$0xff] }
 0x278   :  { %v4152_v43 = vpop.f32.mrf.mxu1  ;;  %v1766_v2 = vadd.f32 %v5658_v50, %v5657_v11 }
 0x279   :  { %v3373_v40 = vadd.f32 %v3310_v30, %v3091_v46  ;;  %v3094_v57 = vadd.f32 %v4152_v43, %v2668_v48  ;;  %v3398_v1 = vadd.f32 %v5491_v20, %v3375_v63  ;;  %v2671_v30 = vadd.f32 %v5409_v28, %v2468_v33  ;;  %v5660_v33 = vld [vmem:[#allocation15_spill] sm:$0xff]  ;;  %v5663_v43 = vld [vmem:[#allocation21_spill] sm:$0xff] }
 0x27a   :  { %v3031_v16 = vpop.f32.mrf.mxu1  ;;  %v2189_v63 = vadd.f32 %v5660_v33, %v1763_v10  ;;  %v5671_v10 = vld [vmem:[#allocation34_spill] sm:$0xff] }
 0x27b   :  { %v3376_v60 = vadd.f32 %v4170_v24, %v3094_v57  ;;  %v3092_v31 = vadd.f32 %v3031_v16, %v2666_v26  ;;  %v3396_v19 = vadd.f32 %v5491_v20, %v3373_v40  ;;  %v2472_v24 = vadd.f32 %v5441_v8, %v5401_v41  ;;  %v5664_v57 = vld [vmem:[#allocation14_spill] sm:$0xff]  ;;  %v5665_v26 = vld [vmem:[#allocation23_spill] sm:$0xff] }
 0x27c   :  { %v4155_v32 = vpop.f32.mrf.mxu1  ;;  %v3414_v29 = vmax.f32 %v3398_v1, 0.0  ;;  %v2670_v41 = vadd.f32 %v5656_v58, %v2467_v52  ;;  %v1769_v40 = vadd.f32 %v5663_v43, %v5662_v4  ;;  %v1767_v5 = vadd.f32 %v5665_v26, %v5664_v57 }
 0x27d   :  { %v3399_v22 = vadd.f32 %v5491_v20, %v3376_v60  ;;  %v3374_v39 = vadd.f32 %v3313_v21, %v3092_v31  ;;  %v3097_v25 = vadd.f32 %v4155_v32, %v2671_v30  ;;  %v4178_v21 = vpop.f32.mrf.mxu0  ;;  %v3412_v8 = vmax.f32 %v3396_v19, 0.0  ;;  %v5666_v31 = vld [vmem:[#allocation25_spill] sm:$0xff]  ;;  %v5668_v32 = vld [vmem:[#allocation16_spill] sm:$0xff] }
 0x27e   :  { %v3044_v28 = vpop.f32.mrf.mxu1  ;;  %v2675_v48 = vadd.f32 %v5661_v45, %v2472_v24  ;;  %v2673_v30 = vadd.f32 %v5666_v31, %v2470_v15  ;;  %v2471_v52 = vadd.f32 %v5667_v12, %v2189_v63  ;;  %v5678_v31 = vld [vmem:[#allocation31_spill] sm:$0xff] }
 0x27f   :  { %v3415_v14 = vmax.f32 %v3399_v22, 0.0  ;;  %v3397_v61 = vadd.f32 %v5491_v20, %v3374_v39  ;;  %v3095_v53 = vadd.f32 %v3044_v28, %v2669_v62  ;;  %v3379_v42 = vadd.f32 %v5451_v34, %v3097_v25  ;;  %v5670_v25 = vld [vmem:[#allocation20_spill] sm:$0xff]  ;;  %v5672_v28 = vld [vmem:[#allocation17_spill] sm:$0xff] }
 0x280   :  { %v4156_v37 = vpop.f32.mrf.mxu1  ;;  %v2192_v62 = vadd.f32 %v5668_v32, %v1766_v2  ;;  %v2476_v24 = vadd.f32 %v5671_v10, %v5670_v25 }
 0x281   :  { %v3429_v47 = vpack.c.bf16 %v3415_v14, %v3414_v29  ;;  %v3413_v36 = vmax.f32 %v3397_v61, 0.0  ;;  %v3377_v0 = vadd.f32 %v5457_v3, %v3095_v53  ;;  %v3098_v17 = vadd.f32 %v4156_v37, %v2672_v6  ;;  %v3345_v3 = vpop.f32.mrf.mxu0  ;;  %v5673_v14 = vld [vmem:[#allocation18_spill] sm:$0xff] }
 0x282   :  { %v3047_v55 = vpop.f32.mrf.mxu1  ;;  %v3402_v35 = vadd.f32 %v5491_v20, %v3379_v42  ;;  %v2195_v29 = vadd.f32 %v5672_v28, %v1769_v40  ;;  %v2193_v61 = vadd.f32 %v5673_v14, %v1767_v5  ;;  %v2474_v37 = vadd.f32 %v5459_v49, %v2192_v62 }
 0x283   :  { %v3428_v34 = vpack.c.bf16 %v3413_v36, %v3412_v8  ;;  %v3096_v46 = vadd.f32 %v3047_v55, %v2670_v41  ;;  %v3380_v27 = vadd.f32 %v5463_v9, %v3098_v17  ;;  %v3400_v16 = vadd.f32 %v5491_v20, %v3377_v0  ;;  %v5669_v9 = vld [vmem:[#allocation26_spill] sm:$0xff]  ;;  %v4181_v53 = vpop.f32.mrf.mxu0  ;;  %v5675_v17 = vld [vmem:[#allocation28_spill] sm:$0xff] }
 0x284   :  { %v4159_v13 = vpop.f32.mrf.mxu1  ;;  %v2676_v39 = vadd.f32 %v5669_v9, %v2473_v44  ;;  %v3418_v15 = vmax.f32 %v3402_v35, 0.0  ;;  %v2679_v55 = vadd.f32 %v5675_v17, %v2476_v24  ;;  %v4253_v17 = vld [vmem:[#allocation3 + $0x8] sm:$0xff] }
 0x285   :  { %v3378_v1 = vadd.f32 %v5476_v23, %v3096_v46  ;;  %v3101_v60 = vadd.f32 %v4159_v13, %v2675_v48  ;;  %4185 = vmatprep.mubr.msk.bf16.mxu1 %vm994_vm14, %v3428_v34  ;;  %v3403_v19 = vadd.f32 %v5491_v20, %v3380_v27  ;;  %v3416_v58 = vmax.f32 %v3400_v16, 0.0  ;;  %v3358_v33 = vpop.f32.mrf.mxu0 }
 0x286   :  { %v3060_v22 = vpop.f32.mrf.mxu1  ;;  %4186 = vmatmul.mubr.msk.bf16.vlgmr.msra.gmra.mxu1 %vm994_vm14, %v3429_v47  ;;  %v2477_v47 = vadd.f32 %v5465_v7, %v2195_v29  ;;  %v2475_v34 = vadd.f32 %v5472_v38, %v2193_v61  ;;  %v5571_v61 = vld [vmem:[%s5617_s6] ss:$0 sm:$0xff]  ;;  %s4339_s6 = smov [#allocation8]  }
 0x287   :  { %v3401_v23 = vadd.f32 %v5491_v20, %v3378_v1  ;;  %v3383_v56 = vadd.f32 %v5486_v18, %v3101_v60  ;;  %v3099_v51 = vadd.f32 %v3060_v22, %v2673_v30  ;;  %v3419_v42 = vmax.f32 %v3403_v19, 0.0  ;;  %v5674_v18 = vld [vmem:[#allocation27_spill] sm:$0xff]  ;;  %v4182_v38 = vpop.f32.mrf.mxu0  ;;  %s3625_s25 = sshll.u32 %s4339_s6, 4  ;;  %s3626_s25 = int_to_ptr.vmem [resolvable:$true] %s3625_s25 }
 0x288   :  { %v4160_v6 = vpop.f32.mrf.mxu1  ;;  %v2674_v11 = vadd.f32 %v5674_v18, %v2471_v52  ;;  %v2678_v30 = vadd.f32 %v5678_v31, %v2475_v34  ;;  %v4254_v34 = vld [vmem:[#allocation3 + $0x30] sm:$0xff]  ;;  %s4306_s26 = scalar_lea.vmem %s3626_s25, 2048  ;;  %p4311_p11 = scmp.lt.s32.totalorder %s3626_s25, %s3626_s25 }
 0x289   :  { %v3417_v41 = vmax.f32 %v3401_v23, 0.0  ;;  %v3102_v8 = vadd.f32 %v4160_v6, %v2676_v39  ;;  %v3431_v36 = vpack.c.bf16 %v3419_v42, %v3418_v15  ;;  %v3381_v0 = vadd.f32 %v5502_v54, %v3099_v51  ;;  %v5676_v54 = vld [vmem:[#allocation29_spill] sm:$0xff]  ;;  %v3361_v22 = vpop.f32.mrf.mxu0  ;;  %p4307_p10 = scmp.ne.s32.totalorder %s3626_s25, %s4306_s26  ;;  %p4312_p12 = scmp.lt.s32.totalorder %s4306_s26, %s4306_s26 }
 0x28a   :  { %v3063_v50 = vpop.f32.mrf.mxu1  ;;  %v3406_v59 = vadd.f32 %v5491_v20, %v3383_v56  ;;  %v2677_v45 = vadd.f32 %v5676_v54, %v2474_v37  ;;  %v4258_v31 = vld [vmem:[#allocation3 + $0x50] sm:$0xff] }
 0x28b   :  { %v3430_v2 = vpack.c.bf16 %v3417_v41, %v3416_v58  ;;  %v3384_v44 = vadd.f32 %v4178_v21, %v3102_v8  ;;  %v3100_v63 = vadd.f32 %v3063_v50, %v2674_v11  ;;  %v3404_v48 = vadd.f32 %v5491_v20, %v3381_v0  ;;  %v5677_v21 = vld [vmem:[#allocation30_spill] sm:$0xff]  ;;  %v4251_v8 = vld [vmem:[#allocation3] sm:$0xff]  ;;  %p4313_p13 = por %p4312_p12, %p4311_p11 }
 0x28c   :  { %v4163_v49 = vpop.f32.mrf.mxu1  ;;  %v2680_v40 = vadd.f32 %v5677_v21, %v2477_v47  ;;  %v3422_v57 = vmax.f32 %v3406_v59, 0.0  ;;  %v4252_v11 = vld [vmem:[#allocation3 + $0x18] sm:$0xff] }
 0x28d   :  { %v3407_v46 = vadd.f32 %v5491_v20, %v3384_v44  ;;  %v3105_v7 = vadd.f32 %v4163_v49, %v2679_v55  ;;  %4189 = vmatprep.mubr.msk.bf16.mxu1 %vm994_vm14, %v3430_v2  ;;  %v3382_v4 = vadd.f32 %v3345_v3, %v3100_v63  ;;  %v3420_v12 = vmax.f32 %v3404_v48, 0.0  ;;  %v4255_v48 = vld [vmem:[#allocation3 + $0x20] sm:$0xff]  ;;  %p4314_p0 = pnand %p4313_p13, %p4307_p10 }
 0x28e   :  { %v3076_v43 = vpop.f32.mrf.mxu1  ;;  %4190 = vmatmul.mubr.msk.bf16.gmra.mxu1 %vm994_vm14, %v3431_v36 }
 0x28f   :  { %v3423_v26 = vmax.f32 %v3407_v46, 0.0  ;;  %v3387_v5 = vadd.f32 %v4181_v53, %v3105_v7  ;;  %v3103_v35 = vadd.f32 %v3076_v43, %v2677_v45  ;;  %v3405_v27 = vadd.f32 %v5491_v20, %v3382_v4 }
 0x290   :  { %v4164_v13 = vpop.f32.mrf.mxu1 }
 0x291   :  { %v3433_v16 = vpack.c.bf16 %v3423_v26, %v3422_v57  ;;  %v3385_v1 = vadd.f32 %v3358_v33, %v3103_v35  ;;  %v3106_v60 = vadd.f32 %v4164_v13, %v2680_v40  ;;  %v3421_v3 = vmax.f32 %v3405_v27, 0.0  ;;  %v4256_v57 = vld [vmem:[#allocation3 + $0x38] sm:$0xff] }
 0x292   :  { %v3079_v52 = vpop.f32.mrf.mxu1  ;;  %v3410_v32 = vadd.f32 %v5491_v20, %v3387_v5 }
 0x293   :  { %v3388_v62 = vadd.f32 %v4182_v38, %v3106_v60  ;;  %v3104_v19 = vadd.f32 %v3079_v52, %v2678_v30  ;;  %v3432_v9 = vpack.c.bf16 %v3421_v3, %v3420_v12  ;;  %v3408_v39 = vadd.f32 %v5491_v20, %v3385_v1  ;;  %v4257_v38 = vld [vmem:[#allocation3 + $0x28] sm:$0xff] }
 0x294   :  { %v3426_v24 = vmax.f32 %v3410_v32, 0.0  ;;  %v4259_v32 = vld [vmem:[#allocation3 + $0x40] sm:$0xff] }
 0x295   :  { %v3411_v25 = vadd.f32 %v5491_v20, %v3388_v62  ;;  %v3386_v10 = vadd.f32 %v3361_v22, %v3104_v19  ;;  %4193 = vmatprep.mubr.msk.bf16.mxu1 %vm994_vm14, %v3432_v9  ;;  %v3424_v51 = vmax.f32 %v3408_v39, 0.0  ;;  %v4260_v39 = vld [vmem:[#allocation3 + $0x58] sm:$0xff] }
 0x296   :  { %4194 = vmatmul.mubr.msk.bf16.gmra.mxu1 %vm994_vm14, %v3433_v16 }
 0x297   :  { %v3427_v23 = vmax.f32 %v3411_v25, 0.0  ;;  %v3409_v56 = vadd.f32 %v5491_v20, %v3386_v10  ;;  %v4250_v20 = vld [vmem:[#allocation3 + $0x10] sm:$0xff] }
 0x299   :  { %v3435_v28 = vpack.c.bf16 %v3427_v23, %v3426_v24  ;;  %v3425_v29 = vmax.f32 %v3409_v56, 0.0  ;;  %v4261_v56 = vld [vmem:[#allocation3 + $0x48] sm:$0xff] }
 0x29b   :  { %v3434_v14 = vpack.c.bf16 %v3425_v29, %v3424_v51 }
 0x29d   :  { %4197 = vmatprep.mubr.msk.bf16.mxu1 %vm994_vm14, %v3434_v14 }
 0x29e   :  { %4198 = vmatmul.mubr.msk.bf16.gmra.mxu1 %vm994_vm14, %v3435_v28 }
 0x346   :  { %v4187_v53 = vpop.f32.mrf.mxu1 }
 0x347   :  { %v3518_v15 = vadd.f32 %v4187_v53, %v5571_v61  ;;  %v4262_v53 = vld [vmem:[#allocation3 + $0x70] sm:$0xff] }
 0x348   :  { %v3509_v42 = vpop.f32.mrf.mxu1 }
 0x349   :  { %v3574_v6 = vadd.f32 %v4250_v20, %v3518_v15  ;;  %v3510_v37 = vadd.f32 %v5571_v61, %v3509_v42 }
 0x34a   :  { %v4188_v58 = vpop.f32.mrf.mxu1 }
 0x34b   :  { %v3590_v41 = vmax.f32 %v3574_v6, 0.0  ;;  %v3572_v47 = vadd.f32 %v4251_v8, %v3510_v37  ;;  %v3521_v36 = vadd.f32 %v4188_v58, %v5571_v61  ;;  %v4263_v37 = vld [vmem:[#allocation3 + $0x60] sm:$0xff] }
 0x34c   :  { %v3512_v0 = vpop.f32.mrf.mxu1 }
 0x34d   :  { %3606 = vst.msk [vmem:[#allocation8 + $0x10] sm:$0xff] %vm119_vm0, %v3590_v41  ;;  %v3588_v18 = vmax.f32 %v3572_v47, 0.0  ;;  %v3575_v50 = vadd.f32 %v4252_v11, %v3521_v36  ;;  %v3513_v2 = vadd.f32 %v5571_v61, %v3512_v0  ;;  %v4264_v36 = vld [vmem:[#allocation3 + $0x78] sm:$0xff] }
 0x34e   :  { %v4191_v59 = vpop.f32.mrf.mxu1 }
 0x34f   :  { %3604 = vst.msk [vmem:[#allocation8] sm:$0xff] %vm119_vm0, %v3588_v18  ;;  %v3591_v44 = vmax.f32 %v3575_v50, 0.0  ;;  %v3573_v55 = vadd.f32 %v4253_v17, %v3513_v2  ;;  %v3534_v33 = vadd.f32 %v4191_v59, %v5571_v61  ;;  %v4265_v50 = vld [vmem:[#allocation3 + $0x68] sm:$0xff] }
 0x350   :  { %v3525_v63 = vpop.f32.mrf.mxu1 }
 0x351   :  { %3607 = vst.msk [vmem:[#allocation8 + $0x18] sm:$0xff] %vm119_vm0, %v3591_v44  ;;  %v3589_v49 = vmax.f32 %v3573_v55, 0.0  ;;  %v3578_v46 = vadd.f32 %v4254_v34, %v3534_v33  ;;  %v3526_v7 = vadd.f32 %v5571_v61, %v3525_v63 }
 0x352   :  { %v4192_v54 = vpop.f32.mrf.mxu1 }
 0x353   :  { %3605 = vst.msk [vmem:[#allocation8 + $0x8] sm:$0xff] %vm119_vm0, %v3589_v49  ;;  %v3594_v45 = vmax.f32 %v3578_v46, 0.0  ;;  %v3576_v4 = vadd.f32 %v4255_v48, %v3526_v7  ;;  %v3537_v43 = vadd.f32 %v4192_v54, %v5571_v61 }
 0x354   :  { %v3528_v21 = vpop.f32.mrf.mxu1 }
 0x355   :  { %3610 = vst.msk [vmem:[#allocation8 + $0x30] sm:$0xff] %vm119_vm0, %v3594_v45  ;;  %v3592_v40 = vmax.f32 %v3576_v4, 0.0  ;;  %v3579_v26 = vadd.f32 %v4256_v57, %v3537_v43  ;;  %v3529_v5 = vadd.f32 %v5571_v61, %v3528_v21 }
 0x356   :  { %v4195_v13 = vpop.f32.mrf.mxu1 }
 0x357   :  { %3608 = vst.msk [vmem:[#allocation8 + $0x20] sm:$0xff] %vm119_vm0, %v3592_v40  ;;  %v3595_v35 = vmax.f32 %v3579_v26, 0.0  ;;  %v3577_v27 = vadd.f32 %v4257_v38, %v3529_v5  ;;  %v3550_v16 = vadd.f32 %v4195_v13, %v5571_v61 }
 0x358   :  { %v3541_v60 = vpop.f32.mrf.mxu1 }
 0x359   :  { %3611 = vst.msk [vmem:[#allocation8 + $0x38] sm:$0xff] %vm119_vm0, %v3595_v35  ;;  %v3593_v1 = vmax.f32 %v3577_v27, 0.0  ;;  %v3582_v30 = vadd.f32 %v4258_v31, %v3550_v16  ;;  %v3542_v12 = vadd.f32 %v5571_v61, %v3541_v60 }
 0x35a   :  { %v4196_v3 = vpop.f32.mrf.mxu1 }
 0x35b   :  { %3609 = vst.msk [vmem:[#allocation8 + $0x28] sm:$0xff] %vm119_vm0, %v3593_v1  ;;  %v3598_v52 = vmax.f32 %v3582_v30, 0.0  ;;  %v3580_v62 = vadd.f32 %v4259_v32, %v3542_v12  ;;  %v3553_v19 = vadd.f32 %v4196_v3, %v5571_v61 }
 0x35c   :  { %v3544_v22 = vpop.f32.mrf.mxu1 }
 0x35d   :  { %3614 = vst.msk [vmem:[#allocation8 + $0x50] sm:$0xff] %vm119_vm0, %v3598_v52  ;;  %v3596_v9 = vmax.f32 %v3580_v62, 0.0  ;;  %v3583_v25 = vadd.f32 %v4260_v39, %v3553_v19  ;;  %v3545_v10 = vadd.f32 %v5571_v61, %v3544_v22 }
 0x35e   :  { %v4199_v24 = vpop.f32.mrf.mxu1 }
 0x35f   :  { %3612 = vst.msk [vmem:[#allocation8 + $0x40] sm:$0xff] %vm119_vm0, %v3596_v9  ;;  %v3599_v23 = vmax.f32 %v3583_v25, 0.0  ;;  %v3581_v51 = vadd.f32 %v4261_v56, %v3545_v10  ;;  %v3566_v28 = vadd.f32 %v4199_v24, %v5571_v61 }
 0x360   :  { %v3557_v29 = vpop.f32.mrf.mxu1 }
 0x361   :  { %3615 = vst.msk [vmem:[#allocation8 + $0x58] sm:$0xff] %vm119_vm0, %v3599_v23  ;;  %v3597_v14 = vmax.f32 %v3581_v51, 0.0  ;;  %v3586_v15 = vadd.f32 %v4262_v53, %v3566_v28  ;;  %v3558_v42 = vadd.f32 %v5571_v61, %v3557_v29 }
 0x362   :  { %v4200_v20 = vpop.f32.mrf.mxu1 }
 0x363   :  { %3613 = vst.msk [vmem:[#allocation8 + $0x48] sm:$0xff] %vm119_vm0, %v3597_v14  ;;  %v3602_v6 = vmax.f32 %v3586_v15, 0.0  ;;  %v3584_v58 = vadd.f32 %v4263_v37, %v3558_v42  ;;  %v3569_v41 = vadd.f32 %v4200_v20, %v5571_v61 }
 0x364   :  { %v3560_v8 = vpop.f32.mrf.mxu1 }
 0x365   :  { %3618 = vst.msk [vmem:[#allocation8 + $0x70] sm:$0xff] %vm119_vm0, %v3602_v6  ;;  %v3600_v47 = vmax.f32 %v3584_v58, 0.0  ;;  %v3587_v0 = vadd.f32 %v4264_v36, %v3569_v41  ;;  %v3561_v18 = vadd.f32 %v5571_v61, %v3560_v8 }
 0x367   :  { %3616 = vst.msk [vmem:[#allocation8 + $0x60] sm:$0xff] %vm119_vm0, %v3600_v47  ;;  %v3603_v11 = vmax.f32 %v3587_v0, 0.0  ;;  %v3585_v2 = vadd.f32 %v4265_v50, %v3561_v18 }
 0x369   :  { %3619 = vst.msk [vmem:[#allocation8 + $0x78] sm:$0xff] %vm119_vm0, %v3603_v11  ;;  %v3601_v59 = vmax.f32 %v3585_v2, 0.0 }
 0x36b   :  { %3617 = vst.msk [vmem:[#allocation8 + $0x68] sm:$0xff] %vm119_vm0, %v3601_v59 }
 0x36c   :  { %4317 = shalt.err (!%p4314_p0)
}
 0x36d   :  { %3631 = dma.vmem_to_hbm [thread:$0]  %s3626_s25, 2048, %s5618_s7, [#allocation5], %s4333_s27, %s4333_s27, %s4334_s28  }
 0x36e   :  { %4330 = dma.done.wait [#allocation5], 2048  }
 0x36f   :  { %4331 = vsyncadd [#allocation5], 4294965248 }
 0x370   :  { %3635 = vsyncpa [#allocation4], 1 }
 0x371   :  { %3636 = vsyncpa [#allocation7], 1 }
 0x372   :  { %3637 = vsyncpa [#allocation5], 1 }

</bundles_post_ra>
